<compile_context>
chip_gen: v5e
topology: v5e:2x2
jax: 0.10.0
libtpu: 0.0.40
codegen_flags: <defaults>
</compile_context>

<pallas_src>
import math

import jax
import jax.numpy as jnp
from jax.experimental import pallas as pl
from jax.experimental.pallas import tpu as pltpu

# ----------------------------- small demo config -----------------------------
BATCH = 2
IN_CH = 4            # "num_imgs" in the PyTorch module (conv in-channels)
IMG_H, IMG_W = 16, 16
PATCH = 4
EMB = 32
NUM_HEADS = 8
KEY_DIM = EMB // NUM_HEADS
HIDDEN = 64
NUM_QUERIES = 8
NUM_CLS = 1
NUM_ENC_BLOCKS = 2
NUM_DEC_BLOCKS = 2
NUM_PATCHES = (IMG_H // PATCH) * (IMG_W // PATCH)
HEAD_N = (NUM_CLS + 1) + 4          # fused cls|bbox head width

# stacked parameter counts / index layout used inside the kernel
NUM_ATTN = NUM_ENC_BLOCKS + 2 + NUM_DEC_BLOCKS   # enc MSAs, dec self, dec cross, dec MSAs
NUM_MLP = NUM_ENC_BLOCKS + 1 + NUM_DEC_BLOCKS    # enc MLPs, dec MLP, dec-block MLPs
NUM_LN = 2 * NUM_ENC_BLOCKS + 3 + 2 * NUM_DEC_BLOCKS


# ------------------------------ fused kernel ---------------------------------
def _detr_kernel(x_ref, pw_ref, pb_ref, pos_ref, qpos_ref,
                 awqkv_ref, abqkv_ref, awo_ref,
                 mw1_ref, mb1_ref, mw2_ref, mb2_ref,
                 lng_ref, lnb_ref, hw_ref, hb_ref,
                 kmask_e_ref, vmask_e_ref, kmask_d_ref, vmask_d_ref, seg_d_ref,
                 out_ref):
    e = EMB
    nh = NUM_HEADS
    inv_sqrt_kd = 1.0 / math.sqrt(KEY_DIM)
    bf16 = jnp.bfloat16

    kmask_enc = kmask_e_ref[...]     # (E, H*Np)   bf16 block-diag mask for K^T
    vmask_enc = vmask_e_ref[...]     # (H*Np, E)   bf16 block-diag mask for V
    kmask_dec = kmask_d_ref[...]     # (E, H*Nq)
    vmask_dec = vmask_d_ref[...]     # (H*Nq, E)
    seg_dec = seg_d_ref[...]         # (H*Nq, H)   f32 per-head segment-sum matrix

    def dot_bf16(a, b):
        # bf16 MXU operands, f32 accumulation.
        return jnp.dot(a.astype(bf16), b.astype(bf16),
                       preferred_element_type=jnp.float32)

    def layernorm(x, idx):
        mu = jnp.mean(x, axis=-1, keepdims=True)
        xc = x - mu
        var = jnp.mean(xc * xc, axis=-1, keepdims=True)
        return xc * jax.lax.rsqrt(var + 1e-5) * lng_ref[idx] + lnb_ref[idx]

    def mlp(x, idx):
        h = dot_bf16(x, mw1_ref[idx]) + mb1_ref[idx]
        # exact (erf) GELU, matching torch.nn.GELU default, in f32
        h = 0.5 * h * (1.0 + jax.lax.erf(h * (1.0 / math.sqrt(2.0))))
        return dot_bf16(h, mw2_ref[idx]) + mb2_ref[idx]

    def mha(x_q, x_kv, idx, kmask, vmask, *, self_attn, softmax_over_queries,
            seg=None):
        """All heads in one shot via block-diagonal K^T / V matrices."""
        wqkv = awqkv_ref[idx]                      # (E, 3E) fused per-head Q|K|V
        bqkv = abqkv_ref[idx]                      # (1, 3E)
        if self_attn:
            qkv = dot_bf16(x_q, wqkv) + bqkv       # single fused projection
            q, k, v = qkv[:, :e], qkv[:, e:2 * e], qkv[:, 2 * e:]
        else:
            q = dot_bf16(x_q, wqkv[:, :e]) + bqkv[:, :e]
            kv = dot_bf16(x_kv, wqkv[:, e:]) + bqkv[:, e:]
            k, v = kv[:, :e], kv[:, e:]

        # single bf16 cast per operand, then tile+mask in bf16 (exact: mask is 0/1)
        q_bf = q.astype(bf16)                      # (Sq, E)
        kt_bf = k.T.astype(bf16)                   # (E, Sk)  transpose in f32, cast once
        v_bf = v.astype(bf16)                      # (Sk, E)

        # scores for every (head, key) pair in ONE matmul: (Sq, H*Sk)
        kbd = jnp.concatenate([kt_bf] * nh, axis=1) * kmask
        scores = jnp.dot(q_bf, kbd,
                         preferred_element_type=jnp.float32) * inv_sqrt_kd

        if softmax_over_queries:
            # reference: F.softmax(scores, dim=1) on (B, Sq, Sk) -> query axis.
            # Every column of the block-diag score matrix is one (head, key)
            # pair, so a plain column softmax is exact.
            scores = scores - jnp.max(scores, axis=0, keepdims=True)
            ex = jnp.exp(scores)
            attn = ex * pl.reciprocal(jnp.sum(ex, axis=0, keepdims=True),
                                      approx=True)
        else:
            # reference: F.softmax(scores, dim=1) on 2-D (Sq, Sk) -> key axis,
            # i.e. normalize each head's Sk-wide segment of every row.
            # Row-global max is one constant per row (same within every
            # segment) -> valid softmax shift.
            scores = scores - jnp.max(scores, axis=1, keepdims=True)
            ex = jnp.exp(scores)
            inv_h = pl.reciprocal(
                jnp.dot(ex, seg, preferred_element_type=jnp.float32),
                approx=True)                                        # (Sq, H)
            attn = ex * jnp.dot(inv_h, seg.T,
                                preferred_element_type=jnp.float32)  # broadcast

        # weighted values for all heads in ONE matmul; result == concat(heads)
        vbd = jnp.concatenate([v_bf] * nh, axis=0) * vmask           # (H*Sk, E)
        z = jnp.dot(attn.astype(bf16), vbd,
                    preferred_element_type=jnp.float32)              # (Sq, E)
        return dot_bf16(z, awo_ref[idx])                             # Z @ W

    def block(x, attn_idx, mlp_idx, ln_idx, kmask, vmask):
        # TransformerBlock: LN1 -> MSA -> +x -> LN2 -> MLP -> +add (dropout=id)
        h = layernorm(x, ln_idx)
        add = x + mha(h, h, attn_idx, kmask, vmask,
                      self_attn=True, softmax_over_queries=True)
        h2 = layernorm(add, ln_idx + 1)
        return add + mlp(h2, mlp_idx)

    # ---- patch embedding + positional embedding (one batch elem / step) ----
    feats = dot_bf16(x_ref[0], pw_ref[...]) + pb_ref[...] + pos_ref[...]  # (Np,E)

    # ---- encoder ----
    for i in range(NUM_ENC_BLOCKS):
        feats = block(feats, i, i, 2 * i, kmask_enc, vmask_enc)

    # ---- decoder ----
    a0 = NUM_ENC_BLOCKS          # attn idx of decoder self-attention
    m0 = NUM_ENC_BLOCKS          # mlp idx of decoder MLP
    l0 = 2 * NUM_ENC_BLOCKS      # ln idx of decoder ln1
    queries = qpos_ref[...]                                   # (Nq, E), 2-D
    # (batch-independent prologue; tiny (8x32) work, recomputed per grid step
    #  because scratch is per-core under "parallel" megacore sharding)
    q_sa = mha(queries, queries, a0, kmask_dec, vmask_dec,
               self_attn=True, softmax_over_queries=False, seg=seg_dec)
    queries = layernorm(queries + q_sa, l0)
    cross = mha(queries, feats, a0 + 1, kmask_enc, vmask_enc,
                self_attn=False, softmax_over_queries=True)
    features = cross + queries
    features1 = layernorm(features, l0 + 1)
    features = mlp(features1, m0) + features1
    features = layernorm(features, l0 + 2)
    for i in range(NUM_DEC_BLOCKS):
        features = block(features, a0 + 2 + i, m0 + 1 + i, l0 + 3 + 2 * i,
                         kmask_dec, vmask_dec)

    # ---- fused classification / bbox heads (single lane-packed output) ----
    y = dot_bf16(features, hw_ref[...]) + hb_ref[...]          # (Nq, HEAD_N)
    out_ref[0] = jnp.concatenate(
        [y[:, :NUM_CLS + 1], jax.nn.sigmoid(y[:, NUM_CLS + 1:])], axis=1)


# ------------------------------ wrapper (glue) --------------------------------
def _whole(shape):
    """BlockSpec for a weight that stays fully resident across the grid."""
    return pl.BlockSpec(shape, lambda i: (0,) * len(shape))


def detr_forward(params, img):
    b, c, h, w = img.shape
    hp, wp = h // PATCH, w // PATCH
    np_ = hp * wp
    cpp = c * PATCH * PATCH
    e = EMB
    # patch extraction (pure reshape/transpose glue; the conv == matmul runs
    # inside the kernel as the patch-embedding dot)
    patches = img.reshape(b, c, hp, PATCH, wp, PATCH)
    patches = patches.transpose(0, 2, 4, 1, 3, 5).reshape(b, np_, cpp)

    in_specs = [
        pl.BlockSpec((1, np_, cpp), lambda i: (i, 0, 0)),   # patches (per batch)
        _whole((cpp, e)),                                   # patch_w
        _whole((1, e)),                                     # patch_b
        _whole((np_, e)),                                   # pos_emb
        _whole((NUM_QUERIES, e)),                           # query_pos
        _whole((NUM_ATTN, e, 3 * e)),                       # attn_wqkv
        _whole((NUM_ATTN, 1, 3 * e)),                       # attn_bqkv
        _whole((NUM_ATTN, e, e)),                           # attn_wo
        _whole((NUM_MLP, e, HIDDEN)),                       # mlp_w1
        _whole((NUM_MLP, 1, HIDDEN)),                       # mlp_b1
        _whole((NUM_MLP, HIDDEN, e)),                       # mlp_w2
        _whole((NUM_MLP, 1, e)),                            # mlp_b2
        _whole((NUM_LN, 1, e)),                             # ln gamma
        _whole((NUM_LN, 1, e)),                             # ln beta
        _whole((e, HEAD_N)),                                # head_w (cls|bbox)
        _whole((1, HEAD_N)),                                # head_b
        _whole((e, NUM_HEADS * np_)),                       # kmask_enc (bf16)
        _whole((NUM_HEADS * np_, e)),                       # vmask_enc (bf16)
        _whole((e, NUM_HEADS * NUM_QUERIES)),               # kmask_dec (bf16)
        _whole((NUM_HEADS * NUM_QUERIES, e)),               # vmask_dec (bf16)
        _whole((NUM_HEADS * NUM_QUERIES, NUM_HEADS)),       # seg_dec (f32)
    ]
    out = pl.pallas_call(
        _detr_kernel,
        grid=(b,),
        in_specs=in_specs,
        out_specs=pl.BlockSpec((1, NUM_QUERIES, HEAD_N), lambda i: (i, 0, 0)),
        out_shape=jax.ShapeDtypeStruct((b, NUM_QUERIES, HEAD_N), jnp.float32),
        compiler_params=pltpu.CompilerParams(
            dimension_semantics=("parallel",)),
    )(patches,
      params["patch_w"], params["patch_b"], params["pos_emb"], params["query_pos"],
      params["attn_wqkv"], params["attn_bqkv"], params["attn_wo"],
      params["mlp_w1"], params["mlp_b1"], params["mlp_w2"], params["mlp_b2"],
      params["ln_g"], params["ln_b"],
      params["head_w"], params["head_b"],
      params["kmask_enc"], params["vmask_enc"],
      params["kmask_dec"], params["vmask_dec"], params["seg_dec"])
    return {"logits": out[..., :NUM_CLS + 1], "bbox": out[..., NUM_CLS + 1:]}


# --------------------------- parameter initialization -------------------------
def _nrm(key, shape, scale=0.1):
    return scale * jax.random.normal(key, shape, dtype=jnp.float32)


def _attn_set(key, e):
    # per-head Q/K/V Linear layers stacked column-wise -> fused (E, 3E)
    ks = jax.random.split(key, 7)
    wqkv = jnp.concatenate(
        [_nrm(ks[0], (e, e)), _nrm(ks[1], (e, e)), _nrm(ks[2], (e, e))], axis=1)
    bqkv = jnp.concatenate(
        [_nrm(ks[3], (1, e)), _nrm(ks[4], (1, e)), _nrm(ks[5], (1, e))], axis=1)
    wo = _nrm(ks[6], (e, e))
    return wqkv, bqkv, wo


def _mlp_set(key, e, hid):
    ks = jax.random.split(key, 4)
    return (_nrm(ks[0], (e, hid)), _nrm(ks[1], (1, hid)),
            _nrm(ks[2], (hid, e)), _nrm(ks[3], (1, e)))


def _head_masks(e, kd, h, sk):
    """Block-diagonalization masks for the all-heads-at-once attention."""
    ehead = jnp.arange(e, dtype=jnp.int32) // kd              # head of emb column
    chead = jnp.arange(h * sk, dtype=jnp.int32) // sk         # head of score column
    kmask = (ehead[:, None] == chead[None, :]).astype(jnp.float32)   # (E, H*Sk)
    vmask = (chead[:, None] == ehead[None, :]).astype(jnp.float32)   # (H*Sk, E)
    seg = (chead[:, None] ==
           jnp.arange(h, dtype=jnp.int32)[None, :]).astype(jnp.float32)  # (H*Sk, H)
    return kmask, vmask, seg


def init_params(key):
    e, hid = EMB, HIDDEN
    cpp = IN_CH * PATCH * PATCH
    ks = jax.random.split(key, 9)

    # attn index order: enc blocks, dec self-attn, dec cross-attn, dec blocks
    attn_sets = [_attn_set(k, e) for k in jax.random.split(ks[0], NUM_ATTN)]
    # mlp index order: enc blocks, dec MLP, dec blocks
    mlp_sets = [_mlp_set(k, e, hid) for k in jax.random.split(ks[1], NUM_MLP)]

    kmask_enc, vmask_enc, _ = _head_masks(e, KEY_DIM, NUM_HEADS, NUM_PATCHES)
    kmask_dec, vmask_dec, seg_dec = _head_masks(e, KEY_DIM, NUM_HEADS, NUM_QUERIES)

    bf16 = jnp.bfloat16
    return dict(
        patch_w=_nrm(ks[2], (cpp, e)).astype(bf16),
        patch_b=_nrm(ks[3], (1, e)),
        pos_emb=_nrm(ks[4], (NUM_PATCHES, e), scale=1.0),
        query_pos=_nrm(ks[5], (NUM_QUERIES, e), scale=1.0),
        attn_wqkv=jnp.stack([s[0] for s in attn_sets]).astype(bf16),
        attn_bqkv=jnp.stack([s[1] for s in attn_sets]),
        attn_wo=jnp.stack([s[2] for s in attn_sets]).astype(bf16),
        mlp_w1=jnp.stack([s[0] for s in mlp_sets]).astype(bf16),
        mlp_b1=jnp.stack([s[1] for s in mlp_sets]),
        mlp_w2=jnp.stack([s[2] for s in mlp_sets]).astype(bf16),
        mlp_b2=jnp.stack([s[3] for s in mlp_sets]),
        ln_g=jnp.ones((NUM_LN, 1, e), jnp.float32),
        ln_b=jnp.zeros((NUM_LN, 1, e), jnp.float32),
        head_w=jnp.concatenate(
            [_nrm(ks[6], (e, NUM_CLS + 1)), _nrm(ks[7], (e, 4))],
            axis=1).astype(bf16),
        head_b=jnp.concatenate(
            [_nrm(ks[8], (1, NUM_CLS + 1)), jnp.zeros((1, 4), jnp.float32)],
            axis=1),
        # 0/1 masks are exact in bf16; applied to already-bf16 operands in-kernel
        kmask_enc=kmask_enc.astype(bf16), vmask_enc=vmask_enc.astype(bf16),
        kmask_dec=kmask_dec.astype(bf16), vmask_dec=vmask_dec.astype(bf16),
        seg_dec=seg_dec,
    )


# ----------------------------------- main -------------------------------------
if __name__ == "__main__":
    key = jax.random.PRNGKey(0)
    pkey, xkey = jax.random.split(key)
    params = init_params(pkey)
    x = jax.random.normal(xkey, (BATCH, IN_CH, IMG_H, IMG_W), dtype=jnp.float32)

    fwd = jax.jit(detr_forward)
    out = fwd(params, x)
    jax.block_until_ready(out)

    assert out["logits"].shape == (BATCH, NUM_QUERIES, NUM_CLS + 1)
    assert out["bbox"].shape == (BATCH, NUM_QUERIES, 4)
    assert bool(jnp.all(jnp.isfinite(out["logits"])))
    assert bool(jnp.all(jnp.isfinite(out["bbox"])))
    print("KERNEL_OK")
</pallas_src>

<mosaic_0001>
module attributes {stable_mosaic.version = 11 : i64} {
  func.func @_detr_kernel(%arg0: i32, %arg1: memref<1x16x64xf32, #tpu.memory_space<vmem>>, %arg2: memref<64x32xbf16, #tpu.memory_space<vmem>>, %arg3: memref<1x32xf32, #tpu.memory_space<vmem>>, %arg4: memref<16x32xf32, #tpu.memory_space<vmem>>, %arg5: memref<8x32xf32, #tpu.memory_space<vmem>>, %arg6: memref<6x32x96xbf16, #tpu.memory_space<vmem>>, %arg7: memref<6x1x96xf32, #tpu.memory_space<vmem>>, %arg8: memref<6x32x32xbf16, #tpu.memory_space<vmem>>, %arg9: memref<5x32x64xbf16, #tpu.memory_space<vmem>>, %arg10: memref<5x1x64xf32, #tpu.memory_space<vmem>>, %arg11: memref<5x64x32xbf16, #tpu.memory_space<vmem>>, %arg12: memref<5x1x32xf32, #tpu.memory_space<vmem>>, %arg13: memref<11x1x32xf32, #tpu.memory_space<vmem>>, %arg14: memref<11x1x32xf32, #tpu.memory_space<vmem>>, %arg15: memref<32x6xbf16, #tpu.memory_space<vmem>>, %arg16: memref<1x6xf32, #tpu.memory_space<vmem>>, %arg17: memref<32x128xbf16, #tpu.memory_space<vmem>>, %arg18: memref<128x32xbf16, #tpu.memory_space<vmem>>, %arg19: memref<32x64xbf16, #tpu.memory_space<vmem>>, %arg20: memref<64x32xbf16, #tpu.memory_space<vmem>>, %arg21: memref<64x8xf32, #tpu.memory_space<vmem>>, %arg22: memref<1x8x6xf32, #tpu.memory_space<vmem>>) attributes {dimension_semantics = [#tpu.dimension_semantics<parallel>], iteration_bounds = array<i64: 2>, scalar_prefetch = 0 : i64, scratch_operands = 0 : i64, tpu.core_type = #tpu.core_type<tc>, window_params = [{transform_indices = @transform_0, window_bounds = array<i64: 1, 16, 64>}, {pipeline_mode = #tpu.pipeline_mode<synchronous>, transform_indices = @transform_1, window_bounds = array<i64: 64, 32>}, {pipeline_mode = #tpu.pipeline_mode<synchronous>, transform_indices = @transform_2, window_bounds = array<i64: 1, 32>}, {pipeline_mode = #tpu.pipeline_mode<synchronous>, transform_indices = @transform_3, window_bounds = array<i64: 16, 32>}, {pipeline_mode = #tpu.pipeline_mode<synchronous>, transform_indices = @transform_4, window_bounds = array<i64: 8, 32>}, {pipeline_mode = #tpu.pipeline_mode<synchronous>, transform_indices = @transform_5, window_bounds = array<i64: 6, 32, 96>}, {pipeline_mode = #tpu.pipeline_mode<synchronous>, transform_indices = @transform_6, window_bounds = array<i64: 6, 1, 96>}, {pipeline_mode = #tpu.pipeline_mode<synchronous>, transform_indices = @transform_7, window_bounds = array<i64: 6, 32, 32>}, {pipeline_mode = #tpu.pipeline_mode<synchronous>, transform_indices = @transform_8, window_bounds = array<i64: 5, 32, 64>}, {pipeline_mode = #tpu.pipeline_mode<synchronous>, transform_indices = @transform_9, window_bounds = array<i64: 5, 1, 64>}, {pipeline_mode = #tpu.pipeline_mode<synchronous>, transform_indices = @transform_10, window_bounds = array<i64: 5, 64, 32>}, {pipeline_mode = #tpu.pipeline_mode<synchronous>, transform_indices = @transform_11, window_bounds = array<i64: 5, 1, 32>}, {pipeline_mode = #tpu.pipeline_mode<synchronous>, transform_indices = @transform_12, window_bounds = array<i64: 11, 1, 32>}, {pipeline_mode = #tpu.pipeline_mode<synchronous>, transform_indices = @transform_13, window_bounds = array<i64: 11, 1, 32>}, {pipeline_mode = #tpu.pipeline_mode<synchronous>, transform_indices = @transform_14, window_bounds = array<i64: 32, 6>}, {pipeline_mode = #tpu.pipeline_mode<synchronous>, transform_indices = @transform_15, window_bounds = array<i64: 1, 6>}, {pipeline_mode = #tpu.pipeline_mode<synchronous>, transform_indices = @transform_16, window_bounds = array<i64: 32, 128>}, {pipeline_mode = #tpu.pipeline_mode<synchronous>, transform_indices = @transform_17, window_bounds = array<i64: 128, 32>}, {pipeline_mode = #tpu.pipeline_mode<synchronous>, transform_indices = @transform_18, window_bounds = array<i64: 32, 64>}, {pipeline_mode = #tpu.pipeline_mode<synchronous>, transform_indices = @transform_19, window_bounds = array<i64: 64, 32>}, {pipeline_mode = #tpu.pipeline_mode<synchronous>, transform_indices = @transform_20, window_bounds = array<i64: 64, 8>}, {transform_indices = @transform_21, window_bounds = array<i64: 1, 8, 6>}]} {
    %c0 = arith.constant 0 : index
    %c0_0 = arith.constant 0 : index
    %0 = vector.load %arg17[%c0, %c0_0] : memref<32x128xbf16, #tpu.memory_space<vmem>>, vector<32x128xbf16>
    %c0_1 = arith.constant 0 : index
    %c0_2 = arith.constant 0 : index
    %1 = vector.load %arg18[%c0_1, %c0_2] : memref<128x32xbf16, #tpu.memory_space<vmem>>, vector<128x32xbf16>
    %c0_3 = arith.constant 0 : index
    %c0_4 = arith.constant 0 : index
    %2 = vector.load %arg19[%c0_3, %c0_4] : memref<32x64xbf16, #tpu.memory_space<vmem>>, vector<32x64xbf16>
    %c0_5 = arith.constant 0 : index
    %c0_6 = arith.constant 0 : index
    %3 = vector.load %arg20[%c0_5, %c0_6] : memref<64x32xbf16, #tpu.memory_space<vmem>>, vector<64x32xbf16>
    %c0_7 = arith.constant 0 : index
    %c0_8 = arith.constant 0 : index
    %4 = vector.load %arg21[%c0_7, %c0_8] : memref<64x8xf32, #tpu.memory_space<vmem>>, vector<64x8xf32>
    %c0_9 = arith.constant 0 : index
    %c0_10 = arith.constant 0 : index
    %c0_11 = arith.constant 0 : index
    %5 = vector.load %arg1[%c0_9, %c0_10, %c0_11] : memref<1x16x64xf32, #tpu.memory_space<vmem>>, vector<1x16x64xf32>
    %6 = vector.shape_cast %5 : vector<1x16x64xf32> to vector<16x64xf32>
    %c0_12 = arith.constant 0 : index
    %c0_13 = arith.constant 0 : index
    %7 = vector.load %arg2[%c0_12, %c0_13] : memref<64x32xbf16, #tpu.memory_space<vmem>>, vector<64x32xbf16>
    %8 = arith.truncf %6 : vector<16x64xf32> to vector<16x64xbf16>
    %cst = arith.constant dense<0.000000e+00> : vector<16x32xf32>
    %9 = tpu.matmul %8, %7, %cst {dimension_numbers = #tpu.dot_dimension_numbers<[1], [0], [0], [1], [0, 0, 1, 1], [], []>} : vector<16x64xbf16>, vector<64x32xbf16>, vector<16x32xf32> -> vector<16x32xf32>
    %c0_14 = arith.constant 0 : index
    %c0_15 = arith.constant 0 : index
    %10 = vector.load %arg3[%c0_14, %c0_15] : memref<1x32xf32, #tpu.memory_space<vmem>>, vector<1x32xf32>
    %11 = vector.broadcast %10 : vector<1x32xf32> to vector<16x32xf32>
    %12 = arith.addf %9, %11 : vector<16x32xf32>
    %c0_16 = arith.constant 0 : index
    %c0_17 = arith.constant 0 : index
    %13 = vector.load %arg4[%c0_16, %c0_17] : memref<16x32xf32, #tpu.memory_space<vmem>>, vector<16x32xf32>
    %14 = arith.addf %12, %13 : vector<16x32xf32>
    %cst_18 = arith.constant dense<0.000000e+00> : vector<16xf32>
    %15 = vector.multi_reduction <add>, %14, %cst_18 [1] : vector<16x32xf32> to vector<16xf32>
    %16 = vector.shape_cast %15 : vector<16xf32> to vector<16x1xf32>
    %cst_19 = arith.constant 3.200000e+01 : f32
    %17 = vector.broadcast %cst_19 : f32 to vector<16x1xf32>
    %18 = arith.divf %16, %17 : vector<16x1xf32>
    %19 = vector.broadcast %18 : vector<16x1xf32> to vector<16x32xf32>
    %20 = arith.subf %14, %19 : vector<16x32xf32>
    %21 = arith.mulf %20, %20 : vector<16x32xf32>
    %cst_20 = arith.constant dense<0.000000e+00> : vector<16xf32>
    %22 = vector.multi_reduction <add>, %21, %cst_20 [1] : vector<16x32xf32> to vector<16xf32>
    %23 = vector.shape_cast %22 : vector<16xf32> to vector<16x1xf32>
    %cst_21 = arith.constant 3.200000e+01 : f32
    %24 = vector.broadcast %cst_21 : f32 to vector<16x1xf32>
    %25 = arith.divf %23, %24 : vector<16x1xf32>
    %cst_22 = arith.constant 9.99999974E-6 : f32
    %26 = vector.broadcast %cst_22 : f32 to vector<16x1xf32>
    %27 = arith.addf %25, %26 : vector<16x1xf32>
    %28 = math.rsqrt %27 : vector<16x1xf32>
    %29 = vector.broadcast %28 : vector<16x1xf32> to vector<16x32xf32>
    %30 = arith.mulf %20, %29 : vector<16x32xf32>
    %c0_23 = arith.constant 0 : index
    %c0_24 = arith.constant 0 : index
    %c0_25 = arith.constant 0 : index
    %31 = vector.load %arg13[%c0_23, %c0_24, %c0_25] : memref<11x1x32xf32, #tpu.memory_space<vmem>>, vector<1x1x32xf32>
    %32 = vector.shape_cast %31 : vector<1x1x32xf32> to vector<1x32xf32>
    %33 = vector.broadcast %32 : vector<1x32xf32> to vector<16x32xf32>
    %34 = arith.mulf %30, %33 : vector<16x32xf32>
    %c0_26 = arith.constant 0 : index
    %c0_27 = arith.constant 0 : index
    %c0_28 = arith.constant 0 : index
    %35 = vector.load %arg14[%c0_26, %c0_27, %c0_28] : memref<11x1x32xf32, #tpu.memory_space<vmem>>, vector<1x1x32xf32>
    %36 = vector.shape_cast %35 : vector<1x1x32xf32> to vector<1x32xf32>
    %37 = vector.broadcast %36 : vector<1x32xf32> to vector<16x32xf32>
    %38 = arith.addf %34, %37 : vector<16x32xf32>
    %c0_29 = arith.constant 0 : index
    %c0_30 = arith.constant 0 : index
    %c0_31 = arith.constant 0 : index
    %39 = vector.load %arg6[%c0_29, %c0_30, %c0_31] : memref<6x32x96xbf16, #tpu.memory_space<vmem>>, vector<1x32x96xbf16>
    %40 = vector.shape_cast %39 : vector<1x32x96xbf16> to vector<32x96xbf16>
    %c0_32 = arith.constant 0 : index
    %c0_33 = arith.constant 0 : index
    %c0_34 = arith.constant 0 : index
    %41 = vector.load %arg7[%c0_32, %c0_33, %c0_34] : memref<6x1x96xf32, #tpu.memory_space<vmem>>, vector<1x1x96xf32>
    %42 = vector.shape_cast %41 : vector<1x1x96xf32> to vector<1x96xf32>
    %43 = arith.truncf %38 : vector<16x32xf32> to vector<16x32xbf16>
    %cst_35 = arith.constant dense<0.000000e+00> : vector<16x96xf32>
    %44 = tpu.matmul %43, %40, %cst_35 {dimension_numbers = #tpu.dot_dimension_numbers<[1], [0], [0], [1], [0, 0, 1, 1], [], []>} : vector<16x32xbf16>, vector<32x96xbf16>, vector<16x96xf32> -> vector<16x96xf32>
    %45 = vector.broadcast %42 : vector<1x96xf32> to vector<16x96xf32>
    %46 = arith.addf %44, %45 : vector<16x96xf32>
    %47 = vector.extract_strided_slice %46 {offsets = [0, 0], sizes = [16, 32], strides = [1, 1]} : vector<16x96xf32> to vector<16x32xf32>
    %48 = vector.extract_strided_slice %46 {offsets = [0, 32], sizes = [16, 32], strides = [1, 1]} : vector<16x96xf32> to vector<16x32xf32>
    %49 = vector.extract_strided_slice %46 {offsets = [0, 64], sizes = [16, 32], strides = [1, 1]} : vector<16x96xf32> to vector<16x32xf32>
    %50 = arith.truncf %47 : vector<16x32xf32> to vector<16x32xbf16>
    %51 = tpu.transpose %48, [1, 0] : vector<16x32xf32> -> vector<32x16xf32>
    %52 = arith.truncf %51 : vector<32x16xf32> to vector<32x16xbf16>
    %53 = arith.truncf %49 : vector<16x32xf32> to vector<16x32xbf16>
    %54 = tpu.concatenate %52, %52, %52, %52, %52, %52, %52, %52 in 1 : vector<32x16xbf16>, vector<32x16xbf16>, vector<32x16xbf16>, vector<32x16xbf16>, vector<32x16xbf16>, vector<32x16xbf16>, vector<32x16xbf16>, vector<32x16xbf16> -> vector<32x128xbf16>
    %55 = arith.mulf %54, %0 : vector<32x128xbf16>
    %cst_36 = arith.constant dense<0.000000e+00> : vector<16x128xf32>
    %56 = tpu.matmul %50, %55, %cst_36 {dimension_numbers = #tpu.dot_dimension_numbers<[1], [0], [0], [1], [0, 0, 1, 1], [], []>} : vector<16x32xbf16>, vector<32x128xbf16>, vector<16x128xf32> -> vector<16x128xf32>
    %cst_37 = arith.constant 5.000000e-01 : f32
    %57 = vector.broadcast %cst_37 : f32 to vector<16x128xf32>
    %58 = arith.mulf %56, %57 : vector<16x128xf32>
    %cst_38 = arith.constant dense<0xFF800000> : vector<128xf32>
    %59 = vector.multi_reduction <maximumf>, %58, %cst_38 [0] : vector<16x128xf32> to vector<128xf32>
    %60 = vector.shape_cast %59 : vector<128xf32> to vector<1x128xf32>
    %61 = vector.broadcast %60 : vector<1x128xf32> to vector<16x128xf32>
    %62 = arith.subf %58, %61 : vector<16x128xf32>
    %63 = math.exp %62 : vector<16x128xf32>
    %cst_39 = arith.constant dense<0.000000e+00> : vector<128xf32>
    %64 = vector.multi_reduction <add>, %63, %cst_39 [0] : vector<16x128xf32> to vector<128xf32>
    %65 = vector.shape_cast %64 : vector<128xf32> to vector<1x128xf32>
    %66 = tpu.reciprocal %65 {approx = true} : vector<1x128xf32> -> vector<1x128xf32>
    %67 = vector.broadcast %66 : vector<1x128xf32> to vector<16x128xf32>
    %68 = arith.mulf %63, %67 : vector<16x128xf32>
    %69 = tpu.concatenate %53, %53, %53, %53, %53, %53, %53, %53 in 0 : vector<16x32xbf16>, vector<16x32xbf16>, vector<16x32xbf16>, vector<16x32xbf16>, vector<16x32xbf16>, vector<16x32xbf16>, vector<16x32xbf16>, vector<16x32xbf16> -> vector<128x32xbf16>
    %70 = arith.mulf %69, %1 : vector<128x32xbf16>
    %71 = arith.truncf %68 : vector<16x128xf32> to vector<16x128xbf16>
    %cst_40 = arith.constant dense<0.000000e+00> : vector<16x32xf32>
    %72 = tpu.matmul %71, %70, %cst_40 {dimension_numbers = #tpu.dot_dimension_numbers<[1], [0], [0], [1], [0, 0, 1, 1], [], []>} : vector<16x128xbf16>, vector<128x32xbf16>, vector<16x32xf32> -> vector<16x32xf32>
    %c0_41 = arith.constant 0 : index
    %c0_42 = arith.constant 0 : index
    %c0_43 = arith.constant 0 : index
    %73 = vector.load %arg8[%c0_41, %c0_42, %c0_43] : memref<6x32x32xbf16, #tpu.memory_space<vmem>>, vector<1x32x32xbf16>
    %74 = vector.shape_cast %73 : vector<1x32x32xbf16> to vector<32x32xbf16>
    %75 = arith.truncf %72 : vector<16x32xf32> to vector<16x32xbf16>
    %cst_44 = arith.constant dense<0.000000e+00> : vector<16x32xf32>
    %76 = tpu.matmul %75, %74, %cst_44 {dimension_numbers = #tpu.dot_dimension_numbers<[1], [0], [0], [1], [0, 0, 1, 1], [], []>} : vector<16x32xbf16>, vector<32x32xbf16>, vector<16x32xf32> -> vector<16x32xf32>
    %77 = arith.addf %14, %76 : vector<16x32xf32>
    %cst_45 = arith.constant dense<0.000000e+00> : vector<16xf32>
    %78 = vector.multi_reduction <add>, %77, %cst_45 [1] : vector<16x32xf32> to vector<16xf32>
    %79 = vector.shape_cast %78 : vector<16xf32> to vector<16x1xf32>
    %cst_46 = arith.constant 3.200000e+01 : f32
    %80 = vector.broadcast %cst_46 : f32 to vector<16x1xf32>
    %81 = arith.divf %79, %80 : vector<16x1xf32>
    %82 = vector.broadcast %81 : vector<16x1xf32> to vector<16x32xf32>
    %83 = arith.subf %77, %82 : vector<16x32xf32>
    %84 = arith.mulf %83, %83 : vector<16x32xf32>
    %cst_47 = arith.constant dense<0.000000e+00> : vector<16xf32>
    %85 = vector.multi_reduction <add>, %84, %cst_47 [1] : vector<16x32xf32> to vector<16xf32>
    %86 = vector.shape_cast %85 : vector<16xf32> to vector<16x1xf32>
    %cst_48 = arith.constant 3.200000e+01 : f32
    %87 = vector.broadcast %cst_48 : f32 to vector<16x1xf32>
    %88 = arith.divf %86, %87 : vector<16x1xf32>
    %cst_49 = arith.constant 9.99999974E-6 : f32
    %89 = vector.broadcast %cst_49 : f32 to vector<16x1xf32>
    %90 = arith.addf %88, %89 : vector<16x1xf32>
    %91 = math.rsqrt %90 : vector<16x1xf32>
    %92 = vector.broadcast %91 : vector<16x1xf32> to vector<16x32xf32>
    %93 = arith.mulf %83, %92 : vector<16x32xf32>
    %c1 = arith.constant 1 : index
    %c0_50 = arith.constant 0 : index
    %c0_51 = arith.constant 0 : index
    %94 = vector.load %arg13[%c1, %c0_50, %c0_51] : memref<11x1x32xf32, #tpu.memory_space<vmem>>, vector<1x1x32xf32>
    %95 = vector.shape_cast %94 : vector<1x1x32xf32> to vector<1x32xf32>
    %96 = vector.broadcast %95 : vector<1x32xf32> to vector<16x32xf32>
    %97 = arith.mulf %93, %96 : vector<16x32xf32>
    %c1_52 = arith.constant 1 : index
    %c0_53 = arith.constant 0 : index
    %c0_54 = arith.constant 0 : index
    %98 = vector.load %arg14[%c1_52, %c0_53, %c0_54] : memref<11x1x32xf32, #tpu.memory_space<vmem>>, vector<1x1x32xf32>
    %99 = vector.shape_cast %98 : vector<1x1x32xf32> to vector<1x32xf32>
    %100 = vector.broadcast %99 : vector<1x32xf32> to vector<16x32xf32>
    %101 = arith.addf %97, %100 : vector<16x32xf32>
    %c0_55 = arith.constant 0 : index
    %c0_56 = arith.constant 0 : index
    %c0_57 = arith.constant 0 : index
    %102 = vector.load %arg9[%c0_55, %c0_56, %c0_57] : memref<5x32x64xbf16, #tpu.memory_space<vmem>>, vector<1x32x64xbf16>
    %103 = vector.shape_cast %102 : vector<1x32x64xbf16> to vector<32x64xbf16>
    %104 = arith.truncf %101 : vector<16x32xf32> to vector<16x32xbf16>
    %cst_58 = arith.constant dense<0.000000e+00> : vector<16x64xf32>
    %105 = tpu.matmul %104, %103, %cst_58 {dimension_numbers = #tpu.dot_dimension_numbers<[1], [0], [0], [1], [0, 0, 1, 1], [], []>} : vector<16x32xbf16>, vector<32x64xbf16>, vector<16x64xf32> -> vector<16x64xf32>
    %c0_59 = arith.constant 0 : index
    %c0_60 = arith.constant 0 : index
    %c0_61 = arith.constant 0 : index
    %106 = vector.load %arg10[%c0_59, %c0_60, %c0_61] : memref<5x1x64xf32, #tpu.memory_space<vmem>>, vector<1x1x64xf32>
    %107 = vector.shape_cast %106 : vector<1x1x64xf32> to vector<1x64xf32>
    %108 = vector.broadcast %107 : vector<1x64xf32> to vector<16x64xf32>
    %109 = arith.addf %105, %108 : vector<16x64xf32>
    %cst_62 = arith.constant 5.000000e-01 : f32
    %110 = vector.broadcast %cst_62 : f32 to vector<16x64xf32>
    %111 = arith.mulf %110, %109 : vector<16x64xf32>
    %cst_63 = arith.constant 0.707106769 : f32
    %112 = vector.broadcast %cst_63 : f32 to vector<16x64xf32>
    %113 = arith.mulf %109, %112 : vector<16x64xf32>
    %114 = math.erf %113 : vector<16x64xf32>
    %cst_64 = arith.constant 1.000000e+00 : f32
    %115 = vector.broadcast %cst_64 : f32 to vector<16x64xf32>
    %116 = arith.addf %115, %114 : vector<16x64xf32>
    %117 = arith.mulf %111, %116 : vector<16x64xf32>
    %c0_65 = arith.constant 0 : index
    %c0_66 = arith.constant 0 : index
    %c0_67 = arith.constant 0 : index
    %118 = vector.load %arg11[%c0_65, %c0_66, %c0_67] : memref<5x64x32xbf16, #tpu.memory_space<vmem>>, vector<1x64x32xbf16>
    %119 = vector.shape_cast %118 : vector<1x64x32xbf16> to vector<64x32xbf16>
    %120 = arith.truncf %117 : vector<16x64xf32> to vector<16x64xbf16>
    %cst_68 = arith.constant dense<0.000000e+00> : vector<16x32xf32>
    %121 = tpu.matmul %120, %119, %cst_68 {dimension_numbers = #tpu.dot_dimension_numbers<[1], [0], [0], [1], [0, 0, 1, 1], [], []>} : vector<16x64xbf16>, vector<64x32xbf16>, vector<16x32xf32> -> vector<16x32xf32>
    %c0_69 = arith.constant 0 : index
    %c0_70 = arith.constant 0 : index
    %c0_71 = arith.constant 0 : index
    %122 = vector.load %arg12[%c0_69, %c0_70, %c0_71] : memref<5x1x32xf32, #tpu.memory_space<vmem>>, vector<1x1x32xf32>
    %123 = vector.shape_cast %122 : vector<1x1x32xf32> to vector<1x32xf32>
    %124 = vector.broadcast %123 : vector<1x32xf32> to vector<16x32xf32>
    %125 = arith.addf %121, %124 : vector<16x32xf32>
    %126 = arith.addf %77, %125 : vector<16x32xf32>
    %cst_72 = arith.constant dense<0.000000e+00> : vector<16xf32>
    %127 = vector.multi_reduction <add>, %126, %cst_72 [1] : vector<16x32xf32> to vector<16xf32>
    %128 = vector.shape_cast %127 : vector<16xf32> to vector<16x1xf32>
    %cst_73 = arith.constant 3.200000e+01 : f32
    %129 = vector.broadcast %cst_73 : f32 to vector<16x1xf32>
    %130 = arith.divf %128, %129 : vector<16x1xf32>
    %131 = vector.broadcast %130 : vector<16x1xf32> to vector<16x32xf32>
    %132 = arith.subf %126, %131 : vector<16x32xf32>
    %133 = arith.mulf %132, %132 : vector<16x32xf32>
    %cst_74 = arith.constant dense<0.000000e+00> : vector<16xf32>
    %134 = vector.multi_reduction <add>, %133, %cst_74 [1] : vector<16x32xf32> to vector<16xf32>
    %135 = vector.shape_cast %134 : vector<16xf32> to vector<16x1xf32>
    %cst_75 = arith.constant 3.200000e+01 : f32
    %136 = vector.broadcast %cst_75 : f32 to vector<16x1xf32>
    %137 = arith.divf %135, %136 : vector<16x1xf32>
    %cst_76 = arith.constant 9.99999974E-6 : f32
    %138 = vector.broadcast %cst_76 : f32 to vector<16x1xf32>
    %139 = arith.addf %137, %138 : vector<16x1xf32>
    %140 = math.rsqrt %139 : vector<16x1xf32>
    %141 = vector.broadcast %140 : vector<16x1xf32> to vector<16x32xf32>
    %142 = arith.mulf %132, %141 : vector<16x32xf32>
    %c2 = arith.constant 2 : index
    %c0_77 = arith.constant 0 : index
    %c0_78 = arith.constant 0 : index
    %143 = vector.load %arg13[%c2, %c0_77, %c0_78] : memref<11x1x32xf32, #tpu.memory_space<vmem>>, vector<1x1x32xf32>
    %144 = vector.shape_cast %143 : vector<1x1x32xf32> to vector<1x32xf32>
    %145 = vector.broadcast %144 : vector<1x32xf32> to vector<16x32xf32>
    %146 = arith.mulf %142, %145 : vector<16x32xf32>
    %c2_79 = arith.constant 2 : index
    %c0_80 = arith.constant 0 : index
    %c0_81 = arith.constant 0 : index
    %147 = vector.load %arg14[%c2_79, %c0_80, %c0_81] : memref<11x1x32xf32, #tpu.memory_space<vmem>>, vector<1x1x32xf32>
    %148 = vector.shape_cast %147 : vector<1x1x32xf32> to vector<1x32xf32>
    %149 = vector.broadcast %148 : vector<1x32xf32> to vector<16x32xf32>
    %150 = arith.addf %146, %149 : vector<16x32xf32>
    %c1_82 = arith.constant 1 : index
    %c0_83 = arith.constant 0 : index
    %c0_84 = arith.constant 0 : index
    %151 = vector.load %arg6[%c1_82, %c0_83, %c0_84] : memref<6x32x96xbf16, #tpu.memory_space<vmem>>, vector<1x32x96xbf16>
    %152 = vector.shape_cast %151 : vector<1x32x96xbf16> to vector<32x96xbf16>
    %c1_85 = arith.constant 1 : index
    %c0_86 = arith.constant 0 : index
    %c0_87 = arith.constant 0 : index
    %153 = vector.load %arg7[%c1_85, %c0_86, %c0_87] : memref<6x1x96xf32, #tpu.memory_space<vmem>>, vector<1x1x96xf32>
    %154 = vector.shape_cast %153 : vector<1x1x96xf32> to vector<1x96xf32>
    %155 = arith.truncf %150 : vector<16x32xf32> to vector<16x32xbf16>
    %cst_88 = arith.constant dense<0.000000e+00> : vector<16x96xf32>
    %156 = tpu.matmul %155, %152, %cst_88 {dimension_numbers = #tpu.dot_dimension_numbers<[1], [0], [0], [1], [0, 0, 1, 1], [], []>} : vector<16x32xbf16>, vector<32x96xbf16>, vector<16x96xf32> -> vector<16x96xf32>
    %157 = vector.broadcast %154 : vector<1x96xf32> to vector<16x96xf32>
    %158 = arith.addf %156, %157 : vector<16x96xf32>
    %159 = vector.extract_strided_slice %158 {offsets = [0, 0], sizes = [16, 32], strides = [1, 1]} : vector<16x96xf32> to vector<16x32xf32>
    %160 = vector.extract_strided_slice %158 {offsets = [0, 32], sizes = [16, 32], strides = [1, 1]} : vector<16x96xf32> to vector<16x32xf32>
    %161 = vector.extract_strided_slice %158 {offsets = [0, 64], sizes = [16, 32], strides = [1, 1]} : vector<16x96xf32> to vector<16x32xf32>
    %162 = arith.truncf %159 : vector<16x32xf32> to vector<16x32xbf16>
    %163 = tpu.transpose %160, [1, 0] : vector<16x32xf32> -> vector<32x16xf32>
    %164 = arith.truncf %163 : vector<32x16xf32> to vector<32x16xbf16>
    %165 = arith.truncf %161 : vector<16x32xf32> to vector<16x32xbf16>
    %166 = tpu.concatenate %164, %164, %164, %164, %164, %164, %164, %164 in 1 : vector<32x16xbf16>, vector<32x16xbf16>, vector<32x16xbf16>, vector<32x16xbf16>, vector<32x16xbf16>, vector<32x16xbf16>, vector<32x16xbf16>, vector<32x16xbf16> -> vector<32x128xbf16>
    %167 = arith.mulf %166, %0 : vector<32x128xbf16>
    %cst_89 = arith.constant dense<0.000000e+00> : vector<16x128xf32>
    %168 = tpu.matmul %162, %167, %cst_89 {dimension_numbers = #tpu.dot_dimension_numbers<[1], [0], [0], [1], [0, 0, 1, 1], [], []>} : vector<16x32xbf16>, vector<32x128xbf16>, vector<16x128xf32> -> vector<16x128xf32>
    %cst_90 = arith.constant 5.000000e-01 : f32
    %169 = vector.broadcast %cst_90 : f32 to vector<16x128xf32>
    %170 = arith.mulf %168, %169 : vector<16x128xf32>
    %cst_91 = arith.constant dense<0xFF800000> : vector<128xf32>
    %171 = vector.multi_reduction <maximumf>, %170, %cst_91 [0] : vector<16x128xf32> to vector<128xf32>
    %172 = vector.shape_cast %171 : vector<128xf32> to vector<1x128xf32>
    %173 = vector.broadcast %172 : vector<1x128xf32> to vector<16x128xf32>
    %174 = arith.subf %170, %173 : vector<16x128xf32>
    %175 = math.exp %174 : vector<16x128xf32>
    %cst_92 = arith.constant dense<0.000000e+00> : vector<128xf32>
    %176 = vector.multi_reduction <add>, %175, %cst_92 [0] : vector<16x128xf32> to vector<128xf32>
    %177 = vector.shape_cast %176 : vector<128xf32> to vector<1x128xf32>
    %178 = tpu.reciprocal %177 {approx = true} : vector<1x128xf32> -> vector<1x128xf32>
    %179 = vector.broadcast %178 : vector<1x128xf32> to vector<16x128xf32>
    %180 = arith.mulf %175, %179 : vector<16x128xf32>
    %181 = tpu.concatenate %165, %165, %165, %165, %165, %165, %165, %165 in 0 : vector<16x32xbf16>, vector<16x32xbf16>, vector<16x32xbf16>, vector<16x32xbf16>, vector<16x32xbf16>, vector<16x32xbf16>, vector<16x32xbf16>, vector<16x32xbf16> -> vector<128x32xbf16>
    %182 = arith.mulf %181, %1 : vector<128x32xbf16>
    %183 = arith.truncf %180 : vector<16x128xf32> to vector<16x128xbf16>
    %cst_93 = arith.constant dense<0.000000e+00> : vector<16x32xf32>
    %184 = tpu.matmul %183, %182, %cst_93 {dimension_numbers = #tpu.dot_dimension_numbers<[1], [0], [0], [1], [0, 0, 1, 1], [], []>} : vector<16x128xbf16>, vector<128x32xbf16>, vector<16x32xf32> -> vector<16x32xf32>
    %c1_94 = arith.constant 1 : index
    %c0_95 = arith.constant 0 : index
    %c0_96 = arith.constant 0 : index
    %185 = vector.load %arg8[%c1_94, %c0_95, %c0_96] : memref<6x32x32xbf16, #tpu.memory_space<vmem>>, vector<1x32x32xbf16>
    %186 = vector.shape_cast %185 : vector<1x32x32xbf16> to vector<32x32xbf16>
    %187 = arith.truncf %184 : vector<16x32xf32> to vector<16x32xbf16>
    %cst_97 = arith.constant dense<0.000000e+00> : vector<16x32xf32>
    %188 = tpu.matmul %187, %186, %cst_97 {dimension_numbers = #tpu.dot_dimension_numbers<[1], [0], [0], [1], [0, 0, 1, 1], [], []>} : vector<16x32xbf16>, vector<32x32xbf16>, vector<16x32xf32> -> vector<16x32xf32>
    %189 = arith.addf %126, %188 : vector<16x32xf32>
    %cst_98 = arith.constant dense<0.000000e+00> : vector<16xf32>
    %190 = vector.multi_reduction <add>, %189, %cst_98 [1] : vector<16x32xf32> to vector<16xf32>
    %191 = vector.shape_cast %190 : vector<16xf32> to vector<16x1xf32>
    %cst_99 = arith.constant 3.200000e+01 : f32
    %192 = vector.broadcast %cst_99 : f32 to vector<16x1xf32>
    %193 = arith.divf %191, %192 : vector<16x1xf32>
    %194 = vector.broadcast %193 : vector<16x1xf32> to vector<16x32xf32>
    %195 = arith.subf %189, %194 : vector<16x32xf32>
    %196 = arith.mulf %195, %195 : vector<16x32xf32>
    %cst_100 = arith.constant dense<0.000000e+00> : vector<16xf32>
    %197 = vector.multi_reduction <add>, %196, %cst_100 [1] : vector<16x32xf32> to vector<16xf32>
    %198 = vector.shape_cast %197 : vector<16xf32> to vector<16x1xf32>
    %cst_101 = arith.constant 3.200000e+01 : f32
    %199 = vector.broadcast %cst_101 : f32 to vector<16x1xf32>
    %200 = arith.divf %198, %199 : vector<16x1xf32>
    %cst_102 = arith.constant 9.99999974E-6 : f32
    %201 = vector.broadcast %cst_102 : f32 to vector<16x1xf32>
    %202 = arith.addf %200, %201 : vector<16x1xf32>
    %203 = math.rsqrt %202 : vector<16x1xf32>
    %204 = vector.broadcast %203 : vector<16x1xf32> to vector<16x32xf32>
    %205 = arith.mulf %195, %204 : vector<16x32xf32>
    %c3 = arith.constant 3 : index
    %c0_103 = arith.constant 0 : index
    %c0_104 = arith.constant 0 : index
    %206 = vector.load %arg13[%c3, %c0_103, %c0_104] : memref<11x1x32xf32, #tpu.memory_space<vmem>>, vector<1x1x32xf32>
    %207 = vector.shape_cast %206 : vector<1x1x32xf32> to vector<1x32xf32>
    %208 = vector.broadcast %207 : vector<1x32xf32> to vector<16x32xf32>
    %209 = arith.mulf %205, %208 : vector<16x32xf32>
    %c3_105 = arith.constant 3 : index
    %c0_106 = arith.constant 0 : index
    %c0_107 = arith.constant 0 : index
    %210 = vector.load %arg14[%c3_105, %c0_106, %c0_107] : memref<11x1x32xf32, #tpu.memory_space<vmem>>, vector<1x1x32xf32>
    %211 = vector.shape_cast %210 : vector<1x1x32xf32> to vector<1x32xf32>
    %212 = vector.broadcast %211 : vector<1x32xf32> to vector<16x32xf32>
    %213 = arith.addf %209, %212 : vector<16x32xf32>
    %c1_108 = arith.constant 1 : index
    %c0_109 = arith.constant 0 : index
    %c0_110 = arith.constant 0 : index
    %214 = vector.load %arg9[%c1_108, %c0_109, %c0_110] : memref<5x32x64xbf16, #tpu.memory_space<vmem>>, vector<1x32x64xbf16>
    %215 = vector.shape_cast %214 : vector<1x32x64xbf16> to vector<32x64xbf16>
    %216 = arith.truncf %213 : vector<16x32xf32> to vector<16x32xbf16>
    %cst_111 = arith.constant dense<0.000000e+00> : vector<16x64xf32>
    %217 = tpu.matmul %216, %215, %cst_111 {dimension_numbers = #tpu.dot_dimension_numbers<[1], [0], [0], [1], [0, 0, 1, 1], [], []>} : vector<16x32xbf16>, vector<32x64xbf16>, vector<16x64xf32> -> vector<16x64xf32>
    %c1_112 = arith.constant 1 : index
    %c0_113 = arith.constant 0 : index
    %c0_114 = arith.constant 0 : index
    %218 = vector.load %arg10[%c1_112, %c0_113, %c0_114] : memref<5x1x64xf32, #tpu.memory_space<vmem>>, vector<1x1x64xf32>
    %219 = vector.shape_cast %218 : vector<1x1x64xf32> to vector<1x64xf32>
    %220 = vector.broadcast %219 : vector<1x64xf32> to vector<16x64xf32>
    %221 = arith.addf %217, %220 : vector<16x64xf32>
    %cst_115 = arith.constant 5.000000e-01 : f32
    %222 = vector.broadcast %cst_115 : f32 to vector<16x64xf32>
    %223 = arith.mulf %222, %221 : vector<16x64xf32>
    %cst_116 = arith.constant 0.707106769 : f32
    %224 = vector.broadcast %cst_116 : f32 to vector<16x64xf32>
    %225 = arith.mulf %221, %224 : vector<16x64xf32>
    %226 = math.erf %225 : vector<16x64xf32>
    %cst_117 = arith.constant 1.000000e+00 : f32
    %227 = vector.broadcast %cst_117 : f32 to vector<16x64xf32>
    %228 = arith.addf %227, %226 : vector<16x64xf32>
    %229 = arith.mulf %223, %228 : vector<16x64xf32>
    %c1_118 = arith.constant 1 : index
    %c0_119 = arith.constant 0 : index
    %c0_120 = arith.constant 0 : index
    %230 = vector.load %arg11[%c1_118, %c0_119, %c0_120] : memref<5x64x32xbf16, #tpu.memory_space<vmem>>, vector<1x64x32xbf16>
    %231 = vector.shape_cast %230 : vector<1x64x32xbf16> to vector<64x32xbf16>
    %232 = arith.truncf %229 : vector<16x64xf32> to vector<16x64xbf16>
    %cst_121 = arith.constant dense<0.000000e+00> : vector<16x32xf32>
    %233 = tpu.matmul %232, %231, %cst_121 {dimension_numbers = #tpu.dot_dimension_numbers<[1], [0], [0], [1], [0, 0, 1, 1], [], []>} : vector<16x64xbf16>, vector<64x32xbf16>, vector<16x32xf32> -> vector<16x32xf32>
    %c1_122 = arith.constant 1 : index
    %c0_123 = arith.constant 0 : index
    %c0_124 = arith.constant 0 : index
    %234 = vector.load %arg12[%c1_122, %c0_123, %c0_124] : memref<5x1x32xf32, #tpu.memory_space<vmem>>, vector<1x1x32xf32>
    %235 = vector.shape_cast %234 : vector<1x1x32xf32> to vector<1x32xf32>
    %236 = vector.broadcast %235 : vector<1x32xf32> to vector<16x32xf32>
    %237 = arith.addf %233, %236 : vector<16x32xf32>
    %238 = arith.addf %189, %237 : vector<16x32xf32>
    %c0_125 = arith.constant 0 : index
    %c0_126 = arith.constant 0 : index
    %239 = vector.load %arg5[%c0_125, %c0_126] : memref<8x32xf32, #tpu.memory_space<vmem>>, vector<8x32xf32>
    %c2_127 = arith.constant 2 : index
    %c0_128 = arith.constant 0 : index
    %c0_129 = arith.constant 0 : index
    %240 = vector.load %arg6[%c2_127, %c0_128, %c0_129] : memref<6x32x96xbf16, #tpu.memory_space<vmem>>, vector<1x32x96xbf16>
    %241 = vector.shape_cast %240 : vector<1x32x96xbf16> to vector<32x96xbf16>
    %c2_130 = arith.constant 2 : index
    %c0_131 = arith.constant 0 : index
    %c0_132 = arith.constant 0 : index
    %242 = vector.load %arg7[%c2_130, %c0_131, %c0_132] : memref<6x1x96xf32, #tpu.memory_space<vmem>>, vector<1x1x96xf32>
    %243 = vector.shape_cast %242 : vector<1x1x96xf32> to vector<1x96xf32>
    %244 = arith.truncf %239 : vector<8x32xf32> to vector<8x32xbf16>
    %cst_133 = arith.constant dense<0.000000e+00> : vector<8x96xf32>
    %245 = tpu.matmul %244, %241, %cst_133 {dimension_numbers = #tpu.dot_dimension_numbers<[1], [0], [0], [1], [0, 0, 1, 1], [], []>} : vector<8x32xbf16>, vector<32x96xbf16>, vector<8x96xf32> -> vector<8x96xf32>
    %246 = vector.broadcast %243 : vector<1x96xf32> to vector<8x96xf32>
    %247 = arith.addf %245, %246 : vector<8x96xf32>
    %248 = vector.extract_strided_slice %247 {offsets = [0, 0], sizes = [8, 32], strides = [1, 1]} : vector<8x96xf32> to vector<8x32xf32>
    %249 = vector.extract_strided_slice %247 {offsets = [0, 32], sizes = [8, 32], strides = [1, 1]} : vector<8x96xf32> to vector<8x32xf32>
    %250 = vector.extract_strided_slice %247 {offsets = [0, 64], sizes = [8, 32], strides = [1, 1]} : vector<8x96xf32> to vector<8x32xf32>
    %251 = arith.truncf %248 : vector<8x32xf32> to vector<8x32xbf16>
    %252 = tpu.transpose %249, [1, 0] : vector<8x32xf32> -> vector<32x8xf32>
    %253 = arith.truncf %252 : vector<32x8xf32> to vector<32x8xbf16>
    %254 = arith.truncf %250 : vector<8x32xf32> to vector<8x32xbf16>
    %255 = tpu.concatenate %253, %253, %253, %253, %253, %253, %253, %253 in 1 : vector<32x8xbf16>, vector<32x8xbf16>, vector<32x8xbf16>, vector<32x8xbf16>, vector<32x8xbf16>, vector<32x8xbf16>, vector<32x8xbf16>, vector<32x8xbf16> -> vector<32x64xbf16>
    %256 = arith.mulf %255, %2 : vector<32x64xbf16>
    %cst_134 = arith.constant dense<0.000000e+00> : vector<8x64xf32>
    %257 = tpu.matmul %251, %256, %cst_134 {dimension_numbers = #tpu.dot_dimension_numbers<[1], [0], [0], [1], [0, 0, 1, 1], [], []>} : vector<8x32xbf16>, vector<32x64xbf16>, vector<8x64xf32> -> vector<8x64xf32>
    %cst_135 = arith.constant 5.000000e-01 : f32
    %258 = vector.broadcast %cst_135 : f32 to vector<8x64xf32>
    %259 = arith.mulf %257, %258 : vector<8x64xf32>
    %cst_136 = arith.constant dense<0xFF800000> : vector<8xf32>
    %260 = vector.multi_reduction <maximumf>, %259, %cst_136 [1] : vector<8x64xf32> to vector<8xf32>
    %261 = vector.shape_cast %260 : vector<8xf32> to vector<8x1xf32>
    %262 = vector.broadcast %261 : vector<8x1xf32> to vector<8x64xf32>
    %263 = arith.subf %259, %262 : vector<8x64xf32>
    %264 = math.exp %263 : vector<8x64xf32>
    %cst_137 = arith.constant dense<0.000000e+00> : vector<8x8xf32>
    %265 = tpu.matmul %264, %4, %cst_137 {dimension_numbers = #tpu.dot_dimension_numbers<[1], [0], [0], [1], [0, 0, 1, 1], [], []>} : vector<8x64xf32>, vector<64x8xf32>, vector<8x8xf32> -> vector<8x8xf32>
    %266 = tpu.reciprocal %265 {approx = true} : vector<8x8xf32> -> vector<8x8xf32>
    %267 = tpu.transpose %4, [1, 0] : vector<64x8xf32> -> vector<8x64xf32>
    %cst_138 = arith.constant dense<0.000000e+00> : vector<8x64xf32>
    %268 = tpu.matmul %266, %267, %cst_138 {dimension_numbers = #tpu.dot_dimension_numbers<[1], [0], [0], [1], [0, 0, 1, 1], [], []>} : vector<8x8xf32>, vector<8x64xf32>, vector<8x64xf32> -> vector<8x64xf32>
    %269 = arith.mulf %264, %268 : vector<8x64xf32>
    %270 = tpu.concatenate %254, %254, %254, %254, %254, %254, %254, %254 in 0 : vector<8x32xbf16>, vector<8x32xbf16>, vector<8x32xbf16>, vector<8x32xbf16>, vector<8x32xbf16>, vector<8x32xbf16>, vector<8x32xbf16>, vector<8x32xbf16> -> vector<64x32xbf16>
    %271 = arith.mulf %270, %3 : vector<64x32xbf16>
    %272 = arith.truncf %269 : vector<8x64xf32> to vector<8x64xbf16>
    %cst_139 = arith.constant dense<0.000000e+00> : vector<8x32xf32>
    %273 = tpu.matmul %272, %271, %cst_139 {dimension_numbers = #tpu.dot_dimension_numbers<[1], [0], [0], [1], [0, 0, 1, 1], [], []>} : vector<8x64xbf16>, vector<64x32xbf16>, vector<8x32xf32> -> vector<8x32xf32>
    %c2_140 = arith.constant 2 : index
    %c0_141 = arith.constant 0 : index
    %c0_142 = arith.constant 0 : index
    %274 = vector.load %arg8[%c2_140, %c0_141, %c0_142] : memref<6x32x32xbf16, #tpu.memory_space<vmem>>, vector<1x32x32xbf16>
    %275 = vector.shape_cast %274 : vector<1x32x32xbf16> to vector<32x32xbf16>
    %276 = arith.truncf %273 : vector<8x32xf32> to vector<8x32xbf16>
    %cst_143 = arith.constant dense<0.000000e+00> : vector<8x32xf32>
    %277 = tpu.matmul %276, %275, %cst_143 {dimension_numbers = #tpu.dot_dimension_numbers<[1], [0], [0], [1], [0, 0, 1, 1], [], []>} : vector<8x32xbf16>, vector<32x32xbf16>, vector<8x32xf32> -> vector<8x32xf32>
    %278 = arith.addf %239, %277 : vector<8x32xf32>
    %cst_144 = arith.constant dense<0.000000e+00> : vector<8xf32>
    %279 = vector.multi_reduction <add>, %278, %cst_144 [1] : vector<8x32xf32> to vector<8xf32>
    %280 = vector.shape_cast %279 : vector<8xf32> to vector<8x1xf32>
    %cst_145 = arith.constant 3.200000e+01 : f32
    %281 = vector.broadcast %cst_145 : f32 to vector<8x1xf32>
    %282 = arith.divf %280, %281 : vector<8x1xf32>
    %283 = vector.broadcast %282 : vector<8x1xf32> to vector<8x32xf32>
    %284 = arith.subf %278, %283 : vector<8x32xf32>
    %285 = arith.mulf %284, %284 : vector<8x32xf32>
    %cst_146 = arith.constant dense<0.000000e+00> : vector<8xf32>
    %286 = vector.multi_reduction <add>, %285, %cst_146 [1] : vector<8x32xf32> to vector<8xf32>
    %287 = vector.shape_cast %286 : vector<8xf32> to vector<8x1xf32>
    %cst_147 = arith.constant 3.200000e+01 : f32
    %288 = vector.broadcast %cst_147 : f32 to vector<8x1xf32>
    %289 = arith.divf %287, %288 : vector<8x1xf32>
    %cst_148 = arith.constant 9.99999974E-6 : f32
    %290 = vector.broadcast %cst_148 : f32 to vector<8x1xf32>
    %291 = arith.addf %289, %290 : vector<8x1xf32>
    %292 = math.rsqrt %291 : vector<8x1xf32>
    %293 = vector.broadcast %292 : vector<8x1xf32> to vector<8x32xf32>
    %294 = arith.mulf %284, %293 : vector<8x32xf32>
    %c4 = arith.constant 4 : index
    %c0_149 = arith.constant 0 : index
    %c0_150 = arith.constant 0 : index
    %295 = vector.load %arg13[%c4, %c0_149, %c0_150] : memref<11x1x32xf32, #tpu.memory_space<vmem>>, vector<1x1x32xf32>
    %296 = vector.shape_cast %295 : vector<1x1x32xf32> to vector<1x32xf32>
    %297 = vector.broadcast %296 : vector<1x32xf32> to vector<8x32xf32>
    %298 = arith.mulf %294, %297 : vector<8x32xf32>
    %c4_151 = arith.constant 4 : index
    %c0_152 = arith.constant 0 : index
    %c0_153 = arith.constant 0 : index
    %299 = vector.load %arg14[%c4_151, %c0_152, %c0_153] : memref<11x1x32xf32, #tpu.memory_space<vmem>>, vector<1x1x32xf32>
    %300 = vector.shape_cast %299 : vector<1x1x32xf32> to vector<1x32xf32>
    %301 = vector.broadcast %300 : vector<1x32xf32> to vector<8x32xf32>
    %302 = arith.addf %298, %301 : vector<8x32xf32>
    %c3_154 = arith.constant 3 : index
    %c0_155 = arith.constant 0 : index
    %c0_156 = arith.constant 0 : index
    %303 = vector.load %arg6[%c3_154, %c0_155, %c0_156] : memref<6x32x96xbf16, #tpu.memory_space<vmem>>, vector<1x32x96xbf16>
    %304 = vector.shape_cast %303 : vector<1x32x96xbf16> to vector<32x96xbf16>
    %c3_157 = arith.constant 3 : index
    %c0_158 = arith.constant 0 : index
    %c0_159 = arith.constant 0 : index
    %305 = vector.load %arg7[%c3_157, %c0_158, %c0_159] : memref<6x1x96xf32, #tpu.memory_space<vmem>>, vector<1x1x96xf32>
    %306 = vector.shape_cast %305 : vector<1x1x96xf32> to vector<1x96xf32>
    %307 = vector.extract_strided_slice %304 {offsets = [0, 0], sizes = [32, 32], strides = [1, 1]} : vector<32x96xbf16> to vector<32x32xbf16>
    %308 = arith.truncf %302 : vector<8x32xf32> to vector<8x32xbf16>
    %cst_160 = arith.constant dense<0.000000e+00> : vector<8x32xf32>
    %309 = tpu.matmul %308, %307, %cst_160 {dimension_numbers = #tpu.dot_dimension_numbers<[1], [0], [0], [1], [0, 0, 1, 1], [], []>} : vector<8x32xbf16>, vector<32x32xbf16>, vector<8x32xf32> -> vector<8x32xf32>
    %310 = vector.extract_strided_slice %306 {offsets = [0, 0], sizes = [1, 32], strides = [1, 1]} : vector<1x96xf32> to vector<1x32xf32>
    %311 = vector.broadcast %310 : vector<1x32xf32> to vector<8x32xf32>
    %312 = arith.addf %309, %311 : vector<8x32xf32>
    %313 = vector.extract_strided_slice %304 {offsets = [0, 32], sizes = [32, 64], strides = [1, 1]} : vector<32x96xbf16> to vector<32x64xbf16>
    %314 = arith.truncf %238 : vector<16x32xf32> to vector<16x32xbf16>
    %cst_161 = arith.constant dense<0.000000e+00> : vector<16x64xf32>
    %315 = tpu.matmul %314, %313, %cst_161 {dimension_numbers = #tpu.dot_dimension_numbers<[1], [0], [0], [1], [0, 0, 1, 1], [], []>} : vector<16x32xbf16>, vector<32x64xbf16>, vector<16x64xf32> -> vector<16x64xf32>
    %316 = vector.extract_strided_slice %306 {offsets = [0, 32], sizes = [1, 64], strides = [1, 1]} : vector<1x96xf32> to vector<1x64xf32>
    %317 = vector.broadcast %316 : vector<1x64xf32> to vector<16x64xf32>
    %318 = arith.addf %315, %317 : vector<16x64xf32>
    %319 = vector.extract_strided_slice %318 {offsets = [0, 0], sizes = [16, 32], strides = [1, 1]} : vector<16x64xf32> to vector<16x32xf32>
    %320 = vector.extract_strided_slice %318 {offsets = [0, 32], sizes = [16, 32], strides = [1, 1]} : vector<16x64xf32> to vector<16x32xf32>
    %321 = arith.truncf %312 : vector<8x32xf32> to vector<8x32xbf16>
    %322 = tpu.transpose %319, [1, 0] : vector<16x32xf32> -> vector<32x16xf32>
    %323 = arith.truncf %322 : vector<32x16xf32> to vector<32x16xbf16>
    %324 = arith.truncf %320 : vector<16x32xf32> to vector<16x32xbf16>
    %325 = tpu.concatenate %323, %323, %323, %323, %323, %323, %323, %323 in 1 : vector<32x16xbf16>, vector<32x16xbf16>, vector<32x16xbf16>, vector<32x16xbf16>, vector<32x16xbf16>, vector<32x16xbf16>, vector<32x16xbf16>, vector<32x16xbf16> -> vector<32x128xbf16>
    %326 = arith.mulf %325, %0 : vector<32x128xbf16>
    %cst_162 = arith.constant dense<0.000000e+00> : vector<8x128xf32>
    %327 = tpu.matmul %321, %326, %cst_162 {dimension_numbers = #tpu.dot_dimension_numbers<[1], [0], [0], [1], [0, 0, 1, 1], [], []>} : vector<8x32xbf16>, vector<32x128xbf16>, vector<8x128xf32> -> vector<8x128xf32>
    %cst_163 = arith.constant 5.000000e-01 : f32
    %328 = vector.broadcast %cst_163 : f32 to vector<8x128xf32>
    %329 = arith.mulf %327, %328 : vector<8x128xf32>
    %cst_164 = arith.constant dense<0xFF800000> : vector<128xf32>
    %330 = vector.multi_reduction <maximumf>, %329, %cst_164 [0] : vector<8x128xf32> to vector<128xf32>
    %331 = vector.shape_cast %330 : vector<128xf32> to vector<1x128xf32>
    %332 = vector.broadcast %331 : vector<1x128xf32> to vector<8x128xf32>
    %333 = arith.subf %329, %332 : vector<8x128xf32>
    %334 = math.exp %333 : vector<8x128xf32>
    %cst_165 = arith.constant dense<0.000000e+00> : vector<128xf32>
    %335 = vector.multi_reduction <add>, %334, %cst_165 [0] : vector<8x128xf32> to vector<128xf32>
    %336 = vector.shape_cast %335 : vector<128xf32> to vector<1x128xf32>
    %337 = tpu.reciprocal %336 {approx = true} : vector<1x128xf32> -> vector<1x128xf32>
    %338 = vector.broadcast %337 : vector<1x128xf32> to vector<8x128xf32>
    %339 = arith.mulf %334, %338 : vector<8x128xf32>
    %340 = tpu.concatenate %324, %324, %324, %324, %324, %324, %324, %324 in 0 : vector<16x32xbf16>, vector<16x32xbf16>, vector<16x32xbf16>, vector<16x32xbf16>, vector<16x32xbf16>, vector<16x32xbf16>, vector<16x32xbf16>, vector<16x32xbf16> -> vector<128x32xbf16>
    %341 = arith.mulf %340, %1 : vector<128x32xbf16>
    %342 = arith.truncf %339 : vector<8x128xf32> to vector<8x128xbf16>
    %cst_166 = arith.constant dense<0.000000e+00> : vector<8x32xf32>
    %343 = tpu.matmul %342, %341, %cst_166 {dimension_numbers = #tpu.dot_dimension_numbers<[1], [0], [0], [1], [0, 0, 1, 1], [], []>} : vector<8x128xbf16>, vector<128x32xbf16>, vector<8x32xf32> -> vector<8x32xf32>
    %c3_167 = arith.constant 3 : index
    %c0_168 = arith.constant 0 : index
    %c0_169 = arith.constant 0 : index
    %344 = vector.load %arg8[%c3_167, %c0_168, %c0_169] : memref<6x32x32xbf16, #tpu.memory_space<vmem>>, vector<1x32x32xbf16>
    %345 = vector.shape_cast %344 : vector<1x32x32xbf16> to vector<32x32xbf16>
    %346 = arith.truncf %343 : vector<8x32xf32> to vector<8x32xbf16>
    %cst_170 = arith.constant dense<0.000000e+00> : vector<8x32xf32>
    %347 = tpu.matmul %346, %345, %cst_170 {dimension_numbers = #tpu.dot_dimension_numbers<[1], [0], [0], [1], [0, 0, 1, 1], [], []>} : vector<8x32xbf16>, vector<32x32xbf16>, vector<8x32xf32> -> vector<8x32xf32>
    %348 = arith.addf %347, %302 : vector<8x32xf32>
    %cst_171 = arith.constant dense<0.000000e+00> : vector<8xf32>
    %349 = vector.multi_reduction <add>, %348, %cst_171 [1] : vector<8x32xf32> to vector<8xf32>
    %350 = vector.shape_cast %349 : vector<8xf32> to vector<8x1xf32>
    %cst_172 = arith.constant 3.200000e+01 : f32
    %351 = vector.broadcast %cst_172 : f32 to vector<8x1xf32>
    %352 = arith.divf %350, %351 : vector<8x1xf32>
    %353 = vector.broadcast %352 : vector<8x1xf32> to vector<8x32xf32>
    %354 = arith.subf %348, %353 : vector<8x32xf32>
    %355 = arith.mulf %354, %354 : vector<8x32xf32>
    %cst_173 = arith.constant dense<0.000000e+00> : vector<8xf32>
    %356 = vector.multi_reduction <add>, %355, %cst_173 [1] : vector<8x32xf32> to vector<8xf32>
    %357 = vector.shape_cast %356 : vector<8xf32> to vector<8x1xf32>
    %cst_174 = arith.constant 3.200000e+01 : f32
    %358 = vector.broadcast %cst_174 : f32 to vector<8x1xf32>
    %359 = arith.divf %357, %358 : vector<8x1xf32>
    %cst_175 = arith.constant 9.99999974E-6 : f32
    %360 = vector.broadcast %cst_175 : f32 to vector<8x1xf32>
    %361 = arith.addf %359, %360 : vector<8x1xf32>
    %362 = math.rsqrt %361 : vector<8x1xf32>
    %363 = vector.broadcast %362 : vector<8x1xf32> to vector<8x32xf32>
    %364 = arith.mulf %354, %363 : vector<8x32xf32>
    %c5 = arith.constant 5 : index
    %c0_176 = arith.constant 0 : index
    %c0_177 = arith.constant 0 : index
    %365 = vector.load %arg13[%c5, %c0_176, %c0_177] : memref<11x1x32xf32, #tpu.memory_space<vmem>>, vector<1x1x32xf32>
    %366 = vector.shape_cast %365 : vector<1x1x32xf32> to vector<1x32xf32>
    %367 = vector.broadcast %366 : vector<1x32xf32> to vector<8x32xf32>
    %368 = arith.mulf %364, %367 : vector<8x32xf32>
    %c5_178 = arith.constant 5 : index
    %c0_179 = arith.constant 0 : index
    %c0_180 = arith.constant 0 : index
    %369 = vector.load %arg14[%c5_178, %c0_179, %c0_180] : memref<11x1x32xf32, #tpu.memory_space<vmem>>, vector<1x1x32xf32>
    %370 = vector.shape_cast %369 : vector<1x1x32xf32> to vector<1x32xf32>
    %371 = vector.broadcast %370 : vector<1x32xf32> to vector<8x32xf32>
    %372 = arith.addf %368, %371 : vector<8x32xf32>
    %c2_181 = arith.constant 2 : index
    %c0_182 = arith.constant 0 : index
    %c0_183 = arith.constant 0 : index
    %373 = vector.load %arg9[%c2_181, %c0_182, %c0_183] : memref<5x32x64xbf16, #tpu.memory_space<vmem>>, vector<1x32x64xbf16>
    %374 = vector.shape_cast %373 : vector<1x32x64xbf16> to vector<32x64xbf16>
    %375 = arith.truncf %372 : vector<8x32xf32> to vector<8x32xbf16>
    %cst_184 = arith.constant dense<0.000000e+00> : vector<8x64xf32>
    %376 = tpu.matmul %375, %374, %cst_184 {dimension_numbers = #tpu.dot_dimension_numbers<[1], [0], [0], [1], [0, 0, 1, 1], [], []>} : vector<8x32xbf16>, vector<32x64xbf16>, vector<8x64xf32> -> vector<8x64xf32>
    %c2_185 = arith.constant 2 : index
    %c0_186 = arith.constant 0 : index
    %c0_187 = arith.constant 0 : index
    %377 = vector.load %arg10[%c2_185, %c0_186, %c0_187] : memref<5x1x64xf32, #tpu.memory_space<vmem>>, vector<1x1x64xf32>
    %378 = vector.shape_cast %377 : vector<1x1x64xf32> to vector<1x64xf32>
    %379 = vector.broadcast %378 : vector<1x64xf32> to vector<8x64xf32>
    %380 = arith.addf %376, %379 : vector<8x64xf32>
    %cst_188 = arith.constant 5.000000e-01 : f32
    %381 = vector.broadcast %cst_188 : f32 to vector<8x64xf32>
    %382 = arith.mulf %381, %380 : vector<8x64xf32>
    %cst_189 = arith.constant 0.707106769 : f32
    %383 = vector.broadcast %cst_189 : f32 to vector<8x64xf32>
    %384 = arith.mulf %380, %383 : vector<8x64xf32>
    %385 = math.erf %384 : vector<8x64xf32>
    %cst_190 = arith.constant 1.000000e+00 : f32
    %386 = vector.broadcast %cst_190 : f32 to vector<8x64xf32>
    %387 = arith.addf %386, %385 : vector<8x64xf32>
    %388 = arith.mulf %382, %387 : vector<8x64xf32>
    %c2_191 = arith.constant 2 : index
    %c0_192 = arith.constant 0 : index
    %c0_193 = arith.constant 0 : index
    %389 = vector.load %arg11[%c2_191, %c0_192, %c0_193] : memref<5x64x32xbf16, #tpu.memory_space<vmem>>, vector<1x64x32xbf16>
    %390 = vector.shape_cast %389 : vector<1x64x32xbf16> to vector<64x32xbf16>
    %391 = arith.truncf %388 : vector<8x64xf32> to vector<8x64xbf16>
    %cst_194 = arith.constant dense<0.000000e+00> : vector<8x32xf32>
    %392 = tpu.matmul %391, %390, %cst_194 {dimension_numbers = #tpu.dot_dimension_numbers<[1], [0], [0], [1], [0, 0, 1, 1], [], []>} : vector<8x64xbf16>, vector<64x32xbf16>, vector<8x32xf32> -> vector<8x32xf32>
    %c2_195 = arith.constant 2 : index
    %c0_196 = arith.constant 0 : index
    %c0_197 = arith.constant 0 : index
    %393 = vector.load %arg12[%c2_195, %c0_196, %c0_197] : memref<5x1x32xf32, #tpu.memory_space<vmem>>, vector<1x1x32xf32>
    %394 = vector.shape_cast %393 : vector<1x1x32xf32> to vector<1x32xf32>
    %395 = vector.broadcast %394 : vector<1x32xf32> to vector<8x32xf32>
    %396 = arith.addf %392, %395 : vector<8x32xf32>
    %397 = arith.addf %396, %372 : vector<8x32xf32>
    %cst_198 = arith.constant dense<0.000000e+00> : vector<8xf32>
    %398 = vector.multi_reduction <add>, %397, %cst_198 [1] : vector<8x32xf32> to vector<8xf32>
    %399 = vector.shape_cast %398 : vector<8xf32> to vector<8x1xf32>
    %cst_199 = arith.constant 3.200000e+01 : f32
    %400 = vector.broadcast %cst_199 : f32 to vector<8x1xf32>
    %401 = arith.divf %399, %400 : vector<8x1xf32>
    %402 = vector.broadcast %401 : vector<8x1xf32> to vector<8x32xf32>
    %403 = arith.subf %397, %402 : vector<8x32xf32>
    %404 = arith.mulf %403, %403 : vector<8x32xf32>
    %cst_200 = arith.constant dense<0.000000e+00> : vector<8xf32>
    %405 = vector.multi_reduction <add>, %404, %cst_200 [1] : vector<8x32xf32> to vector<8xf32>
    %406 = vector.shape_cast %405 : vector<8xf32> to vector<8x1xf32>
    %cst_201 = arith.constant 3.200000e+01 : f32
    %407 = vector.broadcast %cst_201 : f32 to vector<8x1xf32>
    %408 = arith.divf %406, %407 : vector<8x1xf32>
    %cst_202 = arith.constant 9.99999974E-6 : f32
    %409 = vector.broadcast %cst_202 : f32 to vector<8x1xf32>
    %410 = arith.addf %408, %409 : vector<8x1xf32>
    %411 = math.rsqrt %410 : vector<8x1xf32>
    %412 = vector.broadcast %411 : vector<8x1xf32> to vector<8x32xf32>
    %413 = arith.mulf %403, %412 : vector<8x32xf32>
    %c6 = arith.constant 6 : index
    %c0_203 = arith.constant 0 : index
    %c0_204 = arith.constant 0 : index
    %414 = vector.load %arg13[%c6, %c0_203, %c0_204] : memref<11x1x32xf32, #tpu.memory_space<vmem>>, vector<1x1x32xf32>
    %415 = vector.shape_cast %414 : vector<1x1x32xf32> to vector<1x32xf32>
    %416 = vector.broadcast %415 : vector<1x32xf32> to vector<8x32xf32>
    %417 = arith.mulf %413, %416 : vector<8x32xf32>
    %c6_205 = arith.constant 6 : index
    %c0_206 = arith.constant 0 : index
    %c0_207 = arith.constant 0 : index
    %418 = vector.load %arg14[%c6_205, %c0_206, %c0_207] : memref<11x1x32xf32, #tpu.memory_space<vmem>>, vector<1x1x32xf32>
    %419 = vector.shape_cast %418 : vector<1x1x32xf32> to vector<1x32xf32>
    %420 = vector.broadcast %419 : vector<1x32xf32> to vector<8x32xf32>
    %421 = arith.addf %417, %420 : vector<8x32xf32>
    %cst_208 = arith.constant dense<0.000000e+00> : vector<8xf32>
    %422 = vector.multi_reduction <add>, %421, %cst_208 [1] : vector<8x32xf32> to vector<8xf32>
    %423 = vector.shape_cast %422 : vector<8xf32> to vector<8x1xf32>
    %cst_209 = arith.constant 3.200000e+01 : f32
    %424 = vector.broadcast %cst_209 : f32 to vector<8x1xf32>
    %425 = arith.divf %423, %424 : vector<8x1xf32>
    %426 = vector.broadcast %425 : vector<8x1xf32> to vector<8x32xf32>
    %427 = arith.subf %421, %426 : vector<8x32xf32>
    %428 = arith.mulf %427, %427 : vector<8x32xf32>
    %cst_210 = arith.constant dense<0.000000e+00> : vector<8xf32>
    %429 = vector.multi_reduction <add>, %428, %cst_210 [1] : vector<8x32xf32> to vector<8xf32>
    %430 = vector.shape_cast %429 : vector<8xf32> to vector<8x1xf32>
    %cst_211 = arith.constant 3.200000e+01 : f32
    %431 = vector.broadcast %cst_211 : f32 to vector<8x1xf32>
    %432 = arith.divf %430, %431 : vector<8x1xf32>
    %cst_212 = arith.constant 9.99999974E-6 : f32
    %433 = vector.broadcast %cst_212 : f32 to vector<8x1xf32>
    %434 = arith.addf %432, %433 : vector<8x1xf32>
    %435 = math.rsqrt %434 : vector<8x1xf32>
    %436 = vector.broadcast %435 : vector<8x1xf32> to vector<8x32xf32>
    %437 = arith.mulf %427, %436 : vector<8x32xf32>
    %c7 = arith.constant 7 : index
    %c0_213 = arith.constant 0 : index
    %c0_214 = arith.constant 0 : index
    %438 = vector.load %arg13[%c7, %c0_213, %c0_214] : memref<11x1x32xf32, #tpu.memory_space<vmem>>, vector<1x1x32xf32>
    %439 = vector.shape_cast %438 : vector<1x1x32xf32> to vector<1x32xf32>
    %440 = vector.broadcast %439 : vector<1x32xf32> to vector<8x32xf32>
    %441 = arith.mulf %437, %440 : vector<8x32xf32>
    %c7_215 = arith.constant 7 : index
    %c0_216 = arith.constant 0 : index
    %c0_217 = arith.constant 0 : index
    %442 = vector.load %arg14[%c7_215, %c0_216, %c0_217] : memref<11x1x32xf32, #tpu.memory_space<vmem>>, vector<1x1x32xf32>
    %443 = vector.shape_cast %442 : vector<1x1x32xf32> to vector<1x32xf32>
    %444 = vector.broadcast %443 : vector<1x32xf32> to vector<8x32xf32>
    %445 = arith.addf %441, %444 : vector<8x32xf32>
    %c4_218 = arith.constant 4 : index
    %c0_219 = arith.constant 0 : index
    %c0_220 = arith.constant 0 : index
    %446 = vector.load %arg6[%c4_218, %c0_219, %c0_220] : memref<6x32x96xbf16, #tpu.memory_space<vmem>>, vector<1x32x96xbf16>
    %447 = vector.shape_cast %446 : vector<1x32x96xbf16> to vector<32x96xbf16>
    %c4_221 = arith.constant 4 : index
    %c0_222 = arith.constant 0 : index
    %c0_223 = arith.constant 0 : index
    %448 = vector.load %arg7[%c4_221, %c0_222, %c0_223] : memref<6x1x96xf32, #tpu.memory_space<vmem>>, vector<1x1x96xf32>
    %449 = vector.shape_cast %448 : vector<1x1x96xf32> to vector<1x96xf32>
    %450 = arith.truncf %445 : vector<8x32xf32> to vector<8x32xbf16>
    %cst_224 = arith.constant dense<0.000000e+00> : vector<8x96xf32>
    %451 = tpu.matmul %450, %447, %cst_224 {dimension_numbers = #tpu.dot_dimension_numbers<[1], [0], [0], [1], [0, 0, 1, 1], [], []>} : vector<8x32xbf16>, vector<32x96xbf16>, vector<8x96xf32> -> vector<8x96xf32>
    %452 = vector.broadcast %449 : vector<1x96xf32> to vector<8x96xf32>
    %453 = arith.addf %451, %452 : vector<8x96xf32>
    %454 = vector.extract_strided_slice %453 {offsets = [0, 0], sizes = [8, 32], strides = [1, 1]} : vector<8x96xf32> to vector<8x32xf32>
    %455 = vector.extract_strided_slice %453 {offsets = [0, 32], sizes = [8, 32], strides = [1, 1]} : vector<8x96xf32> to vector<8x32xf32>
    %456 = vector.extract_strided_slice %453 {offsets = [0, 64], sizes = [8, 32], strides = [1, 1]} : vector<8x96xf32> to vector<8x32xf32>
    %457 = arith.truncf %454 : vector<8x32xf32> to vector<8x32xbf16>
    %458 = tpu.transpose %455, [1, 0] : vector<8x32xf32> -> vector<32x8xf32>
    %459 = arith.truncf %458 : vector<32x8xf32> to vector<32x8xbf16>
    %460 = arith.truncf %456 : vector<8x32xf32> to vector<8x32xbf16>
    %461 = tpu.concatenate %459, %459, %459, %459, %459, %459, %459, %459 in 1 : vector<32x8xbf16>, vector<32x8xbf16>, vector<32x8xbf16>, vector<32x8xbf16>, vector<32x8xbf16>, vector<32x8xbf16>, vector<32x8xbf16>, vector<32x8xbf16> -> vector<32x64xbf16>
    %462 = arith.mulf %461, %2 : vector<32x64xbf16>
    %cst_225 = arith.constant dense<0.000000e+00> : vector<8x64xf32>
    %463 = tpu.matmul %457, %462, %cst_225 {dimension_numbers = #tpu.dot_dimension_numbers<[1], [0], [0], [1], [0, 0, 1, 1], [], []>} : vector<8x32xbf16>, vector<32x64xbf16>, vector<8x64xf32> -> vector<8x64xf32>
    %cst_226 = arith.constant 5.000000e-01 : f32
    %464 = vector.broadcast %cst_226 : f32 to vector<8x64xf32>
    %465 = arith.mulf %463, %464 : vector<8x64xf32>
    %cst_227 = arith.constant dense<0xFF800000> : vector<64xf32>
    %466 = vector.multi_reduction <maximumf>, %465, %cst_227 [0] : vector<8x64xf32> to vector<64xf32>
    %467 = vector.shape_cast %466 : vector<64xf32> to vector<1x64xf32>
    %468 = vector.broadcast %467 : vector<1x64xf32> to vector<8x64xf32>
    %469 = arith.subf %465, %468 : vector<8x64xf32>
    %470 = math.exp %469 : vector<8x64xf32>
    %cst_228 = arith.constant dense<0.000000e+00> : vector<64xf32>
    %471 = vector.multi_reduction <add>, %470, %cst_228 [0] : vector<8x64xf32> to vector<64xf32>
    %472 = vector.shape_cast %471 : vector<64xf32> to vector<1x64xf32>
    %473 = tpu.reciprocal %472 {approx = true} : vector<1x64xf32> -> vector<1x64xf32>
    %474 = vector.broadcast %473 : vector<1x64xf32> to vector<8x64xf32>
    %475 = arith.mulf %470, %474 : vector<8x64xf32>
    %476 = tpu.concatenate %460, %460, %460, %460, %460, %460, %460, %460 in 0 : vector<8x32xbf16>, vector<8x32xbf16>, vector<8x32xbf16>, vector<8x32xbf16>, vector<8x32xbf16>, vector<8x32xbf16>, vector<8x32xbf16>, vector<8x32xbf16> -> vector<64x32xbf16>
    %477 = arith.mulf %476, %3 : vector<64x32xbf16>
    %478 = arith.truncf %475 : vector<8x64xf32> to vector<8x64xbf16>
    %cst_229 = arith.constant dense<0.000000e+00> : vector<8x32xf32>
    %479 = tpu.matmul %478, %477, %cst_229 {dimension_numbers = #tpu.dot_dimension_numbers<[1], [0], [0], [1], [0, 0, 1, 1], [], []>} : vector<8x64xbf16>, vector<64x32xbf16>, vector<8x32xf32> -> vector<8x32xf32>
    %c4_230 = arith.constant 4 : index
    %c0_231 = arith.constant 0 : index
    %c0_232 = arith.constant 0 : index
    %480 = vector.load %arg8[%c4_230, %c0_231, %c0_232] : memref<6x32x32xbf16, #tpu.memory_space<vmem>>, vector<1x32x32xbf16>
    %481 = vector.shape_cast %480 : vector<1x32x32xbf16> to vector<32x32xbf16>
    %482 = arith.truncf %479 : vector<8x32xf32> to vector<8x32xbf16>
    %cst_233 = arith.constant dense<0.000000e+00> : vector<8x32xf32>
    %483 = tpu.matmul %482, %481, %cst_233 {dimension_numbers = #tpu.dot_dimension_numbers<[1], [0], [0], [1], [0, 0, 1, 1], [], []>} : vector<8x32xbf16>, vector<32x32xbf16>, vector<8x32xf32> -> vector<8x32xf32>
    %484 = arith.addf %421, %483 : vector<8x32xf32>
    %cst_234 = arith.constant dense<0.000000e+00> : vector<8xf32>
    %485 = vector.multi_reduction <add>, %484, %cst_234 [1] : vector<8x32xf32> to vector<8xf32>
    %486 = vector.shape_cast %485 : vector<8xf32> to vector<8x1xf32>
    %cst_235 = arith.constant 3.200000e+01 : f32
    %487 = vector.broadcast %cst_235 : f32 to vector<8x1xf32>
    %488 = arith.divf %486, %487 : vector<8x1xf32>
    %489 = vector.broadcast %488 : vector<8x1xf32> to vector<8x32xf32>
    %490 = arith.subf %484, %489 : vector<8x32xf32>
    %491 = arith.mulf %490, %490 : vector<8x32xf32>
    %cst_236 = arith.constant dense<0.000000e+00> : vector<8xf32>
    %492 = vector.multi_reduction <add>, %491, %cst_236 [1] : vector<8x32xf32> to vector<8xf32>
    %493 = vector.shape_cast %492 : vector<8xf32> to vector<8x1xf32>
    %cst_237 = arith.constant 3.200000e+01 : f32
    %494 = vector.broadcast %cst_237 : f32 to vector<8x1xf32>
    %495 = arith.divf %493, %494 : vector<8x1xf32>
    %cst_238 = arith.constant 9.99999974E-6 : f32
    %496 = vector.broadcast %cst_238 : f32 to vector<8x1xf32>
    %497 = arith.addf %495, %496 : vector<8x1xf32>
    %498 = math.rsqrt %497 : vector<8x1xf32>
    %499 = vector.broadcast %498 : vector<8x1xf32> to vector<8x32xf32>
    %500 = arith.mulf %490, %499 : vector<8x32xf32>
    %c8 = arith.constant 8 : index
    %c0_239 = arith.constant 0 : index
    %c0_240 = arith.constant 0 : index
    %501 = vector.load %arg13[%c8, %c0_239, %c0_240] : memref<11x1x32xf32, #tpu.memory_space<vmem>>, vector<1x1x32xf32>
    %502 = vector.shape_cast %501 : vector<1x1x32xf32> to vector<1x32xf32>
    %503 = vector.broadcast %502 : vector<1x32xf32> to vector<8x32xf32>
    %504 = arith.mulf %500, %503 : vector<8x32xf32>
    %c8_241 = arith.constant 8 : index
    %c0_242 = arith.constant 0 : index
    %c0_243 = arith.constant 0 : index
    %505 = vector.load %arg14[%c8_241, %c0_242, %c0_243] : memref<11x1x32xf32, #tpu.memory_space<vmem>>, vector<1x1x32xf32>
    %506 = vector.shape_cast %505 : vector<1x1x32xf32> to vector<1x32xf32>
    %507 = vector.broadcast %506 : vector<1x32xf32> to vector<8x32xf32>
    %508 = arith.addf %504, %507 : vector<8x32xf32>
    %c3_244 = arith.constant 3 : index
    %c0_245 = arith.constant 0 : index
    %c0_246 = arith.constant 0 : index
    %509 = vector.load %arg9[%c3_244, %c0_245, %c0_246] : memref<5x32x64xbf16, #tpu.memory_space<vmem>>, vector<1x32x64xbf16>
    %510 = vector.shape_cast %509 : vector<1x32x64xbf16> to vector<32x64xbf16>
    %511 = arith.truncf %508 : vector<8x32xf32> to vector<8x32xbf16>
    %cst_247 = arith.constant dense<0.000000e+00> : vector<8x64xf32>
    %512 = tpu.matmul %511, %510, %cst_247 {dimension_numbers = #tpu.dot_dimension_numbers<[1], [0], [0], [1], [0, 0, 1, 1], [], []>} : vector<8x32xbf16>, vector<32x64xbf16>, vector<8x64xf32> -> vector<8x64xf32>
    %c3_248 = arith.constant 3 : index
    %c0_249 = arith.constant 0 : index
    %c0_250 = arith.constant 0 : index
    %513 = vector.load %arg10[%c3_248, %c0_249, %c0_250] : memref<5x1x64xf32, #tpu.memory_space<vmem>>, vector<1x1x64xf32>
    %514 = vector.shape_cast %513 : vector<1x1x64xf32> to vector<1x64xf32>
    %515 = vector.broadcast %514 : vector<1x64xf32> to vector<8x64xf32>
    %516 = arith.addf %512, %515 : vector<8x64xf32>
    %cst_251 = arith.constant 5.000000e-01 : f32
    %517 = vector.broadcast %cst_251 : f32 to vector<8x64xf32>
    %518 = arith.mulf %517, %516 : vector<8x64xf32>
    %cst_252 = arith.constant 0.707106769 : f32
    %519 = vector.broadcast %cst_252 : f32 to vector<8x64xf32>
    %520 = arith.mulf %516, %519 : vector<8x64xf32>
    %521 = math.erf %520 : vector<8x64xf32>
    %cst_253 = arith.constant 1.000000e+00 : f32
    %522 = vector.broadcast %cst_253 : f32 to vector<8x64xf32>
    %523 = arith.addf %522, %521 : vector<8x64xf32>
    %524 = arith.mulf %518, %523 : vector<8x64xf32>
    %c3_254 = arith.constant 3 : index
    %c0_255 = arith.constant 0 : index
    %c0_256 = arith.constant 0 : index
    %525 = vector.load %arg11[%c3_254, %c0_255, %c0_256] : memref<5x64x32xbf16, #tpu.memory_space<vmem>>, vector<1x64x32xbf16>
    %526 = vector.shape_cast %525 : vector<1x64x32xbf16> to vector<64x32xbf16>
    %527 = arith.truncf %524 : vector<8x64xf32> to vector<8x64xbf16>
    %cst_257 = arith.constant dense<0.000000e+00> : vector<8x32xf32>
    %528 = tpu.matmul %527, %526, %cst_257 {dimension_numbers = #tpu.dot_dimension_numbers<[1], [0], [0], [1], [0, 0, 1, 1], [], []>} : vector<8x64xbf16>, vector<64x32xbf16>, vector<8x32xf32> -> vector<8x32xf32>
    %c3_258 = arith.constant 3 : index
    %c0_259 = arith.constant 0 : index
    %c0_260 = arith.constant 0 : index
    %529 = vector.load %arg12[%c3_258, %c0_259, %c0_260] : memref<5x1x32xf32, #tpu.memory_space<vmem>>, vector<1x1x32xf32>
    %530 = vector.shape_cast %529 : vector<1x1x32xf32> to vector<1x32xf32>
    %531 = vector.broadcast %530 : vector<1x32xf32> to vector<8x32xf32>
    %532 = arith.addf %528, %531 : vector<8x32xf32>
    %533 = arith.addf %484, %532 : vector<8x32xf32>
    %cst_261 = arith.constant dense<0.000000e+00> : vector<8xf32>
    %534 = vector.multi_reduction <add>, %533, %cst_261 [1] : vector<8x32xf32> to vector<8xf32>
    %535 = vector.shape_cast %534 : vector<8xf32> to vector<8x1xf32>
    %cst_262 = arith.constant 3.200000e+01 : f32
    %536 = vector.broadcast %cst_262 : f32 to vector<8x1xf32>
    %537 = arith.divf %535, %536 : vector<8x1xf32>
    %538 = vector.broadcast %537 : vector<8x1xf32> to vector<8x32xf32>
    %539 = arith.subf %533, %538 : vector<8x32xf32>
    %540 = arith.mulf %539, %539 : vector<8x32xf32>
    %cst_263 = arith.constant dense<0.000000e+00> : vector<8xf32>
    %541 = vector.multi_reduction <add>, %540, %cst_263 [1] : vector<8x32xf32> to vector<8xf32>
    %542 = vector.shape_cast %541 : vector<8xf32> to vector<8x1xf32>
    %cst_264 = arith.constant 3.200000e+01 : f32
    %543 = vector.broadcast %cst_264 : f32 to vector<8x1xf32>
    %544 = arith.divf %542, %543 : vector<8x1xf32>
    %cst_265 = arith.constant 9.99999974E-6 : f32
    %545 = vector.broadcast %cst_265 : f32 to vector<8x1xf32>
    %546 = arith.addf %544, %545 : vector<8x1xf32>
    %547 = math.rsqrt %546 : vector<8x1xf32>
    %548 = vector.broadcast %547 : vector<8x1xf32> to vector<8x32xf32>
    %549 = arith.mulf %539, %548 : vector<8x32xf32>
    %c9 = arith.constant 9 : index
    %c0_266 = arith.constant 0 : index
    %c0_267 = arith.constant 0 : index
    %550 = vector.load %arg13[%c9, %c0_266, %c0_267] : memref<11x1x32xf32, #tpu.memory_space<vmem>>, vector<1x1x32xf32>
    %551 = vector.shape_cast %550 : vector<1x1x32xf32> to vector<1x32xf32>
    %552 = vector.broadcast %551 : vector<1x32xf32> to vector<8x32xf32>
    %553 = arith.mulf %549, %552 : vector<8x32xf32>
    %c9_268 = arith.constant 9 : index
    %c0_269 = arith.constant 0 : index
    %c0_270 = arith.constant 0 : index
    %554 = vector.load %arg14[%c9_268, %c0_269, %c0_270] : memref<11x1x32xf32, #tpu.memory_space<vmem>>, vector<1x1x32xf32>
    %555 = vector.shape_cast %554 : vector<1x1x32xf32> to vector<1x32xf32>
    %556 = vector.broadcast %555 : vector<1x32xf32> to vector<8x32xf32>
    %557 = arith.addf %553, %556 : vector<8x32xf32>
    %c5_271 = arith.constant 5 : index
    %c0_272 = arith.constant 0 : index
    %c0_273 = arith.constant 0 : index
    %558 = vector.load %arg6[%c5_271, %c0_272, %c0_273] : memref<6x32x96xbf16, #tpu.memory_space<vmem>>, vector<1x32x96xbf16>
    %559 = vector.shape_cast %558 : vector<1x32x96xbf16> to vector<32x96xbf16>
    %c5_274 = arith.constant 5 : index
    %c0_275 = arith.constant 0 : index
    %c0_276 = arith.constant 0 : index
    %560 = vector.load %arg7[%c5_274, %c0_275, %c0_276] : memref<6x1x96xf32, #tpu.memory_space<vmem>>, vector<1x1x96xf32>
    %561 = vector.shape_cast %560 : vector<1x1x96xf32> to vector<1x96xf32>
    %562 = arith.truncf %557 : vector<8x32xf32> to vector<8x32xbf16>
    %cst_277 = arith.constant dense<0.000000e+00> : vector<8x96xf32>
    %563 = tpu.matmul %562, %559, %cst_277 {dimension_numbers = #tpu.dot_dimension_numbers<[1], [0], [0], [1], [0, 0, 1, 1], [], []>} : vector<8x32xbf16>, vector<32x96xbf16>, vector<8x96xf32> -> vector<8x96xf32>
    %564 = vector.broadcast %561 : vector<1x96xf32> to vector<8x96xf32>
    %565 = arith.addf %563, %564 : vector<8x96xf32>
    %566 = vector.extract_strided_slice %565 {offsets = [0, 0], sizes = [8, 32], strides = [1, 1]} : vector<8x96xf32> to vector<8x32xf32>
    %567 = vector.extract_strided_slice %565 {offsets = [0, 32], sizes = [8, 32], strides = [1, 1]} : vector<8x96xf32> to vector<8x32xf32>
    %568 = vector.extract_strided_slice %565 {offsets = [0, 64], sizes = [8, 32], strides = [1, 1]} : vector<8x96xf32> to vector<8x32xf32>
    %569 = arith.truncf %566 : vector<8x32xf32> to vector<8x32xbf16>
    %570 = tpu.transpose %567, [1, 0] : vector<8x32xf32> -> vector<32x8xf32>
    %571 = arith.truncf %570 : vector<32x8xf32> to vector<32x8xbf16>
    %572 = arith.truncf %568 : vector<8x32xf32> to vector<8x32xbf16>
    %573 = tpu.concatenate %571, %571, %571, %571, %571, %571, %571, %571 in 1 : vector<32x8xbf16>, vector<32x8xbf16>, vector<32x8xbf16>, vector<32x8xbf16>, vector<32x8xbf16>, vector<32x8xbf16>, vector<32x8xbf16>, vector<32x8xbf16> -> vector<32x64xbf16>
    %574 = arith.mulf %573, %2 : vector<32x64xbf16>
    %cst_278 = arith.constant dense<0.000000e+00> : vector<8x64xf32>
    %575 = tpu.matmul %569, %574, %cst_278 {dimension_numbers = #tpu.dot_dimension_numbers<[1], [0], [0], [1], [0, 0, 1, 1], [], []>} : vector<8x32xbf16>, vector<32x64xbf16>, vector<8x64xf32> -> vector<8x64xf32>
    %cst_279 = arith.constant 5.000000e-01 : f32
    %576 = vector.broadcast %cst_279 : f32 to vector<8x64xf32>
    %577 = arith.mulf %575, %576 : vector<8x64xf32>
    %cst_280 = arith.constant dense<0xFF800000> : vector<64xf32>
    %578 = vector.multi_reduction <maximumf>, %577, %cst_280 [0] : vector<8x64xf32> to vector<64xf32>
    %579 = vector.shape_cast %578 : vector<64xf32> to vector<1x64xf32>
    %580 = vector.broadcast %579 : vector<1x64xf32> to vector<8x64xf32>
    %581 = arith.subf %577, %580 : vector<8x64xf32>
    %582 = math.exp %581 : vector<8x64xf32>
    %cst_281 = arith.constant dense<0.000000e+00> : vector<64xf32>
    %583 = vector.multi_reduction <add>, %582, %cst_281 [0] : vector<8x64xf32> to vector<64xf32>
    %584 = vector.shape_cast %583 : vector<64xf32> to vector<1x64xf32>
    %585 = tpu.reciprocal %584 {approx = true} : vector<1x64xf32> -> vector<1x64xf32>
    %586 = vector.broadcast %585 : vector<1x64xf32> to vector<8x64xf32>
    %587 = arith.mulf %582, %586 : vector<8x64xf32>
    %588 = tpu.concatenate %572, %572, %572, %572, %572, %572, %572, %572 in 0 : vector<8x32xbf16>, vector<8x32xbf16>, vector<8x32xbf16>, vector<8x32xbf16>, vector<8x32xbf16>, vector<8x32xbf16>, vector<8x32xbf16>, vector<8x32xbf16> -> vector<64x32xbf16>
    %589 = arith.mulf %588, %3 : vector<64x32xbf16>
    %590 = arith.truncf %587 : vector<8x64xf32> to vector<8x64xbf16>
    %cst_282 = arith.constant dense<0.000000e+00> : vector<8x32xf32>
    %591 = tpu.matmul %590, %589, %cst_282 {dimension_numbers = #tpu.dot_dimension_numbers<[1], [0], [0], [1], [0, 0, 1, 1], [], []>} : vector<8x64xbf16>, vector<64x32xbf16>, vector<8x32xf32> -> vector<8x32xf32>
    %c5_283 = arith.constant 5 : index
    %c0_284 = arith.constant 0 : index
    %c0_285 = arith.constant 0 : index
    %592 = vector.load %arg8[%c5_283, %c0_284, %c0_285] : memref<6x32x32xbf16, #tpu.memory_space<vmem>>, vector<1x32x32xbf16>
    %593 = vector.shape_cast %592 : vector<1x32x32xbf16> to vector<32x32xbf16>
    %594 = arith.truncf %591 : vector<8x32xf32> to vector<8x32xbf16>
    %cst_286 = arith.constant dense<0.000000e+00> : vector<8x32xf32>
    %595 = tpu.matmul %594, %593, %cst_286 {dimension_numbers = #tpu.dot_dimension_numbers<[1], [0], [0], [1], [0, 0, 1, 1], [], []>} : vector<8x32xbf16>, vector<32x32xbf16>, vector<8x32xf32> -> vector<8x32xf32>
    %596 = arith.addf %533, %595 : vector<8x32xf32>
    %cst_287 = arith.constant dense<0.000000e+00> : vector<8xf32>
    %597 = vector.multi_reduction <add>, %596, %cst_287 [1] : vector<8x32xf32> to vector<8xf32>
    %598 = vector.shape_cast %597 : vector<8xf32> to vector<8x1xf32>
    %cst_288 = arith.constant 3.200000e+01 : f32
    %599 = vector.broadcast %cst_288 : f32 to vector<8x1xf32>
    %600 = arith.divf %598, %599 : vector<8x1xf32>
    %601 = vector.broadcast %600 : vector<8x1xf32> to vector<8x32xf32>
    %602 = arith.subf %596, %601 : vector<8x32xf32>
    %603 = arith.mulf %602, %602 : vector<8x32xf32>
    %cst_289 = arith.constant dense<0.000000e+00> : vector<8xf32>
    %604 = vector.multi_reduction <add>, %603, %cst_289 [1] : vector<8x32xf32> to vector<8xf32>
    %605 = vector.shape_cast %604 : vector<8xf32> to vector<8x1xf32>
    %cst_290 = arith.constant 3.200000e+01 : f32
    %606 = vector.broadcast %cst_290 : f32 to vector<8x1xf32>
    %607 = arith.divf %605, %606 : vector<8x1xf32>
    %cst_291 = arith.constant 9.99999974E-6 : f32
    %608 = vector.broadcast %cst_291 : f32 to vector<8x1xf32>
    %609 = arith.addf %607, %608 : vector<8x1xf32>
    %610 = math.rsqrt %609 : vector<8x1xf32>
    %611 = vector.broadcast %610 : vector<8x1xf32> to vector<8x32xf32>
    %612 = arith.mulf %602, %611 : vector<8x32xf32>
    %c10 = arith.constant 10 : index
    %c0_292 = arith.constant 0 : index
    %c0_293 = arith.constant 0 : index
    %613 = vector.load %arg13[%c10, %c0_292, %c0_293] : memref<11x1x32xf32, #tpu.memory_space<vmem>>, vector<1x1x32xf32>
    %614 = vector.shape_cast %613 : vector<1x1x32xf32> to vector<1x32xf32>
    %615 = vector.broadcast %614 : vector<1x32xf32> to vector<8x32xf32>
    %616 = arith.mulf %612, %615 : vector<8x32xf32>
    %c10_294 = arith.constant 10 : index
    %c0_295 = arith.constant 0 : index
    %c0_296 = arith.constant 0 : index
    %617 = vector.load %arg14[%c10_294, %c0_295, %c0_296] : memref<11x1x32xf32, #tpu.memory_space<vmem>>, vector<1x1x32xf32>
    %618 = vector.shape_cast %617 : vector<1x1x32xf32> to vector<1x32xf32>
    %619 = vector.broadcast %618 : vector<1x32xf32> to vector<8x32xf32>
    %620 = arith.addf %616, %619 : vector<8x32xf32>
    %c4_297 = arith.constant 4 : index
    %c0_298 = arith.constant 0 : index
    %c0_299 = arith.constant 0 : index
    %621 = vector.load %arg9[%c4_297, %c0_298, %c0_299] : memref<5x32x64xbf16, #tpu.memory_space<vmem>>, vector<1x32x64xbf16>
    %622 = vector.shape_cast %621 : vector<1x32x64xbf16> to vector<32x64xbf16>
    %623 = arith.truncf %620 : vector<8x32xf32> to vector<8x32xbf16>
    %cst_300 = arith.constant dense<0.000000e+00> : vector<8x64xf32>
    %624 = tpu.matmul %623, %622, %cst_300 {dimension_numbers = #tpu.dot_dimension_numbers<[1], [0], [0], [1], [0, 0, 1, 1], [], []>} : vector<8x32xbf16>, vector<32x64xbf16>, vector<8x64xf32> -> vector<8x64xf32>
    %c4_301 = arith.constant 4 : index
    %c0_302 = arith.constant 0 : index
    %c0_303 = arith.constant 0 : index
    %625 = vector.load %arg10[%c4_301, %c0_302, %c0_303] : memref<5x1x64xf32, #tpu.memory_space<vmem>>, vector<1x1x64xf32>
    %626 = vector.shape_cast %625 : vector<1x1x64xf32> to vector<1x64xf32>
    %627 = vector.broadcast %626 : vector<1x64xf32> to vector<8x64xf32>
    %628 = arith.addf %624, %627 : vector<8x64xf32>
    %cst_304 = arith.constant 5.000000e-01 : f32
    %629 = vector.broadcast %cst_304 : f32 to vector<8x64xf32>
    %630 = arith.mulf %629, %628 : vector<8x64xf32>
    %cst_305 = arith.constant 0.707106769 : f32
    %631 = vector.broadcast %cst_305 : f32 to vector<8x64xf32>
    %632 = arith.mulf %628, %631 : vector<8x64xf32>
    %633 = math.erf %632 : vector<8x64xf32>
    %cst_306 = arith.constant 1.000000e+00 : f32
    %634 = vector.broadcast %cst_306 : f32 to vector<8x64xf32>
    %635 = arith.addf %634, %633 : vector<8x64xf32>
    %636 = arith.mulf %630, %635 : vector<8x64xf32>
    %c4_307 = arith.constant 4 : index
    %c0_308 = arith.constant 0 : index
    %c0_309 = arith.constant 0 : index
    %637 = vector.load %arg11[%c4_307, %c0_308, %c0_309] : memref<5x64x32xbf16, #tpu.memory_space<vmem>>, vector<1x64x32xbf16>
    %638 = vector.shape_cast %637 : vector<1x64x32xbf16> to vector<64x32xbf16>
    %639 = arith.truncf %636 : vector<8x64xf32> to vector<8x64xbf16>
    %cst_310 = arith.constant dense<0.000000e+00> : vector<8x32xf32>
    %640 = tpu.matmul %639, %638, %cst_310 {dimension_numbers = #tpu.dot_dimension_numbers<[1], [0], [0], [1], [0, 0, 1, 1], [], []>} : vector<8x64xbf16>, vector<64x32xbf16>, vector<8x32xf32> -> vector<8x32xf32>
    %c4_311 = arith.constant 4 : index
    %c0_312 = arith.constant 0 : index
    %c0_313 = arith.constant 0 : index
    %641 = vector.load %arg12[%c4_311, %c0_312, %c0_313] : memref<5x1x32xf32, #tpu.memory_space<vmem>>, vector<1x1x32xf32>
    %642 = vector.shape_cast %641 : vector<1x1x32xf32> to vector<1x32xf32>
    %643 = vector.broadcast %642 : vector<1x32xf32> to vector<8x32xf32>
    %644 = arith.addf %640, %643 : vector<8x32xf32>
    %645 = arith.addf %596, %644 : vector<8x32xf32>
    %c0_314 = arith.constant 0 : index
    %c0_315 = arith.constant 0 : index
    %646 = vector.load %arg15[%c0_314, %c0_315] : memref<32x6xbf16, #tpu.memory_space<vmem>>, vector<32x6xbf16>
    %647 = arith.truncf %645 : vector<8x32xf32> to vector<8x32xbf16>
    %cst_316 = arith.constant dense<0.000000e+00> : vector<8x6xf32>
    %648 = tpu.matmul %647, %646, %cst_316 {dimension_numbers = #tpu.dot_dimension_numbers<[1], [0], [0], [1], [0, 0, 1, 1], [], []>} : vector<8x32xbf16>, vector<32x6xbf16>, vector<8x6xf32> -> vector<8x6xf32>
    %c0_317 = arith.constant 0 : index
    %c0_318 = arith.constant 0 : index
    %649 = vector.load %arg16[%c0_317, %c0_318] : memref<1x6xf32, #tpu.memory_space<vmem>>, vector<1x6xf32>
    %650 = vector.broadcast %649 : vector<1x6xf32> to vector<8x6xf32>
    %651 = arith.addf %648, %650 : vector<8x6xf32>
    %652 = vector.extract_strided_slice %651 {offsets = [0, 0], sizes = [8, 2], strides = [1, 1]} : vector<8x6xf32> to vector<8x2xf32>
    %653 = vector.extract_strided_slice %651 {offsets = [0, 2], sizes = [8, 4], strides = [1, 1]} : vector<8x6xf32> to vector<8x4xf32>
    %654 = arith.negf %653 : vector<8x4xf32>
    %655 = math.exp %654 : vector<8x4xf32>
    %cst_319 = arith.constant 1.000000e+00 : f32
    %656 = vector.broadcast %cst_319 : f32 to vector<8x4xf32>
    %657 = arith.addf %656, %655 : vector<8x4xf32>
    %658 = arith.divf %656, %657 : vector<8x4xf32>
    %659 = tpu.concatenate %652, %658 in 1 : vector<8x2xf32>, vector<8x4xf32> -> vector<8x6xf32>
    %c0_320 = arith.constant 0 : index
    %c0_321 = arith.constant 0 : index
    %c0_322 = arith.constant 0 : index
    %660 = vector.load %arg22[%c0_320, %c0_321, %c0_322] : memref<1x8x6xf32, #tpu.memory_space<vmem>>, vector<1x8x6xf32>
    %661 = vector.shape_cast %660 : vector<1x8x6xf32> to vector<8x6xf32>
    %662 = vector.shape_cast %659 : vector<8x6xf32> to vector<1x8x6xf32>
    tpu.vector_store %arg22[%c0_320, %c0_321, %c0_322], %662 {strides = array<i32>} : memref<1x8x6xf32, #tpu.memory_space<vmem>>, vector<1x8x6xf32>,
    return
  }
  func.func @transform_0(%arg0: i32) -> (i32, i32, i32) {
    %c0_i32 = arith.constant 0 : i32
    %c0_i32_0 = arith.constant 0 : i32
    %c0_i32_1 = arith.constant 0 : i32
    return %arg0, %c0_i32, %c0_i32_0 : i32, i32, i32
  }
  func.func @transform_1(%arg0: i32) -> (i32, i32) {
    %c0_i32 = arith.constant 0 : i32
    %c0_i32_0 = arith.constant 0 : i32
    %c0_i32_1 = arith.constant 0 : i32
    return %c0_i32, %c0_i32_0 : i32, i32
  }
  func.func @transform_2(%arg0: i32) -> (i32, i32) {
    %c0_i32 = arith.constant 0 : i32
    %c0_i32_0 = arith.constant 0 : i32
    %c0_i32_1 = arith.constant 0 : i32
    return %c0_i32, %c0_i32_0 : i32, i32
  }
  func.func @transform_3(%arg0: i32) -> (i32, i32) {
    %c0_i32 = arith.constant 0 : i32
    %c0_i32_0 = arith.constant 0 : i32
    %c0_i32_1 = arith.constant 0 : i32
    return %c0_i32, %c0_i32_0 : i32, i32
  }
  func.func @transform_4(%arg0: i32) -> (i32, i32) {
    %c0_i32 = arith.constant 0 : i32
    %c0_i32_0 = arith.constant 0 : i32
    %c0_i32_1 = arith.constant 0 : i32
    return %c0_i32, %c0_i32_0 : i32, i32
  }
  func.func @transform_5(%arg0: i32) -> (i32, i32, i32) {
    %c0_i32 = arith.constant 0 : i32
    %c0_i32_0 = arith.constant 0 : i32
    %c0_i32_1 = arith.constant 0 : i32
    %c0_i32_2 = arith.constant 0 : i32
    return %c0_i32, %c0_i32_0, %c0_i32_1 : i32, i32, i32
  }
  func.func @transform_6(%arg0: i32) -> (i32, i32, i32) {
    %c0_i32 = arith.constant 0 : i32
    %c0_i32_0 = arith.constant 0 : i32
    %c0_i32_1 = arith.constant 0 : i32
    %c0_i32_2 = arith.constant 0 : i32
    return %c0_i32, %c0_i32_0, %c0_i32_1 : i32, i32, i32
  }
  func.func @transform_7(%arg0: i32) -> (i32, i32, i32) {
    %c0_i32 = arith.constant 0 : i32
    %c0_i32_0 = arith.constant 0 : i32
    %c0_i32_1 = arith.constant 0 : i32
    %c0_i32_2 = arith.constant 0 : i32
    return %c0_i32, %c0_i32_0, %c0_i32_1 : i32, i32, i32
  }
  func.func @transform_8(%arg0: i32) -> (i32, i32, i32) {
    %c0_i32 = arith.constant 0 : i32
    %c0_i32_0 = arith.constant 0 : i32
    %c0_i32_1 = arith.constant 0 : i32
    %c0_i32_2 = arith.constant 0 : i32
    return %c0_i32, %c0_i32_0, %c0_i32_1 : i32, i32, i32
  }
  func.func @transform_9(%arg0: i32) -> (i32, i32, i32) {
    %c0_i32 = arith.constant 0 : i32
    %c0_i32_0 = arith.constant 0 : i32
    %c0_i32_1 = arith.constant 0 : i32
    %c0_i32_2 = arith.constant 0 : i32
    return %c0_i32, %c0_i32_0, %c0_i32_1 : i32, i32, i32
  }
  func.func @transform_10(%arg0: i32) -> (i32, i32, i32) {
    %c0_i32 = arith.constant 0 : i32
    %c0_i32_0 = arith.constant 0 : i32
    %c0_i32_1 = arith.constant 0 : i32
    %c0_i32_2 = arith.constant 0 : i32
    return %c0_i32, %c0_i32_0, %c0_i32_1 : i32, i32, i32
  }
  func.func @transform_11(%arg0: i32) -> (i32, i32, i32) {
    %c0_i32 = arith.constant 0 : i32
    %c0_i32_0 = arith.constant 0 : i32
    %c0_i32_1 = arith.constant 0 : i32
    %c0_i32_2 = arith.constant 0 : i32
    return %c0_i32, %c0_i32_0, %c0_i32_1 : i32, i32, i32
  }
  func.func @transform_12(%arg0: i32) -> (i32, i32, i32) {
    %c0_i32 = arith.constant 0 : i32
    %c0_i32_0 = arith.constant 0 : i32
    %c0_i32_1 = arith.constant 0 : i32
    %c0_i32_2 = arith.constant 0 : i32
    return %c0_i32, %c0_i32_0, %c0_i32_1 : i32, i32, i32
  }
  func.func @transform_13(%arg0: i32) -> (i32, i32, i32) {
    %c0_i32 = arith.constant 0 : i32
    %c0_i32_0 = arith.constant 0 : i32
    %c0_i32_1 = arith.constant 0 : i32
    %c0_i32_2 = arith.constant 0 : i32
    return %c0_i32, %c0_i32_0, %c0_i32_1 : i32, i32, i32
  }
  func.func @transform_14(%arg0: i32) -> (i32, i32) {
    %c0_i32 = arith.constant 0 : i32
    %c0_i32_0 = arith.constant 0 : i32
    %c0_i32_1 = arith.constant 0 : i32
    return %c0_i32, %c0_i32_0 : i32, i32
  }
  func.func @transform_15(%arg0: i32) -> (i32, i32) {
    %c0_i32 = arith.constant 0 : i32
    %c0_i32_0 = arith.constant 0 : i32
    %c0_i32_1 = arith.constant 0 : i32
    return %c0_i32, %c0_i32_0 : i32, i32
  }
  func.func @transform_16(%arg0: i32) -> (i32, i32) {
    %c0_i32 = arith.constant 0 : i32
    %c0_i32_0 = arith.constant 0 : i32
    %c0_i32_1 = arith.constant 0 : i32
    return %c0_i32, %c0_i32_0 : i32, i32
  }
  func.func @transform_17(%arg0: i32) -> (i32, i32) {
    %c0_i32 = arith.constant 0 : i32
    %c0_i32_0 = arith.constant 0 : i32
    %c0_i32_1 = arith.constant 0 : i32
    return %c0_i32, %c0_i32_0 : i32, i32
  }
  func.func @transform_18(%arg0: i32) -> (i32, i32) {
    %c0_i32 = arith.constant 0 : i32
    %c0_i32_0 = arith.constant 0 : i32
    %c0_i32_1 = arith.constant 0 : i32
    return %c0_i32, %c0_i32_0 : i32, i32
  }
  func.func @transform_19(%arg0: i32) -> (i32, i32) {
    %c0_i32 = arith.constant 0 : i32
    %c0_i32_0 = arith.constant 0 : i32
    %c0_i32_1 = arith.constant 0 : i32
    return %c0_i32, %c0_i32_0 : i32, i32
  }
  func.func @transform_20(%arg0: i32) -> (i32, i32) {
    %c0_i32 = arith.constant 0 : i32
    %c0_i32_0 = arith.constant 0 : i32
    %c0_i32_1 = arith.constant 0 : i32
    return %c0_i32, %c0_i32_0 : i32, i32
  }
  func.func @transform_21(%arg0: i32) -> (i32, i32, i32) {
    %c0_i32 = arith.constant 0 : i32
    %c0_i32_0 = arith.constant 0 : i32
    %c0_i32_1 = arith.constant 0 : i32
    return %arg0, %c0_i32, %c0_i32_0 : i32, i32, i32
  }
}

</mosaic_0001>

<bundles_post_ra>
// kernel: detr_forward.1
= control target key start
LH: loop header
LB: loop body
LE: loop exit
PB: predicated region body
PF: predicated region fallthrough
CT: control target
= control target key end

     0   :  { %s6397_s0 = inlined_call_operand.vmem [shape: f32[2,16,64], index: 0, kind: input, shape index: {}]   ;;  %s6398_s1 = inlined_call_operand.vmem [shape: bf16[64,32], index: 1, kind: input, shape index: {}]   ;;  %s6399_s2 = inlined_call_operand.vmem [shape: f32[1,32], index: 2, kind: input, shape index: {}]   ;;  %s6400_s3 = inlined_call_operand.vmem [shape: f32[16,32], index: 3, kind: input, shape index: {}]   ;;  %s6401_s4 = inlined_call_operand.vmem [shape: f32[8,32], index: 4, kind: input, shape index: {}]   ;;  %s6402_s5 = inlined_call_operand.vmem [shape: bf16[6,32,96], index: 5, kind: input, shape index: {}]   ;;  %s6403_s6 = inlined_call_operand.vmem [shape: f32[6,1,96], index: 6, kind: input, shape index: {}]   ;;  %s6404_s7 = inlined_call_operand.vmem [shape: bf16[6,32,32], index: 7, kind: input, shape index: {}]   ;;  %s6405_s8 = inlined_call_operand.vmem [shape: bf16[5,32,64], index: 8, kind: input, shape index: {}]   ;;  %s6406_s9 = inlined_call_operand.vmem [shape: f32[5,1,64], index: 9, kind: input, shape index: {}]   ;;  %s6407_s10 = inlined_call_operand.vmem [shape: bf16[5,64,32], index: 10, kind: input, shape index: {}]   ;;  %s6408_s11 = inlined_call_operand.vmem [shape: f32[5,1,32], index: 11, kind: input, shape index: {}]   ;;  %s6409_s12 = inlined_call_operand.vmem [shape: f32[11,1,32], index: 12, kind: input, shape index: {}]   ;;  %s6410_s13 = inlined_call_operand.vmem [shape: f32[11,1,32], index: 13, kind: input, shape index: {}]   ;;  %s6411_s14 = inlined_call_operand.vmem [shape: bf16[32,6], index: 14, kind: input, shape index: {}]   ;;  %s6412_s15 = inlined_call_operand.vmem [shape: f32[1,6], index: 15, kind: input, shape index: {}]   ;;  %s6413_s16 = inlined_call_operand.vmem [shape: bf16[32,128], index: 16, kind: input, shape index: {}]   ;;  %s6414_s17 = inlined_call_operand.vmem [shape: bf16[128,32], index: 17, kind: input, shape index: {}]   ;;  %s6415_s18 = inlined_call_operand.vmem [shape: bf16[32,64], index: 18, kind: input, shape index: {}]   ;;  %s6416_s19 = inlined_call_operand.vmem [shape: bf16[64,32], index: 19, kind: input, shape index: {}]   ;;  %s6417_s20 = inlined_call_operand.vmem [shape: f32[64,8], index: 20, kind: input, shape index: {}]   ;;  %s6418_s21 = inlined_call_operand.vmem [shape: f32[2,8,6], index: 21, kind: output, shape index: {}]  }
   0x1   :  { %6452 = sst [smem:[#allocation2_spill]] %s6397_s0 }
   0x2   :  { %6453 = sst [smem:[#allocation3_spill]] %s6398_s1 }
   0x3   :  { %6454 = sst [smem:[#allocation4_spill]] %s6399_s2  ;;  %s5146_s2 = smov 0  }
   0x4   :  { %6455 = sst [smem:[#allocation5_spill]] %s6400_s3 }
   0x5   :  { %6456 = sst [smem:[#allocation6_spill]] %s6401_s4 }
   0x6   :  { %6457 = sst [smem:[#allocation7_spill]] %s6402_s5 }
   0x7   :  { %6458 = sst [smem:[#allocation8_spill]] %s6413_s16 }
   0x8   :  { %6459 = sst [smem:[#allocation9_spill]] %s6414_s17 }
   0x9   :  { %6460 = sst [smem:[#allocation10_spill]] %s6415_s18 }
   0xa LB: > { %s4207_s25 = sadd.s32 4294967295, %s5022_s2   ;;  %p4211_p0 = scmp.ge.s32.totalorder %s5022_s2, 1  ;;  %s5022_s2 = sphi %s5146_s2, %s31_s2  }
   0xb   : > { %p587_p1 = scmp.lt.s32.totalorder %s5022_s2, 3 }
   0xd   : > { %p588_p2 = pnand %p4211_p0, %p587_p1 }
   0xe   : > { %s6461_s3 = sld [smem:[#allocation3_spill]] (!%p588_p2)  ;;  %p646_p3 = scmp.lt.s32.totalorder (!%p588_p2), %s4207_s25, 1 }
   0xf   : > { %591 = sbr.rel (%p588_p2) target bundleno = 10547 (0x2933), region = 104  ;;  %s6462_s5 = sld [smem:[#allocation2_spill]] (!%p588_p2) }
  0x10   : > { %s6463_s29 = sld [smem:[#allocation4_spill]] (!%p588_p2)  ;;  %s6437_s23 = smov (!%p588_p2), 96  }
  0x11   : > { %s6464_s30 = sld [smem:[#allocation5_spill]] (!%p588_p2)  ;;  %s6435_s1 = smov (!%p588_p2), 16  }
  0x12   : > { %s6465_s24 = sld [smem:[#allocation7_spill]] (!%p588_p2)  ;;  %s6426_s26 = smov (!%p588_p2), 32  }
  0x13   : > { %s6433_s27 = smov (!%p588_p2), 64   ;;  %s6424_s28 = smov (!%p588_p2), 48  }
  0x14   : > { %v4634_v0 = vld [vmem:[%s6461_s3 + $0x18] sm:$0xff]  ;;  %v4633_v1 = vld [vmem:[%s6461_s3 + $0x10] sm:$0xff]  ;;  %s6497_s25 = smov (!%p646_p3, %s4207_s25), 1  ;;  %v4632_v2 = vld [vmem:[%s6461_s3 + $0x8] sm:$0xff]  ;;  %vm735_vm0 = vcmask 523264   ;;  %vm757_vm1 = vcmask 261120  }
  0x15   : > { %743 = vmatpush.bf16.msra.mxu0 %v4634_v0  ;;  %s4630_s0 = sshll.u32 %s6497_s25, 4  ;;  %v4631_v3 = vld [vmem:[%s6461_s3] sm:$0xff]  ;;  %v5024_v18 = vmov 32.0   ;;  %s6466_s17 = sld [smem:[#allocation9_spill]]  ;;  %vm944_vm9 = vcmask 130048   ;;  %vm955_vm10 = vcmask 392192  }
  0x16   : > { %s650_s22 = scalar_lea.vmem %s6462_s5, %s4630_s0  ;;  %v4898_v7 = vld [vmem:[%s6463_s29] ss:$0 sm:$0xff]  ;;  %4938 = vrcp.f32 %v5024_v18  ;;  %s6422_s29 = smov 80   ;;  %vm964_vm11 = vcmask 654336   ;;  %vm969_vm12 = vcmask 785408   ;;  %vm974_vm13 = vcmask 916480  }
  0x17   : > { %v696_v4 = vld [vmem:[%s650_s22] sm:$0xff]  ;;  %v697_v5 = vld [vmem:[%s650_s22 + $0x8] sm:$0xff]  ;;  %s6431_s0 = smov 112   ;;  %s6467_s16 = sld [smem:[#allocation8_spill]] }
  0x18   : > { %v706_v6 = vpack.c.bf16 %v697_v5, %v696_v4  ;;  %v753_v9 = vld [vmem:[%s6464_s30] sm:$0xff]  ;;  %v754_v14 = vld [vmem:[%s6464_s30 + $0x8] sm:$0xff]  ;;  %s6469_s4 = smov 48   ;;  %s6476_s22 = smov 16  }
  0x19   : > { %744 = vmatpush.bf16.msra.mxu0 %v4633_v1  ;;  %v4636_v35 = vld [vmem:[%s6465_s24 + $0x8] sm:$0xff]  ;;  %v4635_v37 = vld [vmem:[%s6465_s24] sm:$0xff]  ;;  %s6446_s5 = smov 56   ;;  %s6478_s18 = sld [smem:[#allocation10_spill]] }
  0x1a   : > { %851 = vmatpush.bf16.msra.mxu1 %v4636_v35  ;;  %v4899_v56 = vld [vmem:[%s6409_s12] ss:$0 sm:$0xff]  ;;  %s6479_s30 = smov 112   ;;  %s6480_s3 = smov 24  }
  0x1b   : > { %v4900_v61 = vld [vmem:[%s6410_s13] ss:$0 sm:$0xff] }
  0x1c   : > { %v4939_v19 = vpop.eup %4938 }
  0x1d   : > { %745 = vmatpush.bf16.msra.mxu0 %v4632_v2  ;;  %v765_v20 = vmul.f32 32.0, %v4939_v19  ;;  %vm769_vm2 = vweird.f32 %v4939_v19 }
  0x1e   : > { %852 = vmatpush.bf16.msra.mxu1 %v4635_v37 }
  0x1f   : > { %v766_v21 = vsub.f32 1.0, %v765_v20 }
  0x21   : > { %746 = vmatpush.bf16.msra.mxu0 %v4631_v3  ;;  %v767_v22 = vmul.f32 %v4939_v19, %v766_v21  ;;  %v4901_v3 = vld [vmem:[%s6403_s6] ss:$0 sm:$0xff] }
  0x23   : > { %v768_v23 = vadd.f32 %v4939_v19, %v767_v22 }
  0x24   : > { %4231 = vmatmul.msk.bf16.vlgmr.msra.gmra.mxu0 %vm735_vm0, %v706_v6 }
  0x25   : > { %v5190_v24 = vsel %vm769_vm2, %v4939_v19, %v768_v23 }
  0xa1   : > { %v748_v8 = vpop.f32.mrf.mxu0 }
  0xa2   : > { %v749_v10 = vadd.f32 %v4898_v7, %v748_v8 }
  0xa4   : > { %v5179_v11 = vadd.f32 %v753_v9, %v749_v10 }
  0xa6   : > { %v758_v12 = vsel %vm757_vm1, %v5179_v11, 0.0 }
  0xa7   : > { %759 = vadd.xlane.f32.xlu0 %v758_v12 }
  0xa9   : > { %v750_v13 = vpop.f32.mrf.mxu0 }
  0xaa   : > { %v751_v15 = vadd.f32 %v4898_v7, %v750_v13 }
  0xac   : > { %v5186_v16 = vadd.f32 %v754_v14, %v751_v15 }
  0xae   : > { %v761_v17 = vsel %vm757_vm1, %v5186_v16, 0.0 }
  0xaf   : > { %762 = vadd.xlane.f32.xlu0 %v761_v17 }
 0x11a   : > { %v760_v25 = vpop.xlane.xlu0 %759 }
 0x11b   : > { %v771_v26 = vmul.f32 %v5190_v24, %v760_v25 }
 0x11d   : > { %v773_v27 = vsub.f32 %v5179_v11, %v771_v26 }
 0x11f   : > { %v775_v28 = vmul.f32 %v773_v27, %v773_v27 }
 0x121   : > { %v777_v29 = vsel %vm757_vm1, %v775_v28, 0.0 }
 0x122   : > { %778 = vadd.xlane.f32.xlu1 %v777_v29  ;;  %v763_v30 = vpop.xlane.xlu0 %762 }
 0x123   : > { %v772_v31 = vmul.f32 %v5190_v24, %v763_v30 }
 0x125   : > { %v774_v32 = vsub.f32 %v5186_v16, %v772_v31 }
 0x127   : > { %v776_v33 = vmul.f32 %v774_v32, %v774_v32 }
 0x129   : > { %v780_v34 = vsel %vm757_vm1, %v776_v33, 0.0 }
 0x12a   : > { %781 = vadd.xlane.f32.xlu1 %v780_v34  ;;  %v4761_v34 = vld [vmem:[%s6466_s17 + $0x30] sm:$0xff]  }
 0x12b   : > { %v4725_v35 = vunpack.c.l.bf16 %v4761_v34 }
 0x195   : > { %v779_v36 = vpop.xlane.xlu1 %778 }
 0x196   : > { %v783_v38 = vmul.f32 %v779_v36, %v5190_v24  ;;  %v4726_v36 = vunpack.c.h.bf16 %v4761_v34 }
 0x198   : > { %v785_v39 = vadd.f32 1e-05, %v783_v38  ;;  %v5264_v37 = vpack.i.bf16 %v4726_v36, %v4725_v35  ;;  %v4762_v38 = vld [vmem:[%s6466_s17 + $0x38] sm:$0xff]  }
 0x19a   : > { %4940 = vrsqrt.f32 %v785_v39  ;;  %vm793_vm4 = vweird.f32 %v785_v39 }
 0x19d   : > { %v782_v40 = vpop.xlane.xlu1 %781 }
 0x19e   : > { %v784_v41 = vmul.f32 %v782_v40, %v5190_v24  ;;  %v4729_v40 = vunpack.c.l.bf16 %v4762_v38 }
 0x1a0   : > { %v4941_v42 = vpop.eup %4940  ;;  %v786_v43 = vadd.f32 1e-05, %v784_v41  ;;  %v4730_v41 = vunpack.c.h.bf16 %v4762_v38 }
 0x1a1   : > { %v788_v44 = vmul.f32 %v4941_v42, %v785_v39  ;;  %vm794_vm3 = vweird.f32 %v4941_v42  ;;  %v4759_v39 = vld [vmem:[%s6466_s17 + $0x20] sm:$0xff]  }
 0x1a2   : > { %4942 = vrsqrt.f32 %v786_v43  ;;  %vm795_vm5 = vmor %vm793_vm4, %vm794_vm3  ;;  %vm803_vm7 = vweird.f32 %v786_v43 }
 0x1a3   : > { %v789_v45 = vmul.f32 %v4941_v42, %v788_v44  ;;  %v5276_v44 = vpack.i.bf16 %v4730_v41, %v4729_v40 }
 0x1a5   : > { %v790_v46 = vmul.f32 0.5, %v789_v45 }
 0x1a7   : > { %v791_v47 = vsub.f32 1.5, %v790_v46  ;;  %v4760_v46 = vld [vmem:[%s6466_s17 + $0x28] sm:$0xff]  }
 0x1a8   : > { %v4943_v48 = vpop.eup %4942 }
 0x1a9   : > { %v792_v49 = vmul.f32 %v4941_v42, %v791_v47  ;;  %v798_v50 = vmul.f32 %v4943_v48, %v786_v43  ;;  %vm804_vm6 = vweird.f32 %v4943_v48  ;;  %v4718_v43 = vunpack.c.h.bf16 %v4759_v39  ;;  %v4757_v47 = vld [vmem:[%s6466_s17 + $0x10] sm:$0xff]  }
 0x1aa   : > { %vm805_vm8 = vmor %vm803_vm7, %vm804_vm6 }
 0x1ab   : > { %v799_v51 = vmul.f32 %v4943_v48, %v798_v50  ;;  %v796_v52 = vsel %vm795_vm5, %v4941_v42, %v792_v49  ;;  %v4717_v42 = vunpack.c.l.bf16 %v4759_v39  ;;  %v4722_v49 = vunpack.c.h.bf16 %v4760_v46 }
 0x1ac   : > { %v807_v55 = vmul.f32 %v796_v52, %v773_v27  ;;  %v4709_v50 = vunpack.c.l.bf16 %v4757_v47 }
 0x1ad   : > { %v800_v53 = vmul.f32 0.5, %v799_v51  ;;  %v5278_v45 = vpack.i.bf16 %v4718_v43, %v4717_v42  ;;  %v4710_v51 = vunpack.c.h.bf16 %v4757_v47  ;;  %v4692_v43 = vld [vmem:[%s6467_s16] sm:$0xff]  }
 0x1ae   : > { %v813_v60 = vmul.f32 %v4899_v56, %v807_v55  ;;  %v4700_v55 = vld [vmem:[%s6466_s17] sm:$0xff]  }
 0x1af   : > { %v801_v54 = vsub.f32 1.5, %v800_v53  ;;  %v5292_v53 = vpack.i.bf16 %v4710_v51, %v4709_v50  ;;  %v5353_v51 = vunpack.c.h.bf16 %v4692_v43 }
 0x1b0   : > { %v819_v63 = vadd.f32 %v4900_v61, %v813_v60 }
 0x1b1   : > { %v802_v57 = vmul.f32 %v4943_v48, %v801_v54  ;;  %v4758_v54 = vld [vmem:[%s6466_s17 + $0x18] sm:$0xff]  }
 0x1b3   : > { %v806_v58 = vsel %vm805_vm8, %v4943_v48, %v802_v57  ;;  %v4721_v48 = vunpack.c.l.bf16 %v4760_v46  ;;  %v4714_v57 = vunpack.c.h.bf16 %v4758_v54 }
 0x1b4   : > { %v808_v59 = vmul.f32 %v806_v58, %v774_v32  ;;  %v4701_v58 = vunpack.c.l.bf16 %v4700_v55 }
 0x1b5   : > { %v5290_v52 = vpack.i.bf16 %v4722_v49, %v4721_v48 }
 0x1b6   : > { %v814_v62 = vmul.f32 %v4899_v56, %v808_v59  ;;  %v4713_v56 = vunpack.c.l.bf16 %v4758_v54  ;;  %v4702_v59 = vunpack.c.h.bf16 %v4700_v55 }
 0x1b8   : > { %v820_v0 = vadd.f32 %v4900_v61, %v814_v62  ;;  %v5304_v60 = vpack.i.bf16 %v4714_v57, %v4713_v56  ;;  %v5306_v61 = vpack.i.bf16 %v4702_v59, %v4701_v58  ;;  %v4756_v62 = vld [vmem:[%s6466_s17 + $0x8] sm:$0xff]  }
 0x1ba   : > { %v826_v1 = vpack.c.bf16 %v820_v0, %v819_v63  ;;  %v4705_v63 = vunpack.c.l.bf16 %v4756_v62  ;;  %v4706_v0 = vunpack.c.h.bf16 %v4756_v62 }
 0x1bc   : > { %4240 = vmatmul.msk.bf16.vlgmr.msra.gmra.mxu1 %vm757_vm1, %v826_v1  ;;  %v5315_v1 = vpack.i.bf16 %v4706_v0, %v4705_v63 }
 0x239   : > { %v854_v2 = vpop.f32.mrf.mxu1 }
 0x23a   : > { %v5216_v4 = vadd.f32 %v4901_v3, %v854_v2 }
 0x23c   : > { %v904_v6 = vpack.c.bf16 %v5216_v4, %v5216_v4 }
 0x23e   : > { %v1039_v12 = vunpack.c.l.b16 %v904_v6 }
 0x241   : > { %v856_v5 = vpop.f32.mrf.mxu1 }
 0x242   : > { %v5220_v7 = vadd.f32 %v4901_v3, %v856_v5 }
 0x244   : > { %v905_v8 = vpack.c.bf16 %v5220_v7, %v5220_v7  ;;  %v4788_v9 = vpack.i.bf16 %v5220_v7, %v5216_v4  ;;  %v859_v10 = vpack.c.bf16 %v5220_v7, %v5216_v4 }
 0x246   : > { %v1040_v13 = vunpack.c.l.b16 %v905_v8  ;;  %4789 = vrot.lane.b32.xlu2 %v4788_v9, %s6437_s23 }
 0x248   : > { %v5229_v14 = vpack.c.b16 %v1040_v13, %v1039_v12 }
 0x24a   : > { %v5346_v48 = vunpack.c.l.bf16 %v5229_v14  ;;  %v1044_v54 = vunpack.c.h.bf16 %v5229_v14 }
 0x2a0   : > { %v4790_v15 = vpop.permute.xlu2 %4789 }
 0x2a1   : > { %v4791_v17 = vunpack.i.l.bf16 %v4790_v15  ;;  %v4792_v18 = vunpack.i.h.bf16 %v4790_v15 }
 0x2a3   : > { %868 = vxpose.xlu2.b32.start [1/2] (short) (narrow) %v4791_v17, 32 }
 0x2ab   : > { %869 = vxpose.xlu2.b32.end [2/2] (short) (narrow) %v4792_v18, 32 }
 0x33c   : > { %v884_v19 = vpop.trf.xlu2 }
 0x33d   : > { %v900_v20 = vpack.c.bf16 %v884_v19, %v884_v19 }
 0x33f   : > { %v910_v23 = vunpack.c.l.b16 %v900_v20 }
 0x344   : > { %v885_v21 = vpop.trf.xlu2 }
 0x345   : > { %v901_v22 = vpack.c.bf16 %v885_v21, %v885_v21  ;;  %v4755_v21 = vld [vmem:[%s6467_s16 + $0x8] sm:$0xff]  }
 0x347   : > { %v911_v25 = vunpack.c.l.b16 %v901_v22 }
 0x349   : > { %v5231_v26 = vpack.c.b16 %v911_v25, %v910_v23 }
 0x34b   : > { %916 = vrot.lane.b32.xlu0 %v5231_v26, %s6435_s1 }
 0x34c   : > { %v886_v27 = vpop.trf.xlu2 }
 0x34d   : > { %v902_v28 = vpack.c.bf16 %v886_v27, %v886_v27 }
 0x34f   : > { %v912_v31 = vunpack.c.l.b16 %v902_v28  ;;  %v5329_v28 = vunpack.c.l.bf16 %v4755_v21 }
 0x353   : > { %920 = vrot.lane.b32.xlu0 %v5231_v26, %s6426_s26 }
 0x354   : > { %v887_v29 = vpop.trf.xlu2 }
 0x355   : > { %v903_v30 = vpack.c.bf16 %v887_v29, %v887_v29  ;;  %v5331_v29 = vunpack.c.h.bf16 %v4755_v21 }
 0x357   : > { %v913_v32 = vunpack.c.l.b16 %v903_v30 }
 0x359   : > { %v5237_v33 = vpack.c.b16 %v913_v32, %v912_v31 }
 0x35b   : > { %938 = vrot.lane.b32.xlu2 %v5237_v33, %s6437_s23  ;;  %922 = vrot.lane.b32.xlu1 %v5237_v33, %s6426_s26  ;;  %s6470_s26 = smov 80  }
 0x35c   : > { %918 = vrot.lane.b32.xlu0 %v5237_v33, %s6435_s1 }
 0x363   : > { %930 = vrot.lane.b32.xlu1 %v5237_v33, %s6433_s27 }
 0x364   : > { %926 = vrot.lane.b32.xlu0 %v5237_v33, %s6424_s28 }
 0x36b   : > { %934 = vrot.lane.b32.xlu1 %v5237_v33, %s6422_s29 }
 0x36c   : > { %932 = vrot.lane.b32.xlu0 %v5231_v26, %s6422_s29  ;;  %s6468_s29 = smov 32  }
 0x373   : > { %924 = vrot.lane.b32.xlu1 %v5231_v26, %s6424_s28  ;;  %s6444_s28 = smov 24  }
 0x374   : > { %942 = vrot.lane.b32.xlu0 %v5237_v33, %s6431_s0 }
 0x37b   : > { %928 = vrot.lane.b32.xlu1 %v5231_v26, %s6433_s27 }
 0x37c   : > { %940 = vrot.lane.b32.xlu0 %v5231_v26, %s6431_s0 }
 0x383   : > { %936 = vrot.lane.b32.xlu1 %v5231_v26, %s6437_s23 }
 0x384   : > { %4799 = vrot.lane.b32.xlu0 %v5264_v37, %s6433_s27 }
 0x38b   : > { %4794 = vrot.lane.b32.xlu1 %v5276_v44, %s6433_s27 }
 0x38c   : > { %4809 = vrot.lane.b32.xlu0 %v5278_v45, %s6433_s27 }
 0x393   : > { %4804 = vrot.lane.b32.xlu1 %v5290_v52, %s6433_s27 }
 0x394   : > { %4819 = vrot.lane.b32.xlu0 %v5292_v53, %s6433_s27 }
 0x39b   : > { %4814 = vrot.lane.b32.xlu1 %v5304_v60, %s6433_s27 }
 0x39c   : > { %4829 = vrot.lane.b32.xlu0 %v5306_v61, %s6433_s27 }
 0x3a3   : > { %4824 = vrot.lane.b32.xlu1 %v5315_v1, %s6433_s27 }
 0x3b5   : > { %v939_v22 = vpop.permute.xlu2 %938 }
 0x3bd   : > { %v917_v2 = vpop.permute.xlu0 %916 }
 0x3be   : > { %v947_v39 = vsel %vm944_vm9, %v5231_v26, %v917_v2  ;;  %v5351_v26 = vunpack.c.l.bf16 %v4692_v43 }
 0x3c5   : > { %v921_v3 = vpop.permute.xlu0 %920 }
 0x3c6   : > { %v952_v40 = vsel %vm757_vm1, %v947_v39, %v921_v3 }
 0x3cd   : > { %v923_v5 = vpop.permute.xlu1 %922 }
 0x3ce   : > { %v919_v6 = vpop.permute.xlu0 %918 }
 0x3cf   : > { %v950_v12 = vsel %vm944_vm9, %v5237_v33, %v919_v6 }
 0x3d0   : > { %v954_v15 = vsel %vm757_vm1, %v950_v12, %v923_v5 }
 0x3d5   : > { %v931_v8 = vpop.permute.xlu1 %930 }
 0x3d6   : > { %v927_v9 = vpop.permute.xlu0 %926 }
 0x3d7   : > { %v959_v18 = vsel %vm955_vm10, %v954_v15, %v927_v9 }
 0x3d8   : > { %v963_v19 = vsel %vm735_vm0, %v959_v18, %v931_v8 }
 0x3dd   : > { %v935_v13 = vpop.permute.xlu1 %934 }
 0x3de   : > { %v933_v17 = vpop.permute.xlu0 %932  ;;  %v968_v20 = vsel %vm964_vm11, %v963_v19, %v935_v13 }
 0x3df   : > { %v973_v25 = vsel %vm969_vm12, %v968_v20, %v939_v22 }
 0x3e5   : > { %v925_v23 = vpop.permute.xlu1 %924 }
 0x3e6   : > { %v943_v27 = vpop.permute.xlu0 %942  ;;  %v957_v41 = vsel %vm955_vm10, %v952_v40, %v925_v23 }
 0x3e7   : > { %v979_v30 = vsel %vm974_vm13, %v973_v25, %v943_v27 }
 0x3e8   : > { %v983_v31 = vunpack.c.l.bf16 %v979_v30  ;;  %v984_v32 = vunpack.c.h.bf16 %v979_v30 }
 0x3ea   : > { %v991_v33 = vmul.f32 %v5329_v28, %v983_v31  ;;  %v992_v34 = vmul.f32 %v5331_v29, %v984_v32 }
 0x3ec   : > { %v994_v35 = vpack.c.bf16 %v992_v34, %v991_v33 }
 0x3ed   : > { %v929_v36 = vpop.permute.xlu1 %928 }
 0x3ee   : > { %1004 = vmatpush.bf16.msra.mxu2 %v994_v35  ;;  %v941_v38 = vpop.permute.xlu0 %940  ;;  %v961_v42 = vsel %vm735_vm0, %v957_v41, %v929_v36 }
 0x3ef   : > { %v966_v47 = vsel %vm964_vm11, %v961_v42, %v933_v17 }
 0x3f5   : > { %v937_v46 = vpop.permute.xlu1 %936 }
 0x3f6   : > { %v971_v49 = vsel %vm969_vm12, %v966_v47, %v937_v46  ;;  %v5349_v50 = vpop.permute.xlu0 %4799 }
 0x3f7   : > { %v976_v55 = vsel %vm974_vm13, %v971_v49, %v941_v38  ;;  %v4802_v56 = vunpack.i.h.bf16 %v5349_v50  ;;  %v4801_v57 = vunpack.i.l.bf16 %v5349_v50 }
 0x3f8   : > { %v981_v58 = vunpack.c.l.bf16 %v976_v55  ;;  %v982_v59 = vunpack.c.h.bf16 %v976_v55 }
 0x3f9   : > { %v1137_v62 = vmul.f32 %v4801_v57, %v5346_v48  ;;  %v1138_v63 = vmul.f32 %v4802_v56, %v1044_v54 }
 0x3fa   : > { %v989_v0 = vmul.f32 %v5351_v26, %v981_v58  ;;  %v990_v2 = vmul.f32 %v5353_v51, %v982_v59 }
 0x3fb   : > { %v1147_v14 = vpack.c.bf16 %v1138_v63, %v1137_v62 }
 0x3fc   : > { %v993_v3 = vpack.c.bf16 %v990_v2, %v989_v0 }
 0x3fd   : > { %1170 = vrot.lane.b32.xlu0 %v1147_v14, %s6433_s27  ;;  %v5367_v5 = vpop.permute.xlu1 %4794 }
 0x3fe   : > { %v4797_v6 = vunpack.i.h.bf16 %v5367_v5  ;;  %v4796_v8 = vunpack.i.l.bf16 %v5367_v5  ;;  %v5371_v9 = vpop.permute.xlu0 %4809  ;;  %1005 = vmatpush.bf16.msra.mxu2 %v993_v3 }
 0x3ff   : > { %v4812_v12 = vunpack.i.h.bf16 %v5371_v9  ;;  %v4811_v13 = vunpack.i.l.bf16 %v5371_v9 }
 0x400   : > { %v1139_v15 = vmul.f32 %v4796_v8, %v5346_v48  ;;  %v1140_v17 = vmul.f32 %v4797_v6, %v1044_v54 }
 0x401   : > { %v1133_v18 = vmul.f32 %v4811_v13, %v5346_v48  ;;  %v1134_v19 = vmul.f32 %v4812_v12, %v1044_v54  ;;  %4241 = vmatmul.msk.bf16.vlgmr.msra.gmra.mxu2 %vm757_vm1, %v859_v10 }
 0x402   : > { %v1148_v20 = vpack.c.bf16 %v1140_v17, %v1139_v15 }
 0x403   : > { %v1145_v21 = vpack.c.bf16 %v1134_v19, %v1133_v18 }
 0x404   : > { %1172 = vrot.lane.b32.xlu1 %v1148_v20, %s6433_s27 }
 0x405   : > { %1166 = vrot.lane.b32.xlu0 %v1145_v21, %s6433_s27  ;;  %v5391_v22 = vpop.permute.xlu1 %4804 }
 0x406   : > { %v4807_v23 = vunpack.i.h.bf16 %v5391_v22  ;;  %v4806_v25 = vunpack.i.l.bf16 %v5391_v22  ;;  %v5395_v27 = vpop.permute.xlu0 %4819 }
 0x407   : > { %v4822_v30 = vunpack.i.h.bf16 %v5395_v27  ;;  %v4821_v4 = vunpack.i.l.bf16 %v5395_v27 }
 0x408   : > { %v1135_v7 = vmul.f32 %v4806_v25, %v5346_v48  ;;  %v1136_v10 = vmul.f32 %v4807_v23, %v1044_v54 }
 0x409   : > { %v1129_v31 = vmul.f32 %v4821_v4, %v5346_v48  ;;  %v1130_v32 = vmul.f32 %v4822_v30, %v1044_v54 }
 0x40a   : > { %v1146_v33 = vpack.c.bf16 %v1136_v10, %v1135_v7 }
 0x40b   : > { %v1143_v34 = vpack.c.bf16 %v1130_v32, %v1129_v31 }
 0x40c   : > { %1168 = vrot.lane.b32.xlu1 %v1146_v33, %s6433_s27 }
 0x40d   : > { %1162 = vrot.lane.b32.xlu0 %v1143_v34, %s6433_s27  ;;  %v5411_v35 = vpop.permute.xlu1 %4814 }
 0x40e   : > { %v4817_v36 = vunpack.i.h.bf16 %v5411_v35  ;;  %v4816_v38 = vunpack.i.l.bf16 %v5411_v35  ;;  %v5415_v39 = vpop.permute.xlu0 %4829 }
 0x40f   : > { %v6430_v40 = vunpack.i.h.bf16 %v5415_v39  ;;  %v4831_v41 = vunpack.i.l.bf16 %v5415_v39 }
 0x410   : > { %v1131_v42 = vmul.f32 %v4816_v38, %v5346_v48  ;;  %v1132_v43 = vmul.f32 %v4817_v36, %v1044_v54 }
 0x411   : > { %v1125_v46 = vmul.f32 %v4831_v41, %v5346_v48  ;;  %v1126_v47 = vmul.f32 %v6430_v40, %v1044_v54 }
 0x412   : > { %v1144_v49 = vpack.c.bf16 %v1132_v43, %v1131_v42 }
 0x413   : > { %v1141_v55 = vpack.c.bf16 %v1126_v47, %v1125_v46 }
 0x414   : > { %1164 = vrot.lane.b32.xlu1 %v1144_v49, %s6433_s27 }
 0x415   : > { %1158 = vrot.lane.b32.xlu0 %v1141_v55, %s6433_s27  ;;  %v5431_v58 = vpop.permute.xlu1 %4824 }
 0x416   : > { %v6428_v59 = vunpack.i.h.bf16 %v5431_v58  ;;  %v6429_v62 = vunpack.i.l.bf16 %v5431_v58 }
 0x418   : > { %v1127_v63 = vmul.f32 %v6429_v62, %v5346_v48  ;;  %v1128_v0 = vmul.f32 %v6428_v59, %v1044_v54 }
 0x41a   : > { %v1142_v2 = vpack.c.bf16 %v1128_v0, %v1127_v63 }
 0x41c   : > { %1160 = vrot.lane.b32.xlu1 %v1142_v2, %s6433_s27 }
 0x46f   : > { %v1171_v14 = vpop.permute.xlu0 %1170 }
 0x476   : > { %v1173_v3 = vpop.permute.xlu1 %1172 }
 0x477   : > { %1182 = vmatpush.bf16.msra.mxu3 %v1173_v3  ;;  %v1167_v15 = vpop.permute.xlu0 %1166 }
 0x47b   : > { %1183 = vmatpush.bf16.msra.mxu3 %v1171_v14 }
 0x47e   : > { %v1169_v17 = vpop.permute.xlu1 %1168 }
 0x47f   : > { %1184 = vmatpush.bf16.msra.mxu3 %v1169_v17  ;;  %v1163_v20 = vpop.permute.xlu0 %1162 }
 0x483   : > { %1185 = vmatpush.bf16.msra.mxu3 %v1167_v15 }
 0x484   : > { %v1007_v18 = vpop.f32.mrf.mxu2 }
 0x485   : > { %v1012_v21 = vmul.f32 0.5, %v1007_v18 }
 0x486   : > { %v1165_v19 = vpop.permute.xlu1 %1164 }
 0x487   : > { %1186 = vmatpush.bf16.msra.mxu3 %v1165_v19  ;;  %v1159_v32 = vpop.permute.xlu0 %1158 }
 0x48b   : > { %1187 = vmatpush.bf16.msra.mxu3 %v1163_v20 }
 0x48c   : > { %v1009_v48 = vpop.f32.mrf.mxu2 }
 0x48d   : > { %v1013_v7 = vmul.f32 0.5, %v1009_v48 }
 0x48e   : > { %v1161_v54 = vpop.permute.xlu1 %1160 }
 0x48f   : > { %v1014_v10 = vmax.f32 %v1012_v21, %v1013_v7  ;;  %1188 = vmatpush.bf16.msra.mxu3 %v1161_v54 }
 0x491   : > { %v1015_v31 = vrot.slane %v1014_v10, 4 }
 0x493   : > { %v1016_v33 = vmax.f32 %v1014_v10, %v1015_v31  ;;  %1189 = vmatpush.bf16.msra.mxu3 %v1159_v32 }
 0x495   : > { %v1017_v34 = vrot.slane %v1016_v33, 2 }
 0x497   : > { %v1018_v42 = vmax.f32 %v1016_v33, %v1017_v34 }
 0x499   : > { %v1019_v43 = vrot.slane %v1018_v42, 1 }
 0x49b   : > { %v1020_v46 = vmax.f32 %v1018_v42, %v1019_v43 }
 0x49d   : > { %v1021_v47 = vsub.f32 %v1012_v21, %v1020_v46  ;;  %v1022_v49 = vsub.f32 %v1013_v7, %v1020_v46  ;;  %v4638_v21 = vld [vmem:[%s6404_s7 + $0x8] sm:$0xff]  ;;  %v4637_v7 = vld [vmem:[%s6404_s7] sm:$0xff] }
 0x49e   : > { %1222 = vmatpush.bf16.msrb.mxu1 %v4638_v21 }
 0x49f   : > { %v1023_v55 = vmul.f32 1.442695, %v1021_v47  ;;  %v1025_v63 = vmul.f32 1.442695, %v1022_v49 }
 0x4a1   : > { %4944 = vpow2.f32 %v1023_v55 }
 0x4a2   : > { %4946 = vpow2.f32 %v1025_v63  ;;  %1223 = vmatpush.bf16.msrb.mxu1 %v4637_v7 }
 0x4a7   : > { %v4945_v0 = vpop.eup %4944 }
 0x4a8   : > { %v4947_v2 = vpop.eup %4946 }
 0x4a9   : > { %v1027_v14 = vadd.f32 %v4947_v2, %v4945_v0 }
 0x4ab   : > { %v1028_v3 = vrot.slane %v1027_v14, 4 }
 0x4ad   : > { %v1029_v15 = vadd.f32 %v1028_v3, %v1027_v14 }
 0x4af   : > { %v1030_v17 = vrot.slane %v1029_v15, 2 }
 0x4b1   : > { %v1031_v18 = vadd.f32 %v1030_v17, %v1029_v15 }
 0x4b3   : > { %v1032_v19 = vrot.slane %v1031_v18, 1 }
 0x4b5   : > { %v1033_v20 = vadd.f32 %v1032_v19, %v1031_v18  ;;  %v4640_v19 = vld [vmem:[%s6405_s8 + $0x8] sm:$0xff] }
 0x4b6   : > { %1320 = vmatpush.bf16.msrb.mxu2 %v4640_v19 }
 0x4b7   : > { %4948 = vrcp.f32 %v1033_v20 }
 0x4bd   : > { %v4949_v48 = vpop.eup %4948 }
 0x4be   : > { %v1035_v54 = vmul.f32 %v4949_v48, %v4945_v0  ;;  %v1036_v10 = vmul.f32 %v4949_v48, %v4947_v2  ;;  %v4639_v48 = vld [vmem:[%s6405_s8] sm:$0xff] }
 0x4bf   : > { %1321 = vmatpush.bf16.msrb.mxu2 %v4639_v48 }
 0x4c0   : > { %v1149_v31 = vpack.c.bf16 %v1036_v10, %v1035_v54 }
 0x4c2   : > { %1190 = vmatmul.bf16.vlgmr.msra.gmra.mxu3 %v1149_v31 }
 0x545   : > { %v1191_v32 = vpop.f32.mrf.mxu3 }
 0x54d   : > { %v1193_v33 = vpop.f32.mrf.mxu3 }
 0x54e   : > { %v1200_v34 = vpack.c.bf16 %v1193_v33, %v1191_v32 }
 0x550   : > { %4250 = vmatmul.msk.bf16.vlgmr.msrb.gmra.mxu1 %vm757_vm1, %v1200_v34 }
 0x5cd   : > { %v1225_v42 = vpop.f32.mrf.mxu1 }
 0x5ce   : > { %v5449_v43 = vadd.f32 %v1225_v42, %v5179_v11 }
 0x5d0   : > { %v1232_v46 = vsel %vm757_vm1, %v5449_v43, 0.0 }
 0x5d1   : > { %1233 = vadd.xlane.f32.xlu1 %v1232_v46 }
 0x5d5   : > { %v1227_v47 = vpop.f32.mrf.mxu1 }
 0x5d6   : > { %v5454_v49 = vadd.f32 %v1227_v47, %v5186_v16 }
 0x5d8   : > { %v1235_v55 = vsel %vm757_vm1, %v5454_v49, 0.0 }
 0x5d9   : > { %1236 = vadd.xlane.f32.xlu0 %v1235_v55 }
 0x644   : > { %v1234_v63 = vpop.xlane.xlu1 %1233 }
 0x645   : > { %v1238_v0 = vmul.f32 %v1234_v63, %v5190_v24 }
 0x647   : > { %v1240_v2 = vsub.f32 %v5449_v43, %v1238_v0 }
 0x649   : > { %v1242_v14 = vmul.f32 %v1240_v2, %v1240_v2 }
 0x64b   : > { %v1244_v11 = vsel %vm757_vm1, %v1242_v14, 0.0 }
 0x64c   : > { %1245 = vadd.xlane.f32.xlu2 %v1244_v11  ;;  %v1237_v3 = vpop.xlane.xlu0 %1236 }
 0x64d   : > { %v1239_v15 = vmul.f32 %v1237_v3, %v5190_v24 }
 0x64f   : > { %v1241_v17 = vsub.f32 %v5454_v49, %v1239_v15 }
 0x651   : > { %v1243_v16 = vmul.f32 %v1241_v17, %v1241_v17 }
 0x653   : > { %v1247_v18 = vsel %vm757_vm1, %v1243_v16, 0.0  ;;  %v4902_v16 = vld [vmem:[%s6409_s12 + $0x1] ss:$0 sm:$0xff] }
 0x654   : > { %1248 = vadd.xlane.f32.xlu1 %v1247_v18 }
 0x6bf   : > { %v1246_v20 = vpop.xlane.xlu2 %1245 }
 0x6c0   : > { %v1250_v54 = vmul.f32 %v1246_v20, %v5190_v24 }
 0x6c2   : > { %v1252_v10 = vadd.f32 1e-05, %v1250_v54  ;;  %v4903_v54 = vld [vmem:[%s6410_s13 + $0x1] ss:$0 sm:$0xff] }
 0x6c4   : > { %4950 = vrsqrt.f32 %v1252_v10  ;;  %vm1260_vm15 = vweird.f32 %v1252_v10 }
 0x6c7   : > { %v1249_v31 = vpop.xlane.xlu1 %1248 }
 0x6c8   : > { %v1251_v21 = vmul.f32 %v1249_v31, %v5190_v24 }
 0x6ca   : > { %v4951_v7 = vpop.eup %4950  ;;  %v1253_v32 = vadd.f32 1e-05, %v1251_v21 }
 0x6cb   : > { %v1255_v33 = vmul.f32 %v4951_v7, %v1252_v10  ;;  %vm1261_vm14 = vweird.f32 %v4951_v7 }
 0x6cc   : > { %4952 = vrsqrt.f32 %v1253_v32  ;;  %vm1262_vm2 = vmor %vm1260_vm15, %vm1261_vm14  ;;  %vm1270_vm4 = vweird.f32 %v1253_v32 }
 0x6cd   : > { %v1256_v34 = vmul.f32 %v4951_v7, %v1255_v33 }
 0x6cf   : > { %v1257_v42 = vmul.f32 0.5, %v1256_v34 }
 0x6d1   : > { %v1258_v46 = vsub.f32 1.5, %v1257_v42 }
 0x6d2   : > { %v4953_v47 = vpop.eup %4952 }
 0x6d3   : > { %v1259_v55 = vmul.f32 %v4951_v7, %v1258_v46  ;;  %v1265_v63 = vmul.f32 %v4953_v47, %v1253_v32  ;;  %vm1271_vm3 = vweird.f32 %v4953_v47 }
 0x6d4   : > { %vm1272_vm5 = vmor %vm1270_vm4, %vm1271_vm3 }
 0x6d5   : > { %v1266_v0 = vmul.f32 %v4953_v47, %v1265_v63  ;;  %v1263_v14 = vsel %vm1262_vm2, %v4951_v7, %v1259_v55 }
 0x6d6   : > { %v1274_v15 = vmul.f32 %v1263_v14, %v1240_v2  ;;  %v4904_v2 = vld [vmem:[%s6406_s9] ss:$0 sm:$0xff] }
 0x6d7   : > { %v1267_v11 = vmul.f32 0.5, %v1266_v0 }
 0x6d8   : > { %v1281_v48 = vmul.f32 %v4902_v16, %v1274_v15 }
 0x6d9   : > { %v1268_v3 = vsub.f32 1.5, %v1267_v11 }
 0x6da   : > { %v1288_v31 = vadd.f32 %v4903_v54, %v1281_v48  ;;  %v4644_v48 = vld [vmem:[%s6407_s10 + $0x18] sm:$0xff] }
 0x6db   : > { %v1269_v18 = vmul.f32 %v4953_v47, %v1268_v3  ;;  %1460 = vmatpush.bf16.msrb.mxu0 %v4644_v48 }
 0x6dd   : > { %v1273_v19 = vsel %vm1272_vm5, %v4953_v47, %v1269_v18 }
 0x6de   : > { %v1275_v20 = vmul.f32 %v1273_v19, %v1241_v17 }
 0x6e0   : > { %v1282_v10 = vmul.f32 %v4902_v16, %v1275_v20 }
 0x6e2   : > { %v1289_v21 = vadd.f32 %v4903_v54, %v1282_v10 }
 0x6e4   : > { %v1294_v7 = vpack.c.bf16 %v1289_v21, %v1288_v31 }
 0x6e6   : > { %4261 = vmatmul.msk.bf16.vlgmr.msrb.gmra.mxu2 %vm757_vm1, %v1294_v7 }
 0x769   : > { %v1323_v33 = vpop.f32.mrf.mxu2 }
 0x76a   : > { %v5482_v32 = vadd.f32 %v4904_v2, %v1323_v33 }
 0x76c   : > { %v5485_v17 = vmul.f32 0.70710677, %v5482_v32 }
 0x76e   : > { %v1332_v34 = vmul.f32 %v5485_v17, %v5485_v17 }
 0x770   : > { %v1333_v42 = vmin.f32 %v1332_v34, 16.0  ;;  %v4643_v34 = vld [vmem:[%s6407_s10 + $0x10] sm:$0xff] }
 0x771   : > { %v1325_v46 = vpop.f32.mrf.mxu2  ;;  %1461 = vmatpush.bf16.msrb.mxu0 %v4643_v34 }
 0x772   : > { %v1334_v47 = vmul.f32 2.1237322e-06, %v1333_v42  ;;  %v1345_v55 = vmul.f32 3.8918573e-05, %v1333_v42  ;;  %v5489_v63 = vadd.f32 %v4904_v2, %v1325_v46 }
 0x774   : > { %v1335_v0 = vadd.f32 0.00028619796, %v1334_v47  ;;  %v1346_v14 = vadd.f32 0.001143296, %v1345_v55  ;;  %v5492_v11 = vmul.f32 0.70710677, %v5489_v63 }
 0x776   : > { %v1347_v3 = vmul.f32 %v1346_v14, %v1333_v42  ;;  %v1372_v15 = vmul.f32 %v5492_v11, %v5492_v11  ;;  %v1336_v16 = vmul.f32 %v1335_v0, %v1333_v42 }
 0x778   : > { %v1348_v18 = vadd.f32 0.014752088, %v1347_v3  ;;  %v1373_v19 = vmin.f32 %v1372_v15, 16.0  ;;  %v1337_v31 = vadd.f32 0.0036580483, %v1336_v16  ;;  %v4642_v16 = vld [vmem:[%s6407_s10 + $0x8] sm:$0xff] }
 0x779   : > { %1462 = vmatpush.bf16.msrb.mxu0 %v4642_v16 }
 0x77a   : > { %v1349_v20 = vmul.f32 %v1348_v18, %v1333_v42  ;;  %v1374_v54 = vmul.f32 2.1237322e-06, %v1373_v19  ;;  %v1385_v10 = vmul.f32 3.8918573e-05, %v1373_v19  ;;  %v1338_v55 = vmul.f32 %v1337_v31, %v1333_v42  ;;  %v4641_v31 = vld [vmem:[%s6407_s10] sm:$0xff] }
 0x77c   : > { %v1350_v21 = vadd.f32 0.112945676, %v1349_v20  ;;  %v1375_v7 = vadd.f32 0.00028619796, %v1374_v54  ;;  %v1386_v2 = vadd.f32 0.001143296, %v1385_v10 }
 0x77d   : > { %v1339_v20 = vadd.f32 0.05243302, %v1338_v55  ;;  %1463 = vmatpush.bf16.msrb.mxu0 %v4641_v31 }
 0x77e   : > { %v1351_v33 = vmul.f32 %v1350_v21, %v1333_v42  ;;  %v1376_v46 = vmul.f32 %v1375_v7, %v1373_v19  ;;  %v1387_v47 = vmul.f32 %v1386_v2, %v1373_v19 }
 0x77f   : > { %v1340_v7 = vmul.f32 %v1339_v20, %v1333_v42 }
 0x780   : > { %v1352_v0 = vadd.f32 0.4994258, %v1351_v33  ;;  %v1377_v14 = vadd.f32 0.0036580483, %v1376_v46  ;;  %v1388_v3 = vadd.f32 0.014752088, %v1387_v47 }
 0x781   : > { %v1341_v47 = vadd.f32 0.18741608, %v1340_v7 }
 0x782   : > { %v1353_v15 = vmul.f32 %v1352_v0, %v1333_v42  ;;  %v1389_v18 = vmul.f32 %v1388_v3, %v1373_v19  ;;  %v1378_v54 = vmul.f32 %v1377_v14, %v1373_v19 }
 0x783   : > { %v1342_v14 = vmul.f32 %v1341_v47, %v1333_v42 }
 0x784   : > { %v1354_v48 = vadd.f32 1.0, %v1353_v15  ;;  %v1390_v10 = vadd.f32 0.112945676, %v1389_v18  ;;  %v1379_v2 = vadd.f32 0.05243302, %v1378_v54 }
 0x785   : > { %v1343_v20 = vadd.f32 1.1283791, %v1342_v14 }
 0x786   : > { %4954 = vrcp.f32 %v1354_v48  ;;  %v1391_v21 = vmul.f32 %v1390_v10, %v1373_v19  ;;  %v1380_v3 = vmul.f32 %v1379_v2, %v1373_v19  ;;  %v1366_v18 = vand.u32 2147483648, %v1354_v48 }
 0x787   : > { %v1364_v62 = vand.u32 2147483647, %v1354_v48  ;;  %vm1360_vm7 = vweird.f32 %v1354_v48 }
 0x788   : > { %v1392_v33 = vadd.f32 0.4994258, %v1391_v21  ;;  %v1381_v59 = vadd.f32 0.18741608, %v1380_v3  ;;  %v1367_v31 = vor.u32 1.1754944e-38, %v1366_v18  ;;  %v1328_v18 = vmul.f32 0.5, %v5482_v32 }
 0x789   : > { %vm1365_vm14 = vcmp.eq.f32.partialorder %v1364_v62, 8.507059e+37 }
 0x78a   : > { %v1393_v34 = vmul.f32 %v1392_v33, %v1373_v19  ;;  %v1382_v21 = vmul.f32 %v1381_v59, %v1373_v19  ;;  %v1344_v33 = vmul.f32 %v1343_v20, %v5485_v17  ;;  %v1329_v20 = vmul.f32 0.5, %v5489_v63 }
 0x78c   : > { %v4955_v46 = vpop.eup %4954  ;;  %v1394_v55 = vadd.f32 1.0, %v1393_v34  ;;  %v1383_v42 = vadd.f32 1.1283791, %v1382_v21 }
 0x78d   : > { %v1356_v0 = vmul.f32 %v4955_v46, %v1354_v48  ;;  %vm1361_vm6 = vweird.f32 %v4955_v46 }
 0x78e   : > { %4956 = vrcp.f32 %v1394_v55  ;;  %vm1362_vm8 = vmor %vm1360_vm7, %vm1361_vm6  ;;  %v1406_v47 = vand.u32 2147483648, %v1394_v55  ;;  %v1404_v3 = vand.u32 2147483647, %v1394_v55  ;;  %vm1400_vm2 = vweird.f32 %v1394_v55 }
 0x78f   : > { %v1357_v15 = vsub.f32 1.0, %v1356_v0 }
 0x790   : > { %v1407_v48 = vor.u32 1.1754944e-38, %v1406_v47  ;;  %vm1405_vm4 = vcmp.eq.f32.partialorder %v1404_v3, 8.507059e+37 }
 0x791   : > { %v1358_v16 = vmul.f32 %v4955_v46, %v1357_v15 }
 0x793   : > { %v1359_v40 = vadd.f32 %v4955_v46, %v1358_v16 }
 0x794   : > { %v4957_v54 = vpop.eup %4956 }
 0x795   : > { %v1363_v10 = vsel %vm1362_vm8, %v4955_v46, %v1359_v40  ;;  %v1396_v7 = vmul.f32 %v4957_v54, %v1394_v55  ;;  %vm1401_vm15 = vweird.f32 %v4957_v54  ;;  %v1384_v40 = vmul.f32 %v1383_v42, %v5492_v11  ;;  %v4905_v11 = vld [vmem:[%s6408_s11] ss:$0 sm:$0xff] }
 0x796   : > { %v1368_v2 = vsel %vm1365_vm14, %v1367_v31, %v1363_v10  ;;  %vm1402_vm3 = vmor %vm1400_vm2, %vm1401_vm15 }
 0x797   : > { %v1397_v34 = vsub.f32 1.0, %v1396_v7  ;;  %v1369_v0 = vmul.f32 %v1368_v2, %v1344_v33 }
 0x799   : > { %v1398_v15 = vmul.f32 %v4957_v54, %v1397_v34  ;;  %v4262_v14 = vclamps-f32 %v1369_v0, 1.0 }
 0x79b   : > { %v1399_v16 = vadd.f32 %v4957_v54, %v1398_v15  ;;  %v1412_v46 = vadd.f32 1.0, %v4262_v14 }
 0x79d   : > { %v1403_v59 = vsel %vm1402_vm3, %v4957_v54, %v1399_v16  ;;  %v1414_v31 = vmul.f32 %v1412_v46, %v1328_v18 }
 0x79e   : > { %v1408_v62 = vsel %vm1405_vm4, %v1407_v48, %v1403_v59  ;;  %v4646_v59 = vld [vmem:[%s6465_s24 + $0x18] sm:$0xff] }
 0x79f   : > { %v1409_v19 = vmul.f32 %v1408_v62, %v1384_v40  ;;  %1562 = vmatpush.bf16.msra.mxu1 %v4646_v59 }
 0x7a1   : > { %v4263_v17 = vclamps-f32 %v1409_v19, 1.0 }
 0x7a3   : > { %v1413_v10 = vadd.f32 1.0, %v4263_v17  ;;  %v4645_v17 = vld [vmem:[%s6465_s24 + $0x10] sm:$0xff] }
 0x7a4   : > { %1563 = vmatpush.bf16.msra.mxu1 %v4645_v17 }
 0x7a5   : > { %v1415_v21 = vmul.f32 %v1413_v10, %v1329_v20 }
 0x7a7   : > { %v1424_v7 = vpack.c.bf16 %v1415_v21, %v1414_v31 }
 0x7a9   : > { %4280 = vmatmul.msk.bf16.vlgmr.msrb.gmra.mxu0 %vm735_vm0, %v1424_v7 }
 0x826   : > { %v1465_v55 = vpop.f32.mrf.mxu0 }
 0x827   : > { %v1466_v54 = vadd.f32 %v4905_v11, %v1465_v55 }
 0x829   : > { %v5517_v2 = vadd.f32 %v1466_v54, %v5449_v43 }
 0x82b   : > { %v1472_v32 = vsel %vm757_vm1, %v5517_v2, 0.0 }
 0x82c   : > { %1473 = vadd.xlane.f32.xlu0 %v1472_v32 }
 0x82e   : > { %v1467_v63 = vpop.f32.mrf.mxu0 }
 0x82f   : > { %v1468_v33 = vadd.f32 %v4905_v11, %v1467_v63 }
 0x831   : > { %v5522_v34 = vadd.f32 %v1468_v33, %v5454_v49 }
 0x833   : > { %v1475_v42 = vsel %vm757_vm1, %v5522_v34, 0.0 }
 0x834   : > { %1476 = vadd.xlane.f32.xlu1 %v1475_v42 }
 0x89f   : > { %v1474_v47 = vpop.xlane.xlu0 %1473 }
 0x8a0   : > { %v1478_v0 = vmul.f32 %v1474_v47, %v5190_v24 }
 0x8a2   : > { %v1480_v15 = vsub.f32 %v5517_v2, %v1478_v0 }
 0x8a4   : > { %v1482_v43 = vmul.f32 %v1480_v15, %v1480_v15 }
 0x8a6   : > { %v1484_v3 = vsel %vm757_vm1, %v1482_v43, 0.0  ;;  %v4906_v43 = vld [vmem:[%s6409_s12 + $0x2] ss:$0 sm:$0xff] }
 0x8a7   : > { %v1477_v16 = vpop.xlane.xlu1 %1476  ;;  %1485 = vadd.xlane.f32.xlu0 %v1484_v3 }
 0x8a8   : > { %v1479_v48 = vmul.f32 %v1477_v16, %v5190_v24 }
 0x8aa   : > { %v1481_v14 = vsub.f32 %v5522_v34, %v1479_v48 }
 0x8ac   : > { %v1483_v49 = vmul.f32 %v1481_v14, %v1481_v14 }
 0x8ae   : > { %v1487_v40 = vsel %vm757_vm1, %v1483_v49, 0.0 }
 0x8af   : > { %1488 = vadd.xlane.f32.xlu1 %v1487_v40  ;;  %v4907_v40 = vld [vmem:[%s6410_s13 + $0x2] ss:$0 sm:$0xff] }
 0x91a   : > { %v1486_v62 = vpop.xlane.xlu0 %1485 }
 0x91b   : > { %v1490_v19 = vmul.f32 %v1486_v62, %v5190_v24 }
 0x91d   : > { %v1492_v46 = vadd.f32 1e-05, %v1490_v19 }
 0x91f   : > { %4958 = vrsqrt.f32 %v1492_v46  ;;  %vm1500_vm6 = vweird.f32 %v1492_v46 }
 0x922   : > { %v1489_v18 = vpop.xlane.xlu1 %1488 }
 0x923   : > { %v1491_v20 = vmul.f32 %v1489_v18, %v5190_v24 }
 0x925   : > { %v4959_v10 = vpop.eup %4958  ;;  %v1493_v31 = vadd.f32 1e-05, %v1491_v20 }
 0x926   : > { %v1495_v21 = vmul.f32 %v4959_v10, %v1492_v46  ;;  %vm1501_vm5 = vweird.f32 %v4959_v10 }
 0x927   : > { %4960 = vrsqrt.f32 %v1493_v31  ;;  %vm1502_vm7 = vmor %vm1500_vm6, %vm1501_vm5  ;;  %vm1510_vm14 = vweird.f32 %v1493_v31 }
 0x928   : > { %v1496_v7 = vmul.f32 %v4959_v10, %v1495_v21 }
 0x92a   : > { %v1497_v11 = vmul.f32 0.5, %v1496_v7 }
 0x92c   : > { %v1498_v55 = vsub.f32 1.5, %v1497_v11 }
 0x92d   : > { %v4961_v54 = vpop.eup %4960 }
 0x92e   : > { %v1499_v32 = vmul.f32 %v4959_v10, %v1498_v55  ;;  %v1505_v63 = vmul.f32 %v4961_v54, %v1493_v31  ;;  %vm1511_vm8 = vweird.f32 %v4961_v54 }
 0x92f   : > { %vm1512_vm15 = vmor %vm1510_vm14, %vm1511_vm8  ;;  %vm2218_vm8 = vcmask 64512   ;;  %vm2366_vm14 = vcmask 1043456  }
 0x930   : > { %v1506_v33 = vmul.f32 %v4961_v54, %v1505_v63  ;;  %v1503_v42 = vsel %vm1502_vm7, %v4959_v10, %v1499_v32 }
 0x931   : > { %v1514_v3 = vmul.f32 %v1503_v42, %v1480_v15  ;;  %v4908_v15 = vld [vmem:[%s6403_s6 + $0x1] ss:$0 sm:$0xff] }
 0x932   : > { %v1507_v47 = vmul.f32 0.5, %v1506_v33 }
 0x933   : > { %v1521_v49 = vmul.f32 %v4906_v43, %v1514_v3 }
 0x934   : > { %v1508_v0 = vsub.f32 1.5, %v1507_v47 }
 0x935   : > { %v1528_v46 = vadd.f32 %v4907_v40, %v1521_v49 }
 0x936   : > { %v1509_v16 = vmul.f32 %v4961_v54, %v1508_v0 }
 0x938   : > { %v1513_v48 = vsel %vm1512_vm15, %v4961_v54, %v1509_v16  ;;  %vm6451_vm15 = vcmask 195584  }
 0x939   : > { %v1515_v59 = vmul.f32 %v1513_v48, %v1481_v14 }
 0x93b   : > { %v1522_v62 = vmul.f32 %v4906_v43, %v1515_v59 }
 0x93d   : > { %v1529_v19 = vadd.f32 %v4907_v40, %v1522_v62 }
 0x93f   : > { %v1537_v17 = vpack.c.bf16 %v1529_v19, %v1528_v46 }
 0x941   : > { %4296 = vmatmul.msk.bf16.vlgmr.msra.gmra.mxu1 %vm757_vm1, %v1537_v17 }
 0x9be   : > { %v1565_v18 = vpop.f32.mrf.mxu1 }
 0x9bf   : > { %v5550_v20 = vadd.f32 %v4908_v15, %v1565_v18 }
 0x9c1   : > { %v1615_v31 = vpack.c.bf16 %v5550_v20, %v5550_v20 }
 0x9c3   : > { %v1741_v55 = vunpack.c.l.b16 %v1615_v31 }
 0x9c6   : > { %v1567_v10 = vpop.f32.mrf.mxu1 }
 0x9c7   : > { %v5554_v21 = vadd.f32 %v4908_v15, %v1567_v10 }
 0x9c9   : > { %v1570_v14 = vpack.c.bf16 %v5554_v21, %v5550_v20  ;;  %v1616_v7 = vpack.c.bf16 %v5554_v21, %v5554_v21  ;;  %v4833_v11 = vpack.i.bf16 %v5554_v21, %v5550_v20 }
 0x9cb   : > { %v1742_v54 = vunpack.c.l.b16 %v1616_v7  ;;  %4834 = vrot.lane.b32.xlu0 %v4833_v11, %s6437_s23 }
 0x9cd   : > { %v1743_v32 = vpack.c.b16 %v1742_v54, %v1741_v55 }
 0x9cf   : > { %v1745_v15 = vunpack.c.l.bf16 %v1743_v32  ;;  %v1746_v10 = vunpack.c.h.bf16 %v1743_v32 }
 0x9d1   : > { %v1759_v31 = vmul.f32 %v4801_v57, %v1745_v15  ;;  %v1760_v7 = vmul.f32 %v4802_v56, %v1746_v10  ;;  %v1761_v55 = vmul.f32 %v4796_v8, %v1745_v15  ;;  %v1762_v54 = vmul.f32 %v4797_v6, %v1746_v10 }
 0x9d2   : > { %v1755_v32 = vmul.f32 %v4811_v13, %v1745_v15  ;;  %v1756_v57 = vmul.f32 %v4812_v12, %v1746_v10  ;;  %v1758_v8 = vmul.f32 %v4807_v23, %v1746_v10  ;;  %v1751_v5 = vmul.f32 %v4821_v4, %v1745_v15 }
 0x9d3   : > { %v1769_v11 = vpack.c.bf16 %v1760_v7, %v1759_v31  ;;  %v1770_v50 = vpack.c.bf16 %v1762_v54, %v1761_v55  ;;  %v1752_v6 = vmul.f32 %v4822_v30, %v1746_v10  ;;  %v1753_v13 = vmul.f32 %v4816_v38, %v1745_v15 }
 0x9d4   : > { %v1767_v56 = vpack.c.bf16 %v1756_v57, %v1755_v32  ;;  %v1747_v22 = vmul.f32 %v4831_v41, %v1745_v15  ;;  %v6471_v23 = vunpack.i.h.bf16 %v5415_v39  ;;  %v6473_v38 = vunpack.i.h.bf16 %v5431_v58 }
 0x9d5   : > { %v1765_v12 = vpack.c.bf16 %v1752_v6, %v1751_v5 }
 0x9d6   : > { %v1748_v4 = vmul.f32 %v6471_v23, %v1746_v10 }
 0x9d8   : > { %v1763_v30 = vpack.c.bf16 %v1748_v4, %v1747_v22 }
 0xa3d   : > { %v4835_v63 = vpop.permute.xlu0 %4834 }
 0xa3e   : > { %v4836_v33 = vunpack.i.l.bf16 %v4835_v63  ;;  %v4837_v42 = vunpack.i.h.bf16 %v4835_v63  ;;  %v1757_v63 = vmul.f32 %v4806_v25, %v1745_v15  ;;  %v1754_v25 = vmul.f32 %v4817_v36, %v1746_v10 }
 0xa40   : > { %1579 = vxpose.xlu1.b32.start [1/2] (short) (narrow) %v4836_v33, 32  ;;  %v1768_v9 = vpack.c.bf16 %v1758_v8, %v1757_v63  ;;  %v1766_v27 = vpack.c.bf16 %v1754_v25, %v1753_v13  ;;  %v6472_v33 = vunpack.i.l.bf16 %v5431_v58 }
 0xa48   : > { %1580 = vxpose.xlu1.b32.end [2/2] (short) (narrow) %v4837_v42, 32  ;;  %v1749_v42 = vmul.f32 %v6472_v33, %v1745_v15 }
 0xae4   : > { %v1595_v47 = vpop.trf.xlu1 }
 0xae5   : > { %v1611_v0 = vpack.c.bf16 %v1595_v47, %v1595_v47  ;;  %v1750_v47 = vmul.f32 %v6473_v38, %v1746_v10 }
 0xae7   : > { %v1621_v16 = vunpack.c.l.b16 %v1611_v0  ;;  %v1764_v35 = vpack.c.bf16 %v1750_v47, %v1749_v42 }
 0xaec   : > { %v1596_v43 = vpop.trf.xlu1 }
 0xaed   : > { %v1612_v3 = vpack.c.bf16 %v1596_v43, %v1596_v43 }
 0xaef   : > { %v1622_v48 = vunpack.c.l.b16 %v1612_v3 }
 0xaf1   : > { %v5563_v49 = vpack.c.b16 %v1622_v48, %v1621_v16 }
 0xaf3   : > { %1651 = vrot.lane.b32.xlu1 %v5563_v49, %s6431_s0  ;;  %1627 = vrot.lane.b32.xlu0 %v5563_v49, %s6435_s1 }
 0xaf4   : > { %v1597_v40 = vpop.trf.xlu1 }
 0xaf5   : > { %v1613_v59 = vpack.c.bf16 %v1597_v40, %v1597_v40 }
 0xaf7   : > { %v1623_v19 = vunpack.c.l.b16 %v1613_v59 }
 0xafb   : > { %1631 = vrot.lane.b32.xlu0 %v5563_v49, %s6468_s29 }
 0xafc   : > { %v1598_v62 = vpop.trf.xlu1 }
 0xafd   : > { %v1614_v46 = vpack.c.bf16 %v1598_v62, %v1598_v62 }
 0xaff   : > { %v1624_v17 = vunpack.c.l.b16 %v1614_v46 }
 0xb01   : > { %v1626_v18 = vpack.c.b16 %v1624_v17, %v1623_v19 }
 0xb03   : > { %1635 = vrot.lane.b32.xlu0 %v5563_v49, %s6469_s4  ;;  %1629 = vrot.lane.b32.xlu2 %v1626_v18, %s6435_s1  ;;  %s6475_s1 = smov 96  }
 0xb0b   : > { %1639 = vrot.lane.b32.xlu0 %v5563_v49, %s6433_s27  ;;  %1641 = vrot.lane.b32.xlu2 %v1626_v18, %s6433_s27 }
 0xb13   : > { %1633 = vrot.lane.b32.xlu0 %v1626_v18, %s6468_s29  ;;  %1645 = vrot.lane.b32.xlu2 %v1626_v18, %s6470_s26 }
 0xb1b   : > { %1637 = vrot.lane.b32.xlu0 %v1626_v18, %s6469_s4  ;;  %1649 = vrot.lane.b32.xlu2 %v1626_v18, %s6437_s23 }
 0xb23   : > { %1647 = vrot.lane.b32.xlu0 %v5563_v49, %s6437_s23  ;;  %1653 = vrot.lane.b32.xlu2 %v1626_v18, %s6431_s0  ;;  %s6474_s0 = sld [smem:[#allocation6_spill]]  ;;  %s6481_s23 = smov 8  }
 0xb2b   : > { %1643 = vrot.lane.b32.xlu2 %v5563_v49, %s6470_s26  ;;  %1792 = vrot.lane.b32.xlu0 %v1769_v11, %s6433_s27 }
 0xb33   : > { %1794 = vrot.lane.b32.xlu2 %v1770_v50, %s6433_s27  ;;  %1788 = vrot.lane.b32.xlu0 %v1767_v56, %s6433_s27 }
 0xb3b   : > { %1790 = vrot.lane.b32.xlu2 %v1768_v9, %s6433_s27  ;;  %1784 = vrot.lane.b32.xlu0 %v1765_v12, %s6433_s27 }
 0xb43   : > { %1786 = vrot.lane.b32.xlu2 %v1766_v27, %s6433_s27  ;;  %1780 = vrot.lane.b32.xlu0 %v1763_v30, %s6433_s27 }
 0xb4b   : > { %1782 = vrot.lane.b32.xlu2 %v1764_v35, %s6433_s27  ;;  %s6440_s27 = smov 8  }
 0xb5d   : > { %v1630_v36 = vpop.permute.xlu2 %1629 }
 0xb5e   : > { %v1660_v19 = vsel %vm944_vm9, %v1626_v18, %v1630_v36 }
 0xb65   : > { %v1628_v41 = vpop.permute.xlu0 %1627  ;;  %v1642_v0 = vpop.permute.xlu2 %1641 }
 0xb66   : > { %v1657_v7 = vsel %vm944_vm9, %v5563_v49, %v1628_v41  ;;  %v1652_v49 = vpop.permute.xlu1 %1651 }
 0xb6d   : > { %v1632_v39 = vpop.permute.xlu0 %1631  ;;  %v1646_v43 = vpop.permute.xlu2 %1645 }
 0xb6e   : > { %v1662_v55 = vsel %vm757_vm1, %v1657_v7, %v1632_v39 }
 0xb75   : > { %v1636_v3 = vpop.permute.xlu0 %1635  ;;  %v1650_v16 = vpop.permute.xlu2 %1649 }
 0xb76   : > { %v1666_v54 = vsel %vm955_vm10, %v1662_v55, %v1636_v3 }
 0xb7d   : > { %v1640_v48 = vpop.permute.xlu0 %1639  ;;  %v1654_v40 = vpop.permute.xlu2 %1653 }
 0xb7e   : > { %v1670_v50 = vsel %vm735_vm0, %v1666_v54, %v1640_v48 }
 0xb85   : > { %v1634_v59 = vpop.permute.xlu0 %1633  ;;  %v1644_v62 = vpop.permute.xlu2 %1643 }
 0xb86   : > { %v1664_v46 = vsel %vm757_vm1, %v1660_v19, %v1634_v59  ;;  %v1674_v56 = vsel %vm964_vm11, %v1670_v50, %v1644_v62  ;;  %v4648_v50 = vld [vmem:[%s6404_s7 + $0x18] sm:$0xff] }
 0xb87   : > { %1845 = vmatpush.bf16.msrb.mxu3 %v4648_v50 }
 0xb8d   : > { %v1638_v58 = vpop.permute.xlu0 %1637  ;;  %v1795_v17 = vpop.permute.xlu2 %1794 }
 0xb8e   : > { %v1668_v15 = vsel %vm955_vm10, %v1664_v46, %v1638_v58  ;;  %1804 = vmatpush.bf16.msra.mxu0 %v1795_v17 }
 0xb8f   : > { %v1672_v10 = vsel %vm735_vm0, %v1668_v15, %v1642_v0 }
 0xb90   : > { %v1676_v31 = vsel %vm964_vm11, %v1672_v10, %v1646_v43 }
 0xb91   : > { %v1680_v11 = vsel %vm969_vm12, %v1676_v31, %v1650_v16 }
 0xb92   : > { %v1685_v18 = vsel %vm974_vm13, %v1680_v11, %v1654_v40 }
 0xb93   : > { %v1689_v32 = vunpack.c.l.bf16 %v1685_v18  ;;  %v1690_v57 = vunpack.c.h.bf16 %v1685_v18 }
 0xb95   : > { %v1648_v63 = vpop.permute.xlu0 %1647  ;;  %v1693_v8 = vmul.f32 %v5329_v28, %v1689_v32  ;;  %v1694_v5 = vmul.f32 %v5331_v29, %v1690_v57  ;;  %v1791_v27 = vpop.permute.xlu2 %1790 }
 0xb96   : > { %v1678_v6 = vsel %vm969_vm12, %v1674_v56, %v1648_v63  ;;  %v4647_v56 = vld [vmem:[%s6404_s7 + $0x10] sm:$0xff]  ;;  %v4656_v63 = vld [vmem:[%s6465_s24 + $0x28] sm:$0xff] }
 0xb97   : > { %v1682_v9 = vsel %vm974_vm13, %v1678_v6, %v1652_v49  ;;  %v1696_v12 = vpack.c.bf16 %v1694_v5, %v1693_v8  ;;  %1846 = vmatpush.bf16.msrb.mxu3 %v4647_v56  ;;  %v4655_v8 = vld [vmem:[%s6465_s24 + $0x20] sm:$0xff] }
 0xb98   : > { %v1687_v13 = vunpack.c.l.bf16 %v1682_v9  ;;  %v1688_v25 = vunpack.c.h.bf16 %v1682_v9  ;;  %v5665_v9 = vld [vmem:[%s6474_s0] sm:$0xff]  ;;  %s6442_s0 = smov 40  }
 0xb99   : > { %1706 = vmatpush.bf16.msra.mxu2 %v1696_v12  ;;  %v2107_v12 = vpack.c.bf16 %v5665_v9, %v5665_v9 }
 0xb9a   : > { %v1691_v22 = vmul.f32 %v5351_v26, %v1687_v13  ;;  %v1692_v23 = vmul.f32 %v5353_v51, %v1688_v25 }
 0xb9b   : > { %2132 = vmatpush.bf16.msra.mxu3 %v4656_v63 }
 0xb9c   : > { %v1695_v4 = vpack.c.bf16 %v1692_v23, %v1691_v22 }
 0xb9d   : > { %v1793_v30 = vpop.permute.xlu0 %1792  ;;  %v1787_v42 = vpop.permute.xlu2 %1786 }
 0xb9e   : > { %1707 = vmatpush.bf16.msra.mxu2 %v1695_v4  ;;  %1805 = vmatpush.bf16.msra.mxu0 %v1793_v30 }
 0xb9f   : > { %2133 = vmatpush.bf16.msra.mxu3 %v4655_v8 }
 0xba1   : > { %4297 = vmatmul.msk.bf16.vlgmr.msra.gmra.mxu2 %vm757_vm1, %v1570_v14 }
 0xba2   : > { %1806 = vmatpush.bf16.msra.mxu0 %v1791_v27 }
 0xba5   : > { %v1789_v33 = vpop.permute.xlu0 %1788  ;;  %v1783_v47 = vpop.permute.xlu2 %1782 }
 0xba6   : > { %1807 = vmatpush.bf16.msra.mxu0 %v1789_v33  ;;  %v4909_v33 = vld [vmem:[%s6403_s6 + $0x2] ss:$0 sm:$0xff] }
 0xbaa   : > { %1808 = vmatpush.bf16.msra.mxu0 %v1787_v42 }
 0xbad   : > { %v1785_v38 = vpop.permute.xlu0 %1784 }
 0xbae   : > { %1809 = vmatpush.bf16.msra.mxu0 %v1785_v38 }
 0xbb2   : > { %1810 = vmatpush.bf16.msra.mxu0 %v1783_v47 }
 0xbb5   : > { %v1781_v35 = vpop.permute.xlu0 %1780 }
 0xbb6   : > { %1811 = vmatpush.bf16.msra.mxu0 %v1781_v35 }
 0xc24   : > { %v1709_v36 = vpop.f32.mrf.mxu2 }
 0xc25   : > { %v1714_v0 = vmul.f32 0.5, %v1709_v36 }
 0xc2c   : > { %v1711_v41 = vpop.f32.mrf.mxu2 }
 0xc2d   : > { %v1715_v39 = vmul.f32 0.5, %v1711_v41 }
 0xc2f   : > { %v1716_v43 = vmax.f32 %v1714_v0, %v1715_v39 }
 0xc31   : > { %v1717_v3 = vrot.slane %v1716_v43, 4 }
 0xc33   : > { %v1718_v20 = vmax.f32 %v1716_v43, %v1717_v3 }
 0xc35   : > { %v1719_v21 = vrot.slane %v1718_v20, 2 }
 0xc37   : > { %v1720_v14 = vmax.f32 %v1718_v20, %v1719_v21 }
 0xc39   : > { %v1721_v16 = vrot.slane %v1720_v14, 1 }
 0xc3b   : > { %v1722_v48 = vmax.f32 %v1720_v14, %v1721_v16 }
 0xc3d   : > { %v1723_v40 = vsub.f32 %v1714_v0, %v1722_v48  ;;  %v1724_v59 = vsub.f32 %v1715_v39, %v1722_v48 }
 0xc3f   : > { %v1725_v62 = vmul.f32 1.442695, %v1723_v40  ;;  %v1727_v19 = vmul.f32 1.442695, %v1724_v59 }
 0xc41   : > { %4962 = vpow2.f32 %v1725_v62 }
 0xc42   : > { %4964 = vpow2.f32 %v1727_v19 }
 0xc47   : > { %v4963_v46 = vpop.eup %4962 }
 0xc48   : > { %v4965_v58 = vpop.eup %4964 }
 0xc49   : > { %v1729_v17 = vadd.f32 %v4965_v58, %v4963_v46 }
 0xc4b   : > { %v1730_v15 = vrot.slane %v1729_v17, 4 }
 0xc4d   : > { %v1731_v10 = vadd.f32 %v1730_v15, %v1729_v17 }
 0xc4f   : > { %v1732_v31 = vrot.slane %v1731_v10, 2 }
 0xc51   : > { %v1733_v7 = vadd.f32 %v1732_v31, %v1731_v10 }
 0xc53   : > { %v1734_v11 = vrot.slane %v1733_v7, 1 }
 0xc55   : > { %v1735_v55 = vadd.f32 %v1734_v11, %v1733_v7  ;;  %v4766_v11 = vld [vmem:[%s6416_s19 + $0x18] sm:$0xff]  }
 0xc57   : > { %4966 = vrcp.f32 %v1735_v55  ;;  %v4753_v55 = vunpack.c.l.bf16 %v4766_v11 }
 0xc5d   : > { %v4967_v18 = vpop.eup %4966 }
 0xc5e   : > { %v1737_v54 = vmul.f32 %v4967_v18, %v4963_v46  ;;  %v1738_v32 = vmul.f32 %v4967_v18, %v4965_v58  ;;  %v4754_v18 = vunpack.c.h.bf16 %v4766_v11 }
 0xc60   : > { %v1771_v57 = vpack.c.bf16 %v1738_v32, %v1737_v54  ;;  %v4838_v32 = vpack.i.bf16 %v4754_v18, %v4753_v55 }
 0xc62   : > { %1812 = vmatmul.bf16.vlgmr.msra.gmra.mxu0 %v1771_v57  ;;  %v4765_v57 = vld [vmem:[%s6416_s19 + $0x10] sm:$0xff]  }
 0xc63   : > { %v4749_v56 = vunpack.c.l.bf16 %v4765_v57  ;;  %v4750_v63 = vunpack.c.h.bf16 %v4765_v57 }
 0xc65   : > { %v4843_v8 = vpack.i.bf16 %v4750_v63, %v4749_v56 }
 0xcdf   : > { %v1813_v5 = vpop.f32.mrf.mxu0 }
 0xce7   : > { %v1815_v49 = vpop.f32.mrf.mxu0 }
 0xce8   : > { %v1823_v6 = vpack.c.bf16 %v1815_v49, %v1813_v5  ;;  %v4764_v5 = vld [vmem:[%s6416_s19 + $0x8] sm:$0xff]  }
 0xce9   : > { %v4745_v49 = vunpack.c.l.bf16 %v4764_v5 }
 0xcea   : > { %4310 = vmatmul.msk.bf16.vlgmr.msrb.gmra.mxu3 %vm757_vm1, %v1823_v6  ;;  %v4746_v6 = vunpack.c.h.bf16 %v4764_v5 }
 0xcfa   : > { %4368 = vmatmul.msk.bf16.vlgmr.msra.gmra.mxu3 %vm757_vm1, %v2107_v12 }
 0xd6d   : > { %v1848_v13 = vpop.f32.mrf.mxu3 }
 0xd6e   : > { %v5671_v25 = vadd.f32 %v1848_v13, %v5517_v2  ;;  %v4650_v13 = vld [vmem:[%s6405_s8 + $0x18] sm:$0xff] }
 0xd6f   : > { %1945 = vmatpush.bf16.msrb.mxu1 %v4650_v13 }
 0xd70   : > { %v1855_v22 = vsel %vm757_vm1, %v5671_v25, 0.0 }
 0xd71   : > { %1856 = vadd.xlane.f32.xlu2 %v1855_v22  ;;  %v4848_v22 = vpack.i.bf16 %v4746_v6, %v4745_v49 }
 0xd75   : > { %v1850_v23 = vpop.f32.mrf.mxu3 }
 0xd76   : > { %v5676_v4 = vadd.f32 %v1850_v23, %v5522_v34 }
 0xd78   : > { %v1858_v27 = vsel %vm757_vm1, %v5676_v4, 0.0 }
 0xd79   : > { %1859 = vadd.xlane.f32.xlu0 %v1858_v27  ;;  %v4740_v27 = vld [vmem:[%s6416_s19] sm:$0xff]  }
 0xd7d   : > { %v2135_v30 = vpop.f32.mrf.mxu3 }
 0xd7e   : > { %v5683_v2 = vadd.f32 %v4909_v33, %v2135_v30  ;;  %v4649_v30 = vld [vmem:[%s6405_s8 + $0x10] sm:$0xff]  ;;  %v4741_v33 = vunpack.c.l.bf16 %v4740_v27 }
 0xd7f   : > { %1946 = vmatpush.bf16.msrb.mxu1 %v4649_v30 }
 0xd85   : > { %v2137_v42 = vpop.f32.mrf.mxu3 }
 0xd86   : > { %v4742_v42 = vunpack.c.h.bf16 %v4740_v27 }
 0xd89   : > { %2141 = vrot.lane.b32.xlu2 %v5683_v2, %s6475_s1 }
 0xde4   : > { %v1857_v38 = vpop.xlane.xlu2 %1856 }
 0xde5   : > { %v1861_v47 = vmul.f32 %v1857_v38, %v5190_v24 }
 0xde7   : > { %v5689_v34 = vsub.f32 %v5671_v25, %v1861_v47 }
 0xde9   : > { %v1865_v35 = vmul.f32 %v5689_v34, %v5689_v34 }
 0xdeb   : > { %v1867_v36 = vsel %vm757_vm1, %v1865_v35, 0.0 }
 0xdec   : > { %1868 = vadd.xlane.f32.xlu0 %v1867_v36  ;;  %v2142_v41 = vpop.permute.xlu2 %2141  ;;  %v1860_v0 = vpop.xlane.xlu0 %1859 }
 0xded   : > { %v1862_v39 = vmul.f32 %v1860_v0, %v5190_v24 }
 0xdef   : > { %v5696_v43 = vsub.f32 %v5676_v4, %v1862_v39 }
 0xdf1   : > { %v1866_v3 = vmul.f32 %v5696_v43, %v5696_v43 }
 0xdf3   : > { %v1870_v20 = vsel %vm757_vm1, %v1866_v3, 0.0 }
 0xe15   : > { %2144 = vxpose.xlu0.b32.start.end [1/1] (short) (narrow) %v2142_v41, 32  ;;  %v4853_v41 = vpack.i.bf16 %v4742_v42, %v4741_v33 }
 0xe5f   : > { %v1869_v21 = vpop.xlane.xlu0 %1868 }
 0xe60   : > { %v1873_v54 = vmul.f32 %v1869_v21, %v5190_v24 }
 0xe62   : > { %v1875_v50 = vadd.f32 1e-05, %v1873_v54 }
 0xe64   : > { %4968 = vrsqrt.f32 %v1875_v50  ;;  %vm1883_vm3 = vweird.f32 %v1875_v50 }
 0xe6a   : > { %v4969_v12 = vpop.eup %4968 }
 0xe6b   : > { %v1878_v23 = vmul.f32 %v4969_v12, %v1875_v50  ;;  %vm1884_vm2 = vweird.f32 %v4969_v12 }
 0xe6c   : > { %vm1885_vm4 = vmor %vm1883_vm3, %vm1884_vm2  ;;  %vm6450_vm2 = vcmask 326656   ;;  %vm6449_vm3 = vcmask 457728  }
 0xe6d   : > { %v1879_v38 = vmul.f32 %v4969_v12, %v1878_v23 }
 0xe6f   : > { %v1880_v0 = vmul.f32 0.5, %v1879_v38 }
 0xe71   : > { %v1881_v39 = vsub.f32 1.5, %v1880_v0  ;;  %v4763_v0 = vld [vmem:[%s6478_s18 + $0x8] sm:$0xff]  }
 0xe9e   : > { %1871 = vadd.xlane.f32.xlu0 %v1870_v20  ;;  %v1882_v20 = vmul.f32 %v4969_v12, %v1881_v39 }
 0xeb9   : > { %v2160_v14 = vpop.trf.xlu0 }
 0xeba   : > { %v2176_v16 = vpack.c.bf16 %v2160_v14, %v2160_v14 }
 0xebc   : > { %v2184_v59 = vunpack.c.l.b16 %v2176_v16  ;;  %v1886_v16 = vsel %vm1885_vm4, %v4969_v12, %v1882_v20 }
 0xec1   : > { %v2161_v48 = vpop.trf.xlu0 }
 0xec2   : > { %v2177_v40 = vpack.c.bf16 %v2161_v48, %v2161_v48 }
 0xec4   : > { %v2185_v62 = vunpack.c.l.b16 %v2177_v40 }
 0xec6   : > { %v5701_v19 = vpack.c.b16 %v2185_v62, %v2184_v59  ;;  %v4910_v62 = vld [vmem:[%s6409_s12 + $0x3] ss:$0 sm:$0xff] }
 0xec8   : > { %2190 = vrot.lane.b32.xlu2 %v5701_v19, %s6440_s27 }
 0xec9   : > { %v2162_v46 = vpop.trf.xlu0 }
 0xeca   : > { %v2178_v58 = vpack.c.bf16 %v2162_v46, %v2162_v46  ;;  %v1897_v46 = vmul.f32 %v1886_v16, %v5689_v34 }
 0xecc   : > { %v2186_v10 = vunpack.c.l.b16 %v2178_v58 }
 0xed0   : > { %2194 = vrot.lane.b32.xlu2 %v5701_v19, %s6476_s22 }
 0xed1   : > { %v2163_v17 = vpop.trf.xlu0 }
 0xed2   : > { %v2179_v15 = vpack.c.bf16 %v2163_v17, %v2163_v17 }
 0xed4   : > { %v2187_v31 = vunpack.c.l.b16 %v2179_v15  ;;  %v4911_v15 = vld [vmem:[%s6410_s13 + $0x3] ss:$0 sm:$0xff] }
 0xed6   : > { %v5707_v7 = vpack.c.b16 %v2187_v31, %v2186_v10  ;;  %v1904_v10 = vmul.f32 %v4910_v62, %v1897_v46 }
 0xed8   : > { %2198 = vrot.lane.b32.xlu2 %v5701_v19, %s6444_s28  ;;  %2216 = vrot.lane.b32.xlu0 %v5707_v7, %s6446_s5  ;;  %v1911_v34 = vadd.f32 %v4911_v15, %v1904_v10 }
 0xed9   : > { %2196 = vrot.lane.b32.xlu1 %v5707_v7, %s6476_s22 }
 0xee0   : > { %2192 = vrot.lane.b32.xlu2 %v5707_v7, %s6440_s27  ;;  %s6482_s27 = smov 40  }
 0xee1   : > { %2204 = vrot.lane.b32.xlu1 %v5707_v7, %s6468_s29 }
 0xee8   : > { %2200 = vrot.lane.b32.xlu2 %v5707_v7, %s6444_s28  ;;  %s6477_s28 = smov 64  }
 0xee9   : > { %2208 = vrot.lane.b32.xlu1 %v5707_v7, %s6442_s0 }
 0xef0   : > { %2206 = vrot.lane.b32.xlu2 %v5701_v19, %s6442_s0  ;;  %s6483_s0 = smov 56  }
 0xef1   : > { %2212 = vrot.lane.b32.xlu1 %v5707_v7, %s6469_s4 }
 0xef8   : > { %2214 = vrot.lane.b32.xlu2 %v5701_v19, %s6446_s5 }
 0xef9   : > { %2202 = vrot.lane.b32.xlu1 %v5701_v19, %s6468_s29 }
 0xf00   : > { %4839 = vrot.lane.b32.xlu2 %v4838_v32, %s6477_s28 }
 0xf01   : > { %2210 = vrot.lane.b32.xlu1 %v5701_v19, %s6469_s4 }
 0xf08   : > { %4844 = vrot.lane.b32.xlu2 %v4843_v8, %s6477_s28 }
 0xf10   : > { %4849 = vrot.lane.b32.xlu2 %v4848_v22, %s6477_s28 }
 0xf11   : > { %v1872_v47 = vpop.xlane.xlu0 %1871 }
 0xf12   : > { %v1874_v35 = vmul.f32 %v1872_v47, %v5190_v24 }
 0xf14   : > { %v1876_v36 = vadd.f32 1e-05, %v1874_v35 }
 0xf16   : > { %4970 = vrsqrt.f32 %v1876_v36  ;;  %vm1893_vm6 = vweird.f32 %v1876_v36 }
 0xf18   : > { %4854 = vrot.lane.b32.xlu2 %v4853_v41, %s6477_s28 }
 0xf1c   : > { %v4971_v3 = vpop.eup %4970 }
 0xf1d   : > { %v1888_v21 = vmul.f32 %v4971_v3, %v1876_v36  ;;  %vm1894_vm5 = vweird.f32 %v4971_v3 }
 0xf1e   : > { %vm1895_vm7 = vmor %vm1893_vm6, %vm1894_vm5 }
 0xf1f   : > { %v1889_v14 = vmul.f32 %v4971_v3, %v1888_v21 }
 0xf21   : > { %v1890_v48 = vmul.f32 0.5, %v1889_v14 }
 0xf22   : > { %v2191_v40 = vpop.permute.xlu2 %2190 }
 0xf23   : > { %v1891_v59 = vsub.f32 1.5, %v1890_v48  ;;  %v2221_v55 = vsel %vm2218_vm8, %v5701_v19, %v2191_v40  ;;  %v5796_v48 = vunpack.c.l.bf16 %v4763_v0  ;;  %v5798_v40 = vunpack.c.h.bf16 %v4763_v0 }
 0xf25   : > { %v1892_v58 = vmul.f32 %v4971_v3, %v1891_v59 }
 0xf27   : > { %v1896_v17 = vsel %vm1895_vm7, %v4971_v3, %v1892_v58 }
 0xf28   : > { %v1898_v31 = vmul.f32 %v1896_v17, %v5696_v43  ;;  %v5771_v43 = vpack.c.bf16 %v5683_v2, %v5683_v2 }
 0xf2a   : > { %v1905_v11 = vmul.f32 %v4910_v62, %v1898_v31  ;;  %v2195_v18 = vpop.permute.xlu2 %2194  ;;  %v2364_v49 = vunpack.c.l.b16 %v5771_v43 }
 0xf2b   : > { %v2226_v54 = vsel %vm944_vm9, %v2221_v55, %v2195_v18 }
 0xf2c   : > { %v1912_v32 = vadd.f32 %v4911_v15, %v1905_v11  ;;  %v2365_v12 = vpack.c.b16 %v2364_v49, %v2364_v49 }
 0xf2e   : > { %v1918_v57 = vpack.c.bf16 %v1912_v32, %v1911_v34  ;;  %v2368_v13 = vsel %vm2366_vm14, %v5771_v43, %v2365_v12  ;;  %v4732_v12 = vld [vmem:[%s6478_s18] sm:$0xff]  }
 0xf2f   : > { %v2370_v23 = vunpack.c.l.bf16 %v2368_v13  ;;  %v2371_v27 = vunpack.c.h.bf16 %v2368_v13 }
 0xf30   : > { %4326 = vmatmul.msk.bf16.vlgmr.msrb.gmra.mxu1 %vm757_vm1, %v1918_v57 }
 0xf32   : > { %v2199_v50 = vpop.permute.xlu2 %2198 }
 0xf3a   : > { %v2193_v56 = vpop.permute.xlu2 %2192 }
 0xf3b   : > { %v2224_v2 = vsel %vm2218_vm8, %v5707_v7, %v2193_v56 }
 0xf42   : > { %v2201_v63 = vpop.permute.xlu2 %2200 }
 0xf4a   : > { %v2207_v8 = vpop.permute.xlu2 %2206  ;;  %v2217_v16 = vpop.permute.xlu0 %2216 }
 0xf4b   : > { %v2197_v5 = vpop.permute.xlu1 %2196 }
 0xf4c   : > { %v2228_v35 = vsel %vm944_vm9, %v2224_v2, %v2197_v5  ;;  %v2231_v5 = vsel %vm6451_vm15, %v2226_v54, %v2199_v50  ;;  %v5830_v54 = vunpack.c.l.bf16 %v4732_v12  ;;  %v5832_v50 = vunpack.c.h.bf16 %v4732_v12 }
 0xf4d   : > { %v2233_v41 = vsel %vm6451_vm15, %v2228_v35, %v2201_v63 }
 0xf52   : > { %v2215_v19 = vpop.permute.xlu2 %2214 }
 0xf53   : > { %v2205_v6 = vpop.permute.xlu1 %2204 }
 0xf54   : > { %v2237_v39 = vsel %vm757_vm1, %v2233_v41, %v2205_v6 }
 0xf5a   : > { %v4840_v22 = vpop.permute.xlu2 %4839 }
 0xf5b   : > { %v2209_v30 = vpop.permute.xlu1 %2208  ;;  %v5776_v33 = vunpack.i.h.bf16 %v4840_v22  ;;  %v5778_v42 = vunpack.i.l.bf16 %v4840_v22 }
 0xf5c   : > { %v2242_v3 = vsel %vm6450_vm2, %v2237_v39, %v2209_v30 }
 0xf5d   : > { %v2418_v38 = vmul.f32 %v5778_v42, %v2370_v23  ;;  %v2419_v47 = vmul.f32 %v5776_v33, %v2371_v27 }
 0xf5f   : > { %v2423_v36 = vpack.c.bf16 %v2419_v47, %v2418_v38 }
 0xf61   : > { %2435 = vrot.lane.b32.xlu2 %v2423_v36, %s6477_s28 }
 0xf62   : > { %v4845_v7 = vpop.permute.xlu2 %4844 }
 0xf63   : > { %v2213_v20 = vpop.permute.xlu1 %2212  ;;  %v5792_v21 = vunpack.i.h.bf16 %v4845_v7  ;;  %v5794_v14 = vunpack.i.l.bf16 %v4845_v7 }
 0xf64   : > { %v2246_v59 = vsel %vm955_vm10, %v2242_v3, %v2213_v20 }
 0xf65   : > { %v2252_v62 = vsel %vm6449_vm3, %v2246_v59, %v2217_v16  ;;  %v5803_v46 = vmul.f32 %v5794_v14, %v2370_v23  ;;  %v5806_v58 = vmul.f32 %v5792_v21, %v2371_v27 }
 0xf66   : > { %v2256_v17 = vunpack.c.l.bf16 %v2252_v62  ;;  %v2257_v15 = vunpack.c.h.bf16 %v2252_v62 }
 0xf67   : > { %v2422_v10 = vpack.c.bf16 %v5806_v58, %v5803_v46  ;;  %v691_v46 = vld [vmem:[%s6417_s20 + $0x18] sm:$0xff]  ;;  %v690_v58 = vld [vmem:[%s6417_s20 + $0x10] sm:$0xff] }
 0xf68   : > { %v2264_v31 = vmul.f32 %v5796_v48, %v2256_v17  ;;  %v2265_v11 = vmul.f32 %v5798_v40, %v2257_v15 }
 0xf6a   : > { %v4850_v55 = vpop.permute.xlu2 %4849  ;;  %v2267_v18 = vpack.c.bf16 %v2265_v11, %v2264_v31 }
 0xf6b   : > { %v2203_v34 = vpop.permute.xlu1 %2202  ;;  %v5812_v32 = vunpack.i.h.bf16 %v4850_v55  ;;  %v5814_v57 = vunpack.i.l.bf16 %v4850_v55 }
 0xf6c   : > { %2277 = vmatpush.bf16.msra.mxu1 %v2267_v18  ;;  %v2235_v6 = vsel %vm757_vm1, %v2231_v5, %v2203_v34 }
 0xf6d   : > { %v2414_v56 = vmul.f32 %v5814_v57, %v2370_v23  ;;  %v2415_v63 = vmul.f32 %v5812_v32, %v2371_v27  ;;  %v2240_v30 = vsel %vm6450_vm2, %v2235_v6, %v2207_v8 }
 0xf6f   : > { %v2421_v49 = vpack.c.bf16 %v2415_v63, %v2414_v56 }
 0xf71   : > { %2431 = vrot.lane.b32.xlu2 %v2421_v49, %s6477_s28 }
 0xf72   : > { %v4855_v13 = vpop.permute.xlu2 %4854 }
 0xf73   : > { %v2211_v22 = vpop.permute.xlu1 %2210  ;;  %v5825_v2 = vunpack.i.h.bf16 %v4855_v13  ;;  %v5827_v38 = vunpack.i.l.bf16 %v4855_v13 }
 0xf74   : > { %v2244_v47 = vsel %vm955_vm10, %v2240_v30, %v2211_v22 }
 0xf75   : > { %v2249_v35 = vsel %vm6449_vm3, %v2244_v47, %v2215_v19  ;;  %v2412_v36 = vmul.f32 %v5827_v38, %v2370_v23  ;;  %v2413_v41 = vmul.f32 %v5825_v2, %v2371_v27  ;;  %v4912_v19 = vld [vmem:[%s6406_s9 + $0x1] ss:$0 sm:$0xff] }
 0xf76   : > { %v2254_v0 = vunpack.c.l.bf16 %v2249_v35  ;;  %v2255_v39 = vunpack.c.h.bf16 %v2249_v35  ;;  %v4654_v35 = vld [vmem:[%s6407_s10 + $0x38] sm:$0xff] }
 0xf77   : > { %v2420_v7 = vpack.c.bf16 %v2413_v41, %v2412_v36  ;;  %2087 = vmatpush.bf16.msrb.mxu2 %v4654_v35 }
 0xf78   : > { %v2262_v8 = vmul.f32 %v5830_v54, %v2254_v0  ;;  %v2263_v3 = vmul.f32 %v5832_v50, %v2255_v39 }
 0xf79   : > { %2429 = vrot.lane.b32.xlu2 %v2420_v7, %s6477_s28 }
 0xf7a   : > { %v2266_v20 = vpack.c.bf16 %v2263_v3, %v2262_v8 }
 0xf7c   : > { %2278 = vmatpush.bf16.msra.mxu1 %v2266_v20  ;;  %v4653_v20 = vld [vmem:[%s6407_s10 + $0x30] sm:$0xff] }
 0xf7d   : > { %2088 = vmatpush.bf16.msrb.mxu2 %v4653_v20 }
 0xf7f   : > { %4369 = vmatmul.msk.bf16.vlgmr.msra.gmra.mxu1 %vm757_vm1, %v5771_v43 }
 0xfad   : > { %v1948_v23 = vpop.f32.mrf.mxu1 }
 0xfae   : > { %v5845_v27 = vadd.f32 %v4912_v19, %v1948_v23 }
 0xfb0   : > { %v5848_v16 = vmul.f32 0.70710677, %v5845_v27 }
 0xfb2   : > { %v1957_v59 = vmul.f32 %v5848_v16, %v5848_v16 }
 0xfb4   : > { %v1958_v62 = vmin.f32 %v1957_v59, 16.0 }
 0xfb5   : > { %v1950_v17 = vpop.f32.mrf.mxu1 }
 0xfb6   : > { %v1959_v15 = vmul.f32 2.1237322e-06, %v1958_v62  ;;  %v1970_v31 = vmul.f32 3.8918573e-05, %v1958_v62  ;;  %v5852_v11 = vadd.f32 %v4912_v19, %v1950_v17 }
 0xfb8   : > { %v1960_v43 = vadd.f32 0.00028619796, %v1959_v15  ;;  %v1971_v55 = vadd.f32 0.001143296, %v1970_v31  ;;  %v5855_v18 = vmul.f32 0.70710677, %v5852_v11 }
 0xfba   : > { %v1972_v34 = vmul.f32 %v1971_v55, %v1958_v62  ;;  %v1997_v56 = vmul.f32 %v5855_v18, %v5855_v18  ;;  %v1961_v5 = vmul.f32 %v1960_v43, %v1958_v62  ;;  %v4652_v43 = vld [vmem:[%s6407_s10 + $0x28] sm:$0xff] }
 0xfbb   : > { %v2436_v63 = vpop.permute.xlu2 %2435  ;;  %2089 = vmatpush.bf16.msrb.mxu2 %v4652_v43 }
 0xfbc   : > { %v1973_v49 = vadd.f32 0.014752088, %v1972_v34  ;;  %2448 = vmatpush.bf16.msrb.mxu3 %v2436_v63  ;;  %v1998_v6 = vmin.f32 %v1997_v56, 16.0  ;;  %v1962_v30 = vadd.f32 0.0036580483, %v1961_v5  ;;  %v4651_v5 = vld [vmem:[%s6407_s10 + $0x20] sm:$0xff] }
 0xfbe   : > { %v1974_v12 = vmul.f32 %v1973_v49, %v1958_v62  ;;  %v1999_v13 = vmul.f32 2.1237322e-06, %v1998_v6  ;;  %v2010_v22 = vmul.f32 3.8918573e-05, %v1998_v6  ;;  %v1963_v8 = vmul.f32 %v1962_v30, %v1958_v62 }
 0xfbf   : > { %2090 = vmatpush.bf16.msrb.mxu2 %v4651_v5 }
 0xfc0   : > { %v1975_v47 = vadd.f32 0.112945676, %v1974_v12  ;;  %v2000_v36 = vadd.f32 0.00028619796, %v1999_v13  ;;  %v2011_v41 = vadd.f32 0.001143296, %v2010_v22 }
 0xfc1   : > { %v1964_v15 = vadd.f32 0.05243302, %v1963_v8 }
 0xfc2   : > { %v1976_v0 = vmul.f32 %v1975_v47, %v1958_v62  ;;  %v2001_v39 = vmul.f32 %v2000_v36, %v1998_v6  ;;  %v2012_v7 = vmul.f32 %v2011_v41, %v1998_v6 }
 0xfc3   : > { %v1965_v63 = vmul.f32 %v1964_v15, %v1958_v62 }
 0xfc4   : > { %v1977_v3 = vadd.f32 0.4994258, %v1976_v0  ;;  %v2002_v19 = vadd.f32 0.0036580483, %v2001_v39  ;;  %v2013_v23 = vadd.f32 0.014752088, %v2012_v7 }
 0xfc5   : > { %v1966_v30 = vadd.f32 0.18741608, %v1965_v63 }
 0xfc6   : > { %v1978_v59 = vmul.f32 %v1977_v3, %v1958_v62  ;;  %v2014_v17 = vmul.f32 %v2013_v23, %v1998_v6  ;;  %v2003_v55 = vmul.f32 %v2002_v19, %v1998_v6 }
 0xfc7   : > { %v1967_v0 = vmul.f32 %v1966_v30, %v1958_v62 }
 0xfc8   : > { %v1979_v31 = vadd.f32 1.0, %v1978_v59  ;;  %v2015_v34 = vadd.f32 0.112945676, %v2014_v17  ;;  %v2004_v49 = vadd.f32 0.05243302, %v2003_v55 }
 0xfc9   : > { %v1968_v19 = vadd.f32 1.1283791, %v1967_v0  ;;  %v1953_v0 = vmul.f32 0.5, %v5845_v27 }
 0xfca   : > { %4972 = vrcp.f32 %v1979_v31  ;;  %v2016_v56 = vmul.f32 %v2015_v34, %v1998_v6  ;;  %v2005_v35 = vmul.f32 %v2004_v49, %v1998_v6  ;;  %v1991_v7 = vand.u32 2147483648, %v1979_v31 }
 0xfcb   : > { %v1989_v3 = vand.u32 2147483647, %v1979_v31  ;;  %vm1985_vm5 = vweird.f32 %v1979_v31  ;;  %v1969_v34 = vmul.f32 %v1968_v19, %v5848_v16 }
 0xfcc   : > { %v2017_v12 = vadd.f32 0.4994258, %v2016_v56  ;;  %v2006_v8 = vadd.f32 0.18741608, %v2005_v35  ;;  %v1992_v17 = vor.u32 1.1754944e-38, %v1991_v7 }
 0xfcd   : > { %vm1990_vm7 = vcmp.eq.f32.partialorder %v1989_v3, 8.507059e+37 }
 0xfce   : > { %v2018_v13 = vmul.f32 %v2017_v12, %v1998_v6  ;;  %v2007_v15 = vmul.f32 %v2006_v8, %v1998_v6 }
 0xfd0   : > { %v4973_v22 = vpop.eup %4972  ;;  %v2019_v36 = vadd.f32 1.0, %v2018_v13  ;;  %v2008_v62 = vadd.f32 1.1283791, %v2007_v15  ;;  %v688_v15 = vld [vmem:[%s6417_s20] sm:$0xff] }
 0xfd1   : > { %v1981_v47 = vmul.f32 %v4973_v22, %v1979_v31  ;;  %vm1986_vm4 = vweird.f32 %v4973_v22 }
 0xfd2   : > { %4974 = vrcp.f32 %v2019_v36  ;;  %vm1987_vm6 = vmor %vm1985_vm5, %vm1986_vm4  ;;  %v2031_v63 = vand.u32 2147483648, %v2019_v36  ;;  %v2029_v12 = vand.u32 2147483647, %v2019_v36  ;;  %vm2025_vm2 = vweird.f32 %v2019_v36 }
 0xfd3   : > { %v1982_v41 = vsub.f32 1.0, %v1981_v47 }
 0xfd4   : > { %v2032_v31 = vor.u32 1.1754944e-38, %v2031_v63  ;;  %vm2030_vm4 = vcmp.eq.f32.partialorder %v2029_v12, 8.507059e+37 }
 0xfd5   : > { %v1983_v39 = vmul.f32 %v4973_v22, %v1982_v41 }
 0xfd7   : > { %v1984_v20 = vadd.f32 %v4973_v22, %v1983_v39  ;;  %v1954_v39 = vmul.f32 0.5, %v5852_v11  ;;  %v694_v11 = vld [vmem:[%s6417_s20 + $0x30] sm:$0xff] }
 0xfd8   : > { %v4975_v23 = vpop.eup %4974 }
 0xfd9   : > { %v1988_v59 = vsel %vm1987_vm6, %v4973_v22, %v1984_v20  ;;  %v2021_v43 = vmul.f32 %v4975_v23, %v2019_v36  ;;  %vm2026_vm3 = vweird.f32 %v4975_v23  ;;  %v2009_v22 = vmul.f32 %v2008_v62, %v5855_v18  ;;  %v695_v18 = vld [vmem:[%s6417_s20 + $0x38] sm:$0xff]  ;;  %v2432_v62 = vpop.permute.xlu2 %2431 }
 0xfda   : > { %v1993_v55 = vsel %vm1990_vm7, %v1992_v17, %v1988_v59  ;;  %vm2027_vm15 = vmor %vm2025_vm2, %vm2026_vm3  ;;  %2302 = vmatpush.msra.mxu2 %v695_v18  ;;  %4371 = vmatpush.xpose.msk.msrb.mxu0 %vm2218_vm8, %v695_v18  ;;  %v693_v59 = vld [vmem:[%s6417_s20 + $0x28] sm:$0xff]  ;;  %v692_v17 = vld [vmem:[%s6417_s20 + $0x20] sm:$0xff] }
 0xfdb   : > { %v2022_v56 = vsub.f32 1.0, %v2021_v43  ;;  %v1994_v5 = vmul.f32 %v1993_v55, %v1969_v34 }
 0xfdc   : > { %2303 = vmatpush.msra.mxu2 %v694_v11 }
 0xfdd   : > { %v2023_v49 = vmul.f32 %v4975_v23, %v2022_v56  ;;  %v4327_v30 = vclamps-f32 %v1994_v5, 1.0 }
 0xfde   : > { %4372 = vmatpush.xpose.msk.msrb.mxu0 %vm2218_vm8, %v694_v11  ;;  %2304 = vmatpush.msra.mxu2 %v693_v59 }
 0xfdf   : > { %v2024_v13 = vadd.f32 %v4975_v23, %v2023_v49  ;;  %v2037_v41 = vadd.f32 1.0, %v4327_v30  ;;  %v4660_v30 = vld [vmem:[%s6465_s24 + $0x38] sm:$0xff] }
 0xfe0   : > { %2305 = vmatpush.msra.mxu2 %v692_v17  ;;  %2568 = vrot.lane.b32.xlu2 %v4660_v30, %s6475_s1 }
 0xfe1   : > { %v2028_v6 = vsel %vm2027_vm15, %v4975_v23, %v2024_v13  ;;  %v2039_v8 = vmul.f32 %v2037_v41, %v1953_v0  ;;  %v2430_v5 = vpop.permute.xlu2 %2429  ;;  %2558 = vmatpush.bf16.msrb.mxu1 %v4660_v30 }
 0xfe2   : > { %v2033_v47 = vsel %vm2030_vm4, %v2032_v31, %v2028_v6  ;;  %4373 = vmatpush.xpose.msk.msrb.mxu0 %vm2218_vm8, %v693_v59  ;;  %2306 = vmatpush.msra.mxu2 %v691_v46  ;;  %v4659_v6 = vld [vmem:[%s6465_s24 + $0x30] sm:$0xff] }
 0xfe3   : > { %v2034_v35 = vmul.f32 %v2033_v47, %v2009_v22  ;;  %v4658_v22 = vld [vmem:[%s6404_s7 + $0x28] sm:$0xff] }
 0xfe4   : > { %2307 = vmatpush.msra.mxu2 %v690_v58 }
 0xfe5   : > { %v4328_v16 = vclamps-f32 %v2034_v35, 1.0  ;;  %2559 = vmatpush.bf16.msrb.mxu1 %v4659_v6 }
 0xfe6   : > { %4374 = vmatpush.xpose.msk.msrb.mxu0 %vm2218_vm8, %v692_v17 }
 0xfe7   : > { %v2038_v7 = vadd.f32 1.0, %v4328_v16  ;;  %v4657_v16 = vld [vmem:[%s6404_s7 + $0x20] sm:$0xff] }
 0xfe8   : > { %2566 = vrot.lane.b32.xlu2 %v4659_v6, %s6475_s1 }
 0xfe9   : > { %v2040_v3 = vmul.f32 %v2038_v7, %v1954_v39 }
 0xfea   : > { %4375 = vmatpush.xpose.msk.msrb.mxu0 %vm2218_vm8, %v691_v46 }
 0xfeb   : > { %v2050_v20 = vpack.c.bf16 %v2040_v3, %v2039_v8  ;;  %v4913_v3 = vld [vmem:[%s6408_s11 + $0x1] ss:$0 sm:$0xff] }
 0xfed   : > { %4354 = vmatmul.msk.bf16.vlgmr.msrb.gmra.mxu2 %vm735_vm0, %v2050_v20 }
 0xfee   : > { %4376 = vmatpush.xpose.msk.msrb.mxu0 %vm2218_vm8, %v690_v58  ;;  %v5942_v58 = vld [vmem:[%s6403_s6 + $0x3] ss:$0 sm:$0xff] }
 0xffc   : > { %v2280_v36 = vpop.f32.mrf.mxu1 }
 0xffd   : > { %v2284_v19 = vmul.f32 0.5, %v2280_v36 }
 0xfff   : > { %v2285_v23 = vsel %vm735_vm0, %v2284_v19, -inf }
0x1000   : > { %2286 = vmax.xlane.f32.xlu1 %v2285_v23 }
0x1004   : > { %v2282_v27 = vpop.f32.mrf.mxu1 }
0x1019   : > { %2433 = vrot.lane.b32.xlu1 %v2422_v10, %s6477_s28  ;;  %v689_v10 = vld [vmem:[%s6417_s20 + $0x8] sm:$0xff] }
0x101a   : > { %2308 = vmatpush.msra.mxu2 %v689_v10  ;;  %4377 = vmatpush.xpose.msk.msrb.mxu0 %vm2218_vm8, %v689_v10 }
0x101c   : > { %2309 = vmatpush.msra.mxu2 %v688_v15 }
0x101e   : > { %4378 = vmatpush.xpose.msk.msrb.mxu0 %vm2218_vm8, %v688_v15  ;;  %2484 = vmatpush.bf16.msrb.mxu2 %v4658_v22 }
0x1022   : > { %2485 = vmatpush.bf16.msrb.mxu2 %v4657_v16 }
0x103a   : > { %v2569_v0 = vpop.permute.xlu2 %2568 }
0x1042   : > { %v2567_v39 = vpop.permute.xlu2 %2566 }
0x1070   : > { %v2092_v49 = vpop.f32.mrf.mxu2 }
0x1071   : > { %v2093_v36 = vadd.f32 %v4913_v3, %v2092_v49 }
0x1073   : > { %v2287_v43 = vpop.xlane.xlu1 %2286  ;;  %v2097_v23 = vadd.f32 %v2093_v36, %v5671_v25 }
0x1074   : > { %v2288_v55 = vsub.f32 %v2284_v19, %v2287_v43 }
0x1076   : > { %v2289_v34 = vmul.f32 1.442695, %v2288_v55 }
0x1078   : > { %4976 = vpow2.f32 %v2289_v34  ;;  %v2094_v12 = vpop.f32.mrf.mxu2 }
0x1079   : > { %v2095_v18 = vadd.f32 %v4913_v3, %v2094_v12 }
0x107b   : > { %v2098_v19 = vadd.f32 %v2095_v18, %v5676_v4 }
0x107d   : > { %v2565_v27 = vpack.c.bf16 %v2098_v19, %v2097_v23 }
0x107e   : > { %v4977_v56 = vpop.eup %4976 }
0x107f   : > { %4370 = vmatmul.msk.f32.vlgmr.msra.gmra.mxu2 %vm735_vm0, %v4977_v56 }
0x1080   : > { %2584 = vmatpush.bf16.msra.mxu2 %v2569_v0 }
0x1084   : > { %2585 = vmatpush.bf16.msra.mxu2 %v2567_v39  ;;  %v4915_v39 = vld [vmem:[%s6409_s12 + $0x4] ss:$0 sm:$0xff] }
0x108b   : > { %v2434_v63 = vpop.permute.xlu1 %2433 }
0x108c   : > { %2449 = vmatpush.bf16.msrb.mxu3 %v2434_v63 }
0x1090   : > { %2450 = vmatpush.bf16.msrb.mxu3 %v2432_v62 }
0x1094   : > { %2451 = vmatpush.bf16.msrb.mxu3 %v2430_v5 }
0x1102   : > { %v2311_v13 = vpop.f32.mrf.mxu2 }
0x1103   : > { %4978 = vrcp.f32 %v2311_v13 }
0x1109   : > { %v4979_v31 = vpop.eup %4978 }
0x110a   : > { %4379 = vmatmul.msk.f32.vlgmr.msrb.gmra.mxu0 %vm2218_vm8, %v4979_v31 }
0x1187   : > { %v2359_v47 = vpop.f32.mrf.mxu0 }
0x1188   : > { %v2362_v35 = vmul.f32 %v4977_v56, %v2359_v47 }
0x118a   : > { %v2424_v41 = vpack.c.bf16 %v2362_v35, %v2362_v35 }
0x118c   : > { %4380 = vmatmul.msk.bf16.vlgmr.msrb.gmra.mxu3 %vm735_vm0, %v2424_v41 }
0x120f   : > { %v2453_v7 = vpop.f32.mrf.mxu3 }
0x1210   : > { %v2462_v8 = vpack.c.bf16 %v2453_v7, %v2453_v7 }
0x1212   : > { %4393 = vmatmul.msk.bf16.vlgmr.msrb.gmra.mxu2 %vm757_vm1, %v2462_v8  ;;  %v4916_v8 = vld [vmem:[%s6410_s13 + $0x4] ss:$0 sm:$0xff] }
0x1217   : > { %v2455_v20 = vpop.f32.mrf.mxu3 }
0x1222   : > { %4410 = vmatmul.msk.bf16.vlgmr.msra.gmra.mxu2 %vm757_vm1, %v2565_v27 }
0x1295   : > { %v2487_v11 = vpop.f32.mrf.mxu2 }
0x1296   : > { %v2491_v59 = vadd.f32 %v2487_v11, %v5665_v9 }
0x1298   : > { %v2492_v17 = vsel %vm757_vm1, %v2491_v59, 0.0 }
0x1299   : > { %2493 = vadd.xlane.f32.xlu1 %v2492_v17 }
0x129d   : > { %v2489_v46 = vpop.f32.mrf.mxu2 }
0x12a5   : > { %v2587_v9 = vpop.f32.mrf.mxu2 }
0x12ad   : > { %v2589_v55 = vpop.f32.mrf.mxu2 }
0x12b2   : > { %2572 = vrot.lane.b32.xlu1 %v5942_v58, %s6475_s1 }
0x130c   : > { %v2494_v4 = vpop.xlane.xlu1 %2493 }
0x130d   : > { %v2495_v25 = vmul.f32 %v2494_v4, %v5190_v24 }
0x130f   : > { %v2496_v10 = vsub.f32 %v2491_v59, %v2495_v25 }
0x1311   : > { %v2497_v15 = vmul.f32 %v2496_v10, %v2496_v10 }
0x1313   : > { %v2498_v43 = vsel %vm757_vm1, %v2497_v15, 0.0 }
0x1314   : > { %2499 = vadd.xlane.f32.xlu2 %v2498_v43 }
0x1324   : > { %v2573_v34 = vpop.permute.xlu1 %2572 }
0x1325   : > { %v2588_v56 = vadd.f32 %v2587_v9, %v2573_v34  ;;  %v2590_v62 = vadd.f32 %v2589_v55, %v2573_v34 }
0x1327   : > { %v2629_v63 = vpack.c.bf16 %v2588_v56, %v2588_v56  ;;  %v2630_v5 = vpack.c.bf16 %v2590_v62, %v2590_v62 }
0x1329   : > { %v2747_v49 = vunpack.c.l.b16 %v2629_v63  ;;  %v2748_v12 = vunpack.c.l.b16 %v2630_v5 }
0x132b   : > { %v5948_v13 = vpack.c.b16 %v2748_v12, %v2747_v49 }
0x133d   : > { %2593 = vxpose.xlu2.b32.start [1/2] (short) (narrow) %v2588_v56, 32 }
0x1345   : > { %2594 = vxpose.xlu2.b32.end [2/2] (short) (narrow) %v2590_v62, 32 }
0x1387   : > { %v2500_v31 = vpop.xlane.xlu2 %2499 }
0x1388   : > { %v2501_v30 = vmul.f32 %v2500_v31, %v5190_v24 }
0x138a   : > { %v2502_v22 = vadd.f32 1e-05, %v2501_v30 }
0x138c   : > { %4980 = vrsqrt.f32 %v2502_v22  ;;  %vm2509_vm2 = vweird.f32 %v2502_v22 }
0x1392   : > { %v4981_v6 = vpop.eup %4980 }
0x1393   : > { %v2504_v47 = vmul.f32 %v4981_v6, %v2502_v22  ;;  %vm2510_vm15 = vweird.f32 %v4981_v6 }
0x1394   : > { %vm2511_vm3 = vmor %vm2509_vm2, %vm2510_vm15 }
0x1395   : > { %v2505_v35 = vmul.f32 %v4981_v6, %v2504_v47 }
0x1397   : > { %v2506_v41 = vmul.f32 0.5, %v2505_v35 }
0x1399   : > { %v2507_v16 = vsub.f32 1.5, %v2506_v41 }
0x139b   : > { %v2508_v0 = vmul.f32 %v4981_v6, %v2507_v16 }
0x139d   : > { %v2512_v7 = vsel %vm2511_vm3, %v4981_v6, %v2508_v0 }
0x139e   : > { %v2513_v3 = vmul.f32 %v2512_v7, %v2496_v10 }
0x13a0   : > { %v2519_v20 = vmul.f32 %v4915_v39, %v2513_v3  ;;  %v6016_v3 = vunpack.c.h.bf16 %v5948_v13 }
0x13a2   : > { %v5957_v18 = vadd.f32 %v4916_v8, %v2519_v20  ;;  %v6013_v8 = vunpack.c.l.bf16 %v5948_v13 }
0x13a4   : > { %v2533_v36 = vpack.c.bf16 %v5957_v18, %v5957_v18 }
0x13a6   : > { %4409 = vmatmul.msk.bf16.vlgmr.msrb.gmra.mxu1 %vm757_vm1, %v2533_v36 }
0x13d6   : > { %v2609_v19 = vpop.trf.xlu2 }
0x13d7   : > { %v2625_v23 = vpack.c.bf16 %v2609_v19, %v2609_v19 }
0x13d9   : > { %v2635_v59 = vunpack.c.l.b16 %v2625_v23 }
0x13de   : > { %v2610_v27 = vpop.trf.xlu2 }
0x13df   : > { %v2626_v11 = vpack.c.bf16 %v2610_v27, %v2610_v27 }
0x13e1   : > { %v2636_v17 = vunpack.c.l.b16 %v2626_v11 }
0x13e3   : > { %v5962_v46 = vpack.c.b16 %v2636_v17, %v2635_v59 }
0x13e5   : > { %2657 = vrot.lane.b32.xlu2 %v5962_v46, %s6470_s26 }
0x13e6   : > { %v2611_v4 = vpop.trf.xlu2 }
0x13e7   : > { %v2627_v25 = vpack.c.bf16 %v2611_v4, %v2611_v4 }
0x13e9   : > { %v2637_v43 = vunpack.c.l.b16 %v2627_v25 }
0x13ee   : > { %v2612_v10 = vpop.trf.xlu2 }
0x13ef   : > { %v2628_v15 = vpack.c.bf16 %v2612_v10, %v2612_v10 }
0x13f1   : > { %v2638_v9 = vunpack.c.l.b16 %v2628_v15 }
0x13f3   : > { %v2640_v55 = vpack.c.b16 %v2638_v9, %v2637_v43 }
0x13f5   : > { %2655 = vrot.lane.b32.xlu1 %v2640_v55, %s6477_s28  ;;  %2643 = vrot.lane.b32.xlu0 %v2640_v55, %s6476_s22 }
0x13fd   : > { %2659 = vrot.lane.b32.xlu1 %v2640_v55, %s6470_s26  ;;  %2647 = vrot.lane.b32.xlu0 %v2640_v55, %s6468_s29 }
0x1405   : > { %2663 = vrot.lane.b32.xlu1 %v2640_v55, %s6475_s1  ;;  %2651 = vrot.lane.b32.xlu0 %v2640_v55, %s6469_s4 }
0x140d   : > { %2667 = vrot.lane.b32.xlu1 %v2640_v55, %s6479_s30  ;;  %2641 = vrot.lane.b32.xlu0 %v5962_v46, %s6476_s22 }
0x1415   : > { %2661 = vrot.lane.b32.xlu1 %v5962_v46, %s6475_s1  ;;  %2645 = vrot.lane.b32.xlu0 %v5962_v46, %s6468_s29 }
0x141d   : > { %4859 = vrot.lane.b32.xlu1 %v5276_v44, %s6468_s29  ;;  %2649 = vrot.lane.b32.xlu0 %v5962_v46, %s6469_s4 }
0x1423   : > { %v5983_v34 = vpop.f32.mrf.mxu1 }
0x1425   : > { %4869 = vrot.lane.b32.xlu1 %v5290_v52, %s6468_s29  ;;  %2653 = vrot.lane.b32.xlu0 %v5962_v46, %s6477_s28 }
0x142b   : > { %v2563_v56 = vpop.f32.mrf.mxu1 }
0x142d   : > { %4879 = vrot.lane.b32.xlu1 %v5304_v60, %s6468_s29  ;;  %2665 = vrot.lane.b32.xlu0 %v5962_v46, %s6479_s30 }
0x1435   : > { %4889 = vrot.lane.b32.xlu1 %v5315_v1, %s6468_s29  ;;  %4864 = vrot.lane.b32.xlu0 %v5264_v37, %s6468_s29 }
0x143d   : > { %4874 = vrot.lane.b32.xlu0 %v5278_v45, %s6468_s29 }
0x143f   : > { %v2658_v43 = vpop.permute.xlu2 %2657 }
0x1445   : > { %4884 = vrot.lane.b32.xlu0 %v5292_v53, %s6468_s29 }
0x144d   : > { %4894 = vrot.lane.b32.xlu0 %v5306_v61, %s6468_s29 }
0x1467   : > { %v2656_v44 = vpop.permute.xlu1 %2655  ;;  %v2644_v52 = vpop.permute.xlu0 %2643 }
0x1468   : > { %v2674_v63 = vsel %vm944_vm9, %v2640_v55, %v2644_v52 }
0x146f   : > { %v2660_v60 = vpop.permute.xlu1 %2659  ;;  %v2648_v62 = vpop.permute.xlu0 %2647 }
0x1470   : > { %v2678_v1 = vsel %vm757_vm1, %v2674_v63, %v2648_v62 }
0x1477   : > { %v2664_v5 = vpop.permute.xlu1 %2663  ;;  %v2652_v49 = vpop.permute.xlu0 %2651 }
0x1478   : > { %v2682_v37 = vsel %vm955_vm10, %v2678_v1, %v2652_v49 }
0x1479   : > { %v2686_v45 = vsel %vm735_vm0, %v2682_v37, %v2656_v44  ;;  %v2562_v37 = vadd.f32 %v5942_v58, %v5983_v34 }
0x147a   : > { %v2690_v12 = vsel %vm964_vm11, %v2686_v45, %v2660_v60 }
0x147b   : > { %v2694_v31 = vsel %vm969_vm12, %v2690_v12, %v2664_v5 }
0x147f   : > { %v2668_v53 = vpop.permute.xlu1 %2667  ;;  %v2642_v61 = vpop.permute.xlu0 %2641 }
0x1480   : > { %v2699_v30 = vsel %vm974_vm13, %v2694_v31, %v2668_v53 }
0x1481   : > { %v2703_v22 = vunpack.c.l.bf16 %v2699_v30  ;;  %v2704_v6 = vunpack.c.h.bf16 %v2699_v30 }
0x1483   : > { %v2707_v47 = vmul.f32 %v5329_v28, %v2703_v22  ;;  %v2708_v35 = vmul.f32 %v5331_v29, %v2704_v6  ;;  %v2671_v29 = vsel %vm944_vm9, %v5962_v46, %v2642_v61  ;;  %v2592_v61 = vpack.c.bf16 %v2562_v37, %v2562_v37 }
0x1485   : > { %v2710_v41 = vpack.c.bf16 %v2708_v35, %v2707_v47 }
0x1487   : > { %v2662_v16 = vpop.permute.xlu1 %2661  ;;  %2720 = vmatpush.bf16.msra.mxu3 %v2710_v41  ;;  %v2646_v0 = vpop.permute.xlu0 %2645 }
0x1488   : > { %v2676_v27 = vsel %vm757_vm1, %v2671_v29, %v2646_v0 }
0x148f   : > { %v4860_v39 = vpop.permute.xlu1 %4859  ;;  %v2650_v7 = vpop.permute.xlu0 %2649 }
0x1490   : > { %v4862_v20 = vunpack.i.h.bf16 %v4860_v39  ;;  %v4861_v36 = vunpack.i.l.bf16 %v4860_v39  ;;  %v2680_v17 = vsel %vm955_vm10, %v2676_v27, %v2650_v7 }
0x1492   : > { %v2815_v19 = vmul.f32 %v4861_v36, %v6013_v8  ;;  %v2816_v28 = vmul.f32 %v4862_v20, %v6016_v3 }
0x1494   : > { %v2824_v23 = vpack.c.bf16 %v2816_v28, %v2815_v19 }
0x1496   : > { %2848 = vrot.lane.b32.xlu1 %v2824_v23, %s6475_s1 }
0x1497   : > { %v4870_v11 = vpop.permute.xlu1 %4869  ;;  %v2654_v59 = vpop.permute.xlu0 %2653 }
0x1498   : > { %v4872_v13 = vunpack.i.h.bf16 %v4870_v11  ;;  %v4871_v4 = vunpack.i.l.bf16 %v4870_v11  ;;  %v2684_v25 = vsel %vm735_vm0, %v2680_v17, %v2654_v59 }
0x1499   : > { %v2688_v9 = vsel %vm964_vm11, %v2684_v25, %v2658_v43 }
0x149a   : > { %v2811_v10 = vmul.f32 %v4871_v4, %v6013_v8  ;;  %v2812_v15 = vmul.f32 %v4872_v13, %v6016_v3  ;;  %v2692_v44 = vsel %vm969_vm12, %v2688_v9, %v2662_v16 }
0x149c   : > { %v2822_v46 = vpack.c.bf16 %v2812_v15, %v2811_v10 }
0x149e   : > { %2844 = vrot.lane.b32.xlu1 %v2822_v46, %s6475_s1 }
0x149f   : > { %v4880_v55 = vpop.permute.xlu1 %4879  ;;  %v2666_v56 = vpop.permute.xlu0 %2665 }
0x14a0   : > { %v4882_v52 = vunpack.i.h.bf16 %v4880_v55  ;;  %v4881_v60 = vunpack.i.l.bf16 %v4880_v55  ;;  %v2696_v62 = vsel %vm974_vm13, %v2692_v44, %v2666_v56 }
0x14a1   : > { %v2701_v63 = vunpack.c.l.bf16 %v2696_v62  ;;  %v2702_v1 = vunpack.c.h.bf16 %v2696_v62 }
0x14a2   : > { %v2807_v5 = vmul.f32 %v4881_v60, %v6013_v8  ;;  %v2808_v49 = vmul.f32 %v4882_v52, %v6016_v3 }
0x14a3   : > { %v2705_v45 = vmul.f32 %v5351_v26, %v2701_v63  ;;  %v2706_v12 = vmul.f32 %v5353_v51, %v2702_v1 }
0x14a4   : > { %v2820_v53 = vpack.c.bf16 %v2808_v49, %v2807_v5 }
0x14a5   : > { %v2709_v31 = vpack.c.bf16 %v2706_v12, %v2705_v45 }
0x14a6   : > { %2840 = vrot.lane.b32.xlu1 %v2820_v53, %s6475_s1 }
0x14a7   : > { %v4890_v30 = vpop.permute.xlu1 %4889  ;;  %v4865_v22 = vpop.permute.xlu0 %4864  ;;  %2721 = vmatpush.bf16.msra.mxu3 %v2709_v31 }
0x14a8   : > { %v4892_v6 = vunpack.i.h.bf16 %v4890_v30  ;;  %v4891_v47 = vunpack.i.l.bf16 %v4890_v30  ;;  %v4867_v35 = vunpack.i.h.bf16 %v4865_v22  ;;  %v4866_v41 = vunpack.i.l.bf16 %v4865_v22 }
0x14aa   : > { %v2803_v16 = vmul.f32 %v4891_v47, %v6013_v8  ;;  %v2804_v58 = vmul.f32 %v4892_v6, %v6016_v3  ;;  %v2813_v26 = vmul.f32 %v4866_v41, %v6013_v8  ;;  %v2814_v51 = vmul.f32 %v4867_v35, %v6016_v3  ;;  %4411 = vmatmul.msk.bf16.vlgmr.msra.gmra.mxu3 %vm757_vm1, %v2592_v61  ;;  %v4662_v61 = vld [vmem:[%s6404_s7 + $0x38] sm:$0xff] }
0x14ab   : > { %2898 = vmatpush.bf16.msra.mxu0 %v4662_v61  ;;  %v4668_v61 = vld [vmem:[%s6407_s10 + $0x58] sm:$0xff] }
0x14ac   : > { %v2823_v34 = vpack.c.bf16 %v2814_v51, %v2813_v26  ;;  %v2818_v0 = vpack.c.bf16 %v2804_v58, %v2803_v16  ;;  %3068 = vmatpush.bf16.msrb.mxu3 %v4668_v61 }
0x14ae   : > { %2846 = vrot.lane.b32.xlu0 %v2823_v34, %s6475_s1  ;;  %2836 = vrot.lane.b32.xlu1 %v2818_v0, %s6475_s1  ;;  %v4661_v34 = vld [vmem:[%s6404_s7 + $0x30] sm:$0xff] }
0x14af   : > { %v4875_v39 = vpop.permute.xlu0 %4874  ;;  %2899 = vmatpush.bf16.msra.mxu0 %v4661_v34 }
0x14b0   : > { %v4877_v7 = vunpack.i.h.bf16 %v4875_v39  ;;  %v4876_v20 = vunpack.i.l.bf16 %v4875_v39 }
0x14b2   : > { %v2809_v36 = vmul.f32 %v4876_v20, %v6013_v8  ;;  %v2810_v19 = vmul.f32 %v4877_v7, %v6016_v3 }
0x14b4   : > { %v2821_v28 = vpack.c.bf16 %v2810_v19, %v2809_v36 }
0x14b6   : > { %2842 = vrot.lane.b32.xlu0 %v2821_v28, %s6475_s1 }
0x14b7   : > { %v4885_v23 = vpop.permute.xlu0 %4884 }
0x14b8   : > { %v4887_v29 = vunpack.i.h.bf16 %v4885_v23  ;;  %v4886_v27 = vunpack.i.l.bf16 %v4885_v23 }
0x14ba   : > { %v2805_v11 = vmul.f32 %v4886_v27, %v6013_v8  ;;  %v2806_v59 = vmul.f32 %v4887_v29, %v6016_v3 }
0x14bc   : > { %v2819_v17 = vpack.c.bf16 %v2806_v59, %v2805_v11 }
0x14be   : > { %2838 = vrot.lane.b32.xlu0 %v2819_v17, %s6475_s1  ;;  %v4664_v17 = vld [vmem:[%s6405_s8 + $0x28] sm:$0xff] }
0x14bf   : > { %v4895_v13 = vpop.permute.xlu0 %4894  ;;  %2971 = vmatpush.bf16.msrb.mxu2 %v4664_v17 }
0x14c0   : > { %v4897_v4 = vunpack.i.h.bf16 %v4895_v13  ;;  %v4896_v25 = vunpack.i.l.bf16 %v4895_v13 }
0x14c2   : > { %v2801_v10 = vmul.f32 %v4896_v25, %v6013_v8  ;;  %v2802_v15 = vmul.f32 %v4897_v4, %v6016_v3 }
0x14c4   : > { %v2817_v43 = vpack.c.bf16 %v2802_v15, %v2801_v10 }
0x14c6   : > { %2834 = vrot.lane.b32.xlu0 %v2817_v43, %s6475_s1 }
0x1508   : > { %v2849_v9 = vpop.permute.xlu1 %2848 }
0x1509   : > { %2858 = vmatpush.bf16.msra.mxu1 %v2849_v9 }
0x1510   : > { %v2845_v46 = vpop.permute.xlu1 %2844 }
0x1518   : > { %v2841_v44 = vpop.permute.xlu1 %2840 }
0x1520   : > { %v2847_v55 = vpop.permute.xlu0 %2846  ;;  %v2837_v3 = vpop.permute.xlu1 %2836 }
0x1521   : > { %2859 = vmatpush.bf16.msra.mxu1 %v2847_v55 }
0x1525   : > { %2860 = vmatpush.bf16.msra.mxu1 %v2845_v46 }
0x1528   : > { %v2843_v56 = vpop.permute.xlu0 %2842 }
0x1529   : > { %2861 = vmatpush.bf16.msra.mxu1 %v2843_v56  ;;  %v4917_v56 = vld [vmem:[%s6409_s12 + $0x5] ss:$0 sm:$0xff] }
0x152d   : > { %v2723_v52 = vpop.f32.mrf.mxu3  ;;  %2862 = vmatpush.bf16.msra.mxu1 %v2841_v44 }
0x152e   : > { %v2727_v60 = vmul.f32 0.5, %v2723_v52  ;;  %v4918_v52 = vld [vmem:[%s6410_s13 + $0x5] ss:$0 sm:$0xff] }
0x1530   : > { %v2728_v62 = vrot.slane %v2727_v60, 4  ;;  %v2839_v63 = vpop.permute.xlu0 %2838 }
0x1531   : > { %2863 = vmatpush.bf16.msra.mxu1 %v2839_v63 }
0x1532   : > { %v2729_v8 = vmax.f32 %v2727_v60, %v2728_v62 }
0x1534   : > { %v2730_v1 = vrot.slane %v2729_v8, 2 }
0x1535   : > { %v2725_v5 = vpop.f32.mrf.mxu3  ;;  %2864 = vmatpush.bf16.msra.mxu1 %v2837_v3  ;;  %v4919_v3 = vld [vmem:[%s6406_s9 + $0x2] ss:$0 sm:$0xff] }
0x1536   : > { %v2731_v49 = vmax.f32 %v2729_v8, %v2730_v1 }
0x1538   : > { %v2732_v37 = vrot.slane %v2731_v49, 1  ;;  %v2835_v45 = vpop.permute.xlu0 %2834 }
0x1539   : > { %2865 = vmatpush.bf16.msra.mxu1 %v2835_v45 }
0x153a   : > { %v2733_v12 = vmax.f32 %v2731_v49, %v2732_v37 }
0x153c   : > { %v2734_v53 = vsub.f32 %v2727_v60, %v2733_v12 }
0x153e   : > { %v2735_v31 = vmul.f32 1.442695, %v2734_v53 }
0x1540   : > { %4982 = vpow2.f32 %v2735_v31 }
0x1546   : > { %v4983_v30 = vpop.eup %4982 }
0x1547   : > { %v2737_v22 = vrot.slane %v4983_v30, 4 }
0x1549   : > { %v2738_v6 = vadd.f32 %v4983_v30, %v2737_v22 }
0x154b   : > { %v2739_v47 = vrot.slane %v2738_v6, 2 }
0x154d   : > { %v2740_v35 = vadd.f32 %v2739_v47, %v2738_v6 }
0x154f   : > { %v2741_v41 = vrot.slane %v2740_v35, 1 }
0x1551   : > { %v2742_v16 = vadd.f32 %v2741_v41, %v2740_v35  ;;  %v4667_v35 = vld [vmem:[%s6407_s10 + $0x50] sm:$0xff] }
0x1552   : > { %3069 = vmatpush.bf16.msrb.mxu3 %v4667_v35 }
0x1553   : > { %4984 = vrcp.f32 %v2742_v16 }
0x1559   : > { %v4985_v58 = vpop.eup %4984 }
0x155a   : > { %v2744_v26 = vmul.f32 %v4985_v58, %v4983_v30 }
0x155c   : > { %v2825_v51 = vpack.c.bf16 %v2744_v26, %v2744_v26  ;;  %v4666_v26 = vld [vmem:[%s6407_s10 + $0x48] sm:$0xff] }
0x155d   : > { %3070 = vmatpush.bf16.msrb.mxu3 %v4666_v26 }
0x155e   : > { %2866 = vmatmul.bf16.vlgmr.msra.gmra.mxu1 %v2825_v51 }
0x15db   : > { %v2867_v0 = vpop.f32.mrf.mxu1 }
0x15dc   : > { %v2876_v39 = vpack.c.bf16 %v2867_v0, %v2867_v0 }
0x15de   : > { %4424 = vmatmul.msk.bf16.vlgmr.msra.gmra.mxu0 %vm757_vm1, %v2876_v39  ;;  %v4665_v39 = vld [vmem:[%s6407_s10 + $0x40] sm:$0xff] }
0x15df   : > { %3071 = vmatpush.bf16.msrb.mxu3 %v4665_v39 }
0x15e3   : > { %v2869_v7 = vpop.f32.mrf.mxu1 }
0x165b   : > { %v2901_v20 = vpop.f32.mrf.mxu0 }
0x165c   : > { %v2902_v36 = vadd.f32 %v2901_v20, %v5957_v18  ;;  %v4663_v18 = vld [vmem:[%s6405_s8 + $0x20] sm:$0xff] }
0x165d   : > { %2972 = vmatpush.bf16.msrb.mxu2 %v4663_v18 }
0x165e   : > { %v2905_v19 = vsel %vm757_vm1, %v2902_v36, 0.0 }
0x165f   : > { %2906 = vadd.xlane.f32.xlu1 %v2905_v19 }
0x1663   : > { %v2903_v28 = vpop.f32.mrf.mxu0 }
0x16d2   : > { %v2907_v23 = vpop.xlane.xlu1 %2906 }
0x16d3   : > { %v2908_v29 = vmul.f32 %v2907_v23, %v5190_v24 }
0x16d5   : > { %v2909_v27 = vsub.f32 %v2902_v36, %v2908_v29 }
0x16d7   : > { %v2910_v11 = vmul.f32 %v2909_v27, %v2909_v27 }
0x16d9   : > { %v2911_v59 = vsel %vm757_vm1, %v2910_v11, 0.0 }
0x16da   : > { %2912 = vadd.xlane.f32.xlu0 %v2911_v59 }
0x174d   : > { %v2913_v13 = vpop.xlane.xlu0 %2912 }
0x174e   : > { %v2914_v4 = vmul.f32 %v2913_v13, %v5190_v24 }
0x1750   : > { %v2915_v25 = vadd.f32 1e-05, %v2914_v4 }
0x1752   : > { %4986 = vrsqrt.f32 %v2915_v25  ;;  %vm2922_vm12 = vweird.f32 %v2915_v25 }
0x1758   : > { %v4987_v10 = vpop.eup %4986 }
0x1759   : > { %v2917_v15 = vmul.f32 %v4987_v10, %v2915_v25  ;;  %vm2923_vm11 = vweird.f32 %v4987_v10 }
0x175a   : > { %vm2924_vm13 = vmor %vm2922_vm12, %vm2923_vm11 }
0x175b   : > { %v2918_v43 = vmul.f32 %v4987_v10, %v2917_v15 }
0x175d   : > { %v2919_v9 = vmul.f32 0.5, %v2918_v43 }
0x175f   : > { %v2920_v46 = vsub.f32 1.5, %v2919_v9 }
0x1761   : > { %v2921_v55 = vmul.f32 %v4987_v10, %v2920_v46 }
0x1763   : > { %v2925_v44 = vsel %vm2924_vm13, %v4987_v10, %v2921_v55 }
0x1764   : > { %v2926_v60 = vmul.f32 %v2925_v44, %v2909_v27 }
0x1766   : > { %v2932_v62 = vmul.f32 %v4917_v56, %v2926_v60 }
0x1768   : > { %v6079_v63 = vadd.f32 %v4918_v52, %v2932_v62  ;;  %v4920_v62 = vld [vmem:[%s6408_s11 + $0x2] ss:$0 sm:$0xff] }
0x176a   : > { %v2944_v8 = vpack.c.bf16 %v6079_v63, %v6079_v63 }
0x176c   : > { %4440 = vmatmul.msk.bf16.vlgmr.msrb.gmra.mxu2 %vm757_vm1, %v2944_v8 }
0x17ef   : > { %v2974_v1 = vpop.f32.mrf.mxu2 }
0x17f0   : > { %v2975_v5 = vadd.f32 %v4919_v3, %v2974_v1 }
0x17f2   : > { %v2979_v49 = vmul.f32 0.70710677, %v2975_v5  ;;  %v2978_v56 = vmul.f32 0.5, %v2975_v5 }
0x17f4   : > { %v2980_v37 = vmul.f32 %v2979_v49, %v2979_v49 }
0x17f6   : > { %v2981_v45 = vmin.f32 %v2980_v37, 16.0 }
0x17f7   : > { %v2976_v12 = vpop.f32.mrf.mxu2 }
0x17f8   : > { %v2982_v53 = vmul.f32 2.1237322e-06, %v2981_v45  ;;  %v2993_v31 = vmul.f32 3.8918573e-05, %v2981_v45 }
0x17fa   : > { %v2983_v30 = vadd.f32 0.00028619796, %v2982_v53  ;;  %v2994_v22 = vadd.f32 0.001143296, %v2993_v31 }
0x17fc   : > { %v2984_v6 = vmul.f32 %v2983_v30, %v2981_v45  ;;  %v2995_v47 = vmul.f32 %v2994_v22, %v2981_v45 }
0x17fe   : > { %v2996_v41 = vadd.f32 0.014752088, %v2995_v47  ;;  %v2985_v16 = vadd.f32 0.0036580483, %v2984_v6 }
0x1800   : > { %v2997_v58 = vmul.f32 %v2996_v41, %v2981_v45  ;;  %v2986_v34 = vmul.f32 %v2985_v16, %v2981_v45 }
0x1802   : > { %v2998_v51 = vadd.f32 0.112945676, %v2997_v58  ;;  %v2987_v20 = vadd.f32 0.05243302, %v2986_v34  ;;  %v4921_v58 = vld [vmem:[%s6409_s12 + $0x6] ss:$0 sm:$0xff] }
0x1803   : > { %v4922_v34 = vld [vmem:[%s6410_s13 + $0x6] ss:$0 sm:$0xff] }
0x1804   : > { %v2999_v0 = vmul.f32 %v2998_v51, %v2981_v45  ;;  %v2988_v28 = vmul.f32 %v2987_v20, %v2981_v45 }
0x1806   : > { %v3000_v7 = vadd.f32 0.4994258, %v2999_v0  ;;  %v2989_v23 = vadd.f32 0.18741608, %v2988_v28 }
0x1808   : > { %v3001_v36 = vmul.f32 %v3000_v7, %v2981_v45  ;;  %v2990_v27 = vmul.f32 %v2989_v23, %v2981_v45 }
0x180a   : > { %v3002_v19 = vadd.f32 1.0, %v3001_v36  ;;  %v2991_v18 = vadd.f32 1.1283791, %v2990_v27  ;;  %v4669_v27 = vld [vmem:[%s6465_s24 + $0x40] sm:$0xff] }
0x180c   : > { %4988 = vrcp.f32 %v3002_v19  ;;  %v3014_v17 = vand.u32 2147483648, %v3002_v19  ;;  %v3012_v4 = vand.u32 2147483647, %v3002_v19  ;;  %vm3008_vm6 = vweird.f32 %v3002_v19 }
0x180d   : > { %v2992_v15 = vmul.f32 %v2991_v18, %v2979_v49 }
0x180e   : > { %v3015_v10 = vor.u32 1.1754944e-38, %v3014_v17  ;;  %vm3013_vm4 = vcmp.eq.f32.partialorder %v3012_v4, 8.507059e+37 }
0x1812   : > { %v4989_v29 = vpop.eup %4988 }
0x1813   : > { %v3004_v11 = vmul.f32 %v4989_v29, %v3002_v19  ;;  %vm3009_vm5 = vweird.f32 %v4989_v29 }
0x1814   : > { %vm3010_vm7 = vmor %vm3008_vm6, %vm3009_vm5  ;;  %vm6484_vm5 = vcmask 195584   ;;  %vm6485_vm6 = vcmask 326656  }
0x1815   : > { %v3005_v59 = vsub.f32 1.0, %v3004_v11 }
0x1817   : > { %v3006_v13 = vmul.f32 %v4989_v29, %v3005_v59 }
0x1819   : > { %v3007_v25 = vadd.f32 %v4989_v29, %v3006_v13 }
0x181b   : > { %v3011_v43 = vsel %vm3010_vm7, %v4989_v29, %v3007_v25  ;;  %v4670_v29 = vld [vmem:[%s6465_s24 + $0x48] sm:$0xff]  ;;  %vm6486_vm7 = vcmask 457728  }
0x181c   : > { %v3016_v9 = vsel %vm3013_vm4, %v3015_v10, %v3011_v43  ;;  %3178 = vmatpush.bf16.msrb.mxu0 %v4670_v29  ;;  %v4923_v43 = vld [vmem:[%s6409_s12 + $0x7] ss:$0 sm:$0xff]  ;;  %vm6487_vm4 = vmmov %vm6484_vm5 }
0x181d   : > { %v3017_v46 = vmul.f32 %v3016_v9, %v2992_v15 }
0x181f   : > { %v4441_v55 = vclamps-f32 %v3017_v46, 1.0 }
0x1820   : > { %3179 = vmatpush.bf16.msrb.mxu0 %v4669_v27 }
0x1821   : > { %v3020_v44 = vadd.f32 1.0, %v4441_v55  ;;  %v4924_v55 = vld [vmem:[%s6410_s13 + $0x7] ss:$0 sm:$0xff] }
0x1823   : > { %v3021_v52 = vmul.f32 %v3020_v44, %v2978_v56 }
0x1825   : > { %v3031_v60 = vpack.c.bf16 %v3021_v52, %v3021_v52 }
0x1827   : > { %4467 = vmatmul.msk.bf16.vlgmr.msrb.gmra.mxu3 %vm735_vm0, %v3031_v60  ;;  %v4925_v60 = vld [vmem:[%s6403_s6 + $0x4] ss:$0 sm:$0xff] }
0x18aa   : > { %v3073_v8 = vpop.f32.mrf.mxu3 }
0x18ab   : > { %v3074_v3 = vadd.f32 %v4920_v62, %v3073_v8 }
0x18ad   : > { %v3077_v1 = vadd.f32 %v3074_v3, %v6079_v63 }
0x18af   : > { %v3078_v49 = vsel %vm757_vm1, %v3077_v1, 0.0 }
0x18b0   : > { %3079 = vadd.xlane.f32.xlu1 %v3078_v49 }
0x18b2   : > { %v3075_v37 = vpop.f32.mrf.mxu3 }
0x1923   : > { %v3080_v45 = vpop.xlane.xlu1 %3079 }
0x1924   : > { %v3081_v5 = vmul.f32 %v3080_v45, %v5190_v24 }
0x1926   : > { %v3082_v12 = vsub.f32 %v3077_v1, %v3081_v5 }
0x1928   : > { %v3083_v53 = vmul.f32 %v3082_v12, %v3082_v12 }
0x192a   : > { %v3084_v31 = vsel %vm757_vm1, %v3083_v53, 0.0 }
0x192b   : > { %3085 = vadd.xlane.f32.xlu2 %v3084_v31 }
0x199e   : > { %v3086_v61 = vpop.xlane.xlu2 %3085 }
0x199f   : > { %v3087_v30 = vmul.f32 %v3086_v61, %v5190_v24 }
0x19a1   : > { %v3088_v22 = vadd.f32 1e-05, %v3087_v30 }
0x19a3   : > { %4990 = vrsqrt.f32 %v3088_v22  ;;  %vm3095_vm2 = vweird.f32 %v3088_v22 }
0x19a9   : > { %v4991_v6 = vpop.eup %4990 }
0x19aa   : > { %v3090_v47 = vmul.f32 %v4991_v6, %v3088_v22  ;;  %vm3096_vm15 = vweird.f32 %v4991_v6 }
0x19ab   : > { %vm3097_vm3 = vmor %vm3095_vm2, %vm3096_vm15 }
0x19ac   : > { %v3091_v63 = vmul.f32 %v4991_v6, %v3090_v47  ;;  %vm6488_vm15 = vmmov %vm6485_vm6 }
0x19ad   : > { %vm6489_vm2 = vmmov %vm6486_vm7 }
0x19ae   : > { %v3092_v35 = vmul.f32 0.5, %v3091_v63 }
0x19b0   : > { %v3093_v41 = vsub.f32 1.5, %v3092_v35 }
0x19b2   : > { %v3094_v16 = vmul.f32 %v4991_v6, %v3093_v41 }
0x19b4   : > { %v3098_v26 = vsel %vm3097_vm3, %v4991_v6, %v3094_v16 }
0x19b5   : > { %v3099_v51 = vmul.f32 %v3098_v26, %v3082_v12 }
0x19b7   : > { %v3105_v0 = vmul.f32 %v4921_v58, %v3099_v51 }
0x19b9   : > { %v6114_v39 = vadd.f32 %v4922_v34, %v3105_v0 }
0x19bb   : > { %v3112_v7 = vsel %vm757_vm1, %v6114_v39, 0.0 }
0x19bc   : > { %3113 = vadd.xlane.f32.xlu0 %v3112_v7 }
0x1a2f   : > { %v3114_v20 = vpop.xlane.xlu0 %3113 }
0x1a30   : > { %v3115_v36 = vmul.f32 %v3114_v20, %v5190_v24 }
0x1a32   : > { %v3116_v19 = vsub.f32 %v6114_v39, %v3115_v36 }
0x1a34   : > { %v3117_v28 = vmul.f32 %v3116_v19, %v3116_v19 }
0x1a36   : > { %v3118_v23 = vsel %vm757_vm1, %v3117_v28, 0.0 }
0x1a37   : > { %3119 = vadd.xlane.f32.xlu1 %v3118_v23 }
0x1aaa   : > { %v3120_v11 = vpop.xlane.xlu1 %3119 }
0x1aab   : > { %v3121_v59 = vmul.f32 %v3120_v11, %v5190_v24 }
0x1aad   : > { %v3122_v17 = vadd.f32 1e-05, %v3121_v59 }
0x1aaf   : > { %4992 = vrsqrt.f32 %v3122_v17  ;;  %vm3129_vm12 = vweird.f32 %v3122_v17 }
0x1ab5   : > { %v4993_v18 = vpop.eup %4992 }
0x1ab6   : > { %v3124_v13 = vmul.f32 %v4993_v18, %v3122_v17  ;;  %vm3130_vm11 = vweird.f32 %v4993_v18 }
0x1ab7   : > { %vm3131_vm13 = vmor %vm3129_vm12, %vm3130_vm11 }
0x1ab8   : > { %v3125_v4 = vmul.f32 %v4993_v18, %v3124_v13 }
0x1aba   : > { %v3126_v25 = vmul.f32 0.5, %v3125_v4 }
0x1abc   : > { %v3127_v10 = vsub.f32 1.5, %v3126_v25 }
0x1abe   : > { %v3128_v15 = vmul.f32 %v4993_v18, %v3127_v10 }
0x1ac0   : > { %v3132_v9 = vsel %vm3131_vm13, %v4993_v18, %v3128_v15 }
0x1ac1   : > { %v3133_v46 = vmul.f32 %v3132_v9, %v3116_v19 }
0x1ac3   : > { %v3139_v56 = vmul.f32 %v4923_v43, %v3133_v46 }
0x1ac5   : > { %v3145_v44 = vadd.f32 %v4924_v55, %v3139_v56 }
0x1ac7   : > { %v3153_v52 = vpack.c.bf16 %v3145_v44, %v3145_v44 }
0x1ac9   : > { %4485 = vmatmul.msk.bf16.vlgmr.msrb.gmra.mxu0 %vm757_vm1, %v3153_v52 }
0x1b46   : > { %v3181_v62 = vpop.f32.mrf.mxu0 }
0x1b47   : > { %v3182_v8 = vadd.f32 %v4925_v60, %v3181_v62 }
0x1b49   : > { %3187 = vrot.lane.b32.xlu0 %v3182_v8, %s6475_s1  ;;  %v6144_v41 = vpack.c.bf16 %v3182_v8, %v3182_v8 }
0x1b4b   : > { %v3343_v16 = vunpack.c.l.b16 %v6144_v41 }
0x1b4d   : > { %v3344_v58 = vpack.c.b16 %v3343_v16, %v3343_v16 }
0x1b4e   : > { %v3183_v3 = vpop.f32.mrf.mxu0 }
0x1b4f   : > { %v3346_v26 = vsel %vm2366_vm14, %v6144_v41, %v3344_v58 }
0x1b50   : > { %v3348_v51 = vunpack.c.l.bf16 %v3346_v26  ;;  %v3349_v34 = vunpack.c.h.bf16 %v3346_v26 }
0x1b52   : > { %v3354_v0 = vmul.f32 %v5794_v14, %v3348_v51  ;;  %v3355_v7 = vmul.f32 %v5792_v21, %v3349_v34  ;;  %v3350_v36 = vmul.f32 %v5827_v38, %v3348_v51  ;;  %v3351_v19 = vmul.f32 %v5825_v2, %v3349_v34 }
0x1b53   : > { %v3356_v23 = vmul.f32 %v5778_v42, %v3348_v51  ;;  %v3357_v29 = vmul.f32 %v5776_v33, %v3349_v34  ;;  %v3352_v11 = vmul.f32 %v5814_v57, %v3348_v51  ;;  %v3353_v59 = vmul.f32 %v5812_v32, %v3349_v34 }
0x1b54   : > { %v3360_v20 = vpack.c.bf16 %v3355_v7, %v3354_v0  ;;  %v3358_v28 = vpack.c.bf16 %v3351_v19, %v3350_v36 }
0x1b55   : > { %v3361_v27 = vpack.c.bf16 %v3357_v29, %v3356_v23  ;;  %v3359_v17 = vpack.c.bf16 %v3353_v59, %v3352_v11 }
0x1bbb   : > { %v3188_v1 = vpop.permute.xlu0 %3187 }
0x1bbc   : > { %3190 = vxpose.xlu1.b32.start.end [1/1] (short) (narrow) %v3188_v1, 32 }
0x1c60   : > { %v3206_v49 = vpop.trf.xlu1 }
0x1c61   : > { %v3222_v37 = vpack.c.bf16 %v3206_v49, %v3206_v49 }
0x1c63   : > { %v3230_v12 = vunpack.c.l.b16 %v3222_v37 }
0x1c68   : > { %v3207_v45 = vpop.trf.xlu1 }
0x1c69   : > { %v3223_v5 = vpack.c.bf16 %v3207_v45, %v3207_v45 }
0x1c6b   : > { %v3231_v53 = vunpack.c.l.b16 %v3223_v5 }
0x1c6d   : > { %v3234_v31 = vpack.c.b16 %v3231_v53, %v3230_v12 }
0x1c6f   : > { %3244 = vrot.lane.b32.xlu1 %v3234_v31, %s6480_s3  ;;  %3240 = vrot.lane.b32.xlu2 %v3234_v31, %s6476_s22 }
0x1c70   : > { %3236 = vrot.lane.b32.xlu0 %v3234_v31, %s6481_s23  ;;  %v3208_v61 = vpop.trf.xlu1 }
0x1c71   : > { %v3224_v30 = vpack.c.bf16 %v3208_v61, %v3208_v61 }
0x1c73   : > { %v3232_v47 = vunpack.c.l.b16 %v3224_v30 }
0x1c77   : > { %3252 = vrot.lane.b32.xlu2 %v3234_v31, %s6482_s27 }
0x1c78   : > { %3248 = vrot.lane.b32.xlu0 %v3234_v31, %s6468_s29  ;;  %v3209_v22 = vpop.trf.xlu1 }
0x1c79   : > { %v3225_v6 = vpack.c.bf16 %v3209_v22, %v3209_v22 }
0x1c7b   : > { %v3233_v63 = vunpack.c.l.b16 %v3225_v6 }
0x1c7d   : > { %v3235_v35 = vpack.c.b16 %v3233_v63, %v3232_v47 }
0x1c7f   : > { %3246 = vrot.lane.b32.xlu2 %v3235_v35, %s6480_s3 }
0x1c80   : > { %3238 = vrot.lane.b32.xlu0 %v3235_v35, %s6481_s23 }
0x1c87   : > { %3262 = vrot.lane.b32.xlu2 %v3235_v35, %s6483_s0 }
0x1c88   : > { %3242 = vrot.lane.b32.xlu0 %v3235_v35, %s6476_s22 }
0x1c8f   : > { %3260 = vrot.lane.b32.xlu2 %v3234_v31, %s6483_s0 }
0x1c90   : > { %3250 = vrot.lane.b32.xlu0 %v3235_v35, %s6468_s29 }
0x1c97   : > { %3371 = vrot.lane.b32.xlu2 %v3360_v20, %s6477_s28 }
0x1c98   : > { %3254 = vrot.lane.b32.xlu0 %v3235_v35, %s6482_s27 }
0x1c9f   : > { %3367 = vrot.lane.b32.xlu2 %v3358_v28, %s6477_s28 }
0x1ca0   : > { %3258 = vrot.lane.b32.xlu0 %v3235_v35, %s6469_s4 }
0x1ca8   : > { %3256 = vrot.lane.b32.xlu0 %v3234_v31, %s6469_s4 }
0x1cb0   : > { %3373 = vrot.lane.b32.xlu0 %v3361_v27, %s6477_s28 }
0x1cb8   : > { %3369 = vrot.lane.b32.xlu0 %v3359_v17, %s6477_s28 }
0x1cc9   : > { %v3241_v4 = vpop.permute.xlu2 %3240 }
0x1cd1   : > { %v3253_v15 = vpop.permute.xlu2 %3252 }
0x1cd9   : > { %v3247_v9 = vpop.permute.xlu2 %3246 }
0x1ce1   : > { %v3263_v52 = vpop.permute.xlu2 %3262  ;;  %v3245_v45 = vpop.permute.xlu1 %3244 }
0x1ce2   : > { %v3237_v18 = vpop.permute.xlu0 %3236 }
0x1ce3   : > { %v3266_v44 = vsel %vm2218_vm8, %v3234_v31, %v3237_v18 }
0x1ce4   : > { %v3271_v1 = vsel %vm944_vm9, %v3266_v44, %v3241_v4 }
0x1ce5   : > { %v3275_v53 = vsel %vm6487_vm4, %v3271_v1, %v3245_v45 }
0x1ce9   : > { %v3261_v6 = vpop.permute.xlu2 %3260 }
0x1cea   : > { %v3249_v13 = vpop.permute.xlu0 %3248 }
0x1ceb   : > { %v3279_v31 = vsel %vm757_vm1, %v3275_v53, %v3249_v13 }
0x1cec   : > { %v3283_v63 = vsel %vm6488_vm15, %v3279_v31, %v3253_v15 }
0x1cf1   : > { %v3372_v20 = vpop.permute.xlu2 %3371 }
0x1cf2   : > { %v3239_v25 = vpop.permute.xlu0 %3238 }
0x1cf3   : > { %v3269_v55 = vsel %vm2218_vm8, %v3235_v35, %v3239_v25 }
0x1cf9   : > { %v3368_v19 = vpop.permute.xlu2 %3367 }
0x1cfa   : > { %v3243_v10 = vpop.permute.xlu0 %3242 }
0x1cfb   : > { %v3273_v56 = vsel %vm944_vm9, %v3269_v55, %v3243_v10 }
0x1cfc   : > { %v3277_v60 = vsel %vm6484_vm5, %v3273_v56, %v3247_v9 }
0x1d02   : > { %v3251_v43 = vpop.permute.xlu0 %3250 }
0x1d03   : > { %v3281_v62 = vsel %vm757_vm1, %v3277_v60, %v3251_v43 }
0x1d0a   : > { %v3255_v46 = vpop.permute.xlu0 %3254 }
0x1d0b   : > { %v3285_v8 = vsel %vm6485_vm6, %v3281_v62, %v3255_v46 }
0x1d12   : > { %v3259_v3 = vpop.permute.xlu0 %3258 }
0x1d13   : > { %v3289_v49 = vsel %vm955_vm10, %v3285_v8, %v3259_v3  ;;  %v4671_v3 = vld [vmem:[%s6404_s7 + $0x40] sm:$0xff] }
0x1d14   : > { %v3294_v37 = vsel %vm6486_vm7, %v3289_v49, %v3263_v52 }
0x1d15   : > { %v3298_v5 = vunpack.c.l.bf16 %v3294_v37  ;;  %v3299_v12 = vunpack.c.h.bf16 %v3294_v37 }
0x1d17   : > { %v3302_v61 = vmul.f32 %v5796_v48, %v3298_v5  ;;  %v3303_v30 = vmul.f32 %v5798_v40, %v3299_v12 }
0x1d19   : > { %v3305_v22 = vpack.c.bf16 %v3303_v30, %v3302_v61 }
0x1d1a   : > { %v3257_v47 = vpop.permute.xlu0 %3256 }
0x1d1b   : > { %v3287_v35 = vsel %vm955_vm10, %v3283_v63, %v3257_v47  ;;  %3315 = vmatpush.bf16.msra.mxu2 %v3305_v22  ;;  %v4674_v47 = vld [vmem:[%s6405_s8 + $0x38] sm:$0xff] }
0x1d1c   : > { %v3291_v16 = vsel %vm6489_vm2, %v3287_v35, %v3261_v6  ;;  %3496 = vmatpush.bf16.msrb.mxu1 %v4674_v47 }
0x1d1d   : > { %v3296_v58 = vunpack.c.l.bf16 %v3291_v16  ;;  %v3297_v26 = vunpack.c.h.bf16 %v3291_v16 }
0x1d1f   : > { %v3300_v51 = vmul.f32 %v5830_v54, %v3296_v58  ;;  %v3301_v34 = vmul.f32 %v5832_v50, %v3297_v26 }
0x1d21   : > { %v3304_v0 = vpack.c.bf16 %v3301_v34, %v3300_v51 }
0x1d22   : > { %v3374_v7 = vpop.permute.xlu0 %3373 }
0x1d23   : > { %3316 = vmatpush.bf16.msra.mxu2 %v3304_v0  ;;  %3386 = vmatpush.bf16.msra.mxu3 %v3374_v7 }
0x1d26   : > { %4486 = vmatmul.msk.bf16.vlgmr.msra.gmra.mxu2 %vm757_vm1, %v6144_v41  ;;  %v4672_v41 = vld [vmem:[%s6404_s7 + $0x48] sm:$0xff] }
0x1d27   : > { %3387 = vmatpush.bf16.msra.mxu3 %v3372_v20  ;;  %3422 = vmatpush.bf16.msra.mxu0 %v4672_v41  ;;  %v4926_v20 = vld [vmem:[%s6409_s12 + $0x8] ss:$0 sm:$0xff] }
0x1d2a   : > { %v3370_v36 = vpop.permute.xlu0 %3369 }
0x1d2b   : > { %3388 = vmatpush.bf16.msra.mxu3 %v3370_v36  ;;  %3423 = vmatpush.bf16.msra.mxu0 %v4671_v3 }
0x1d2f   : > { %3389 = vmatpush.bf16.msra.mxu3 %v3368_v19 }
0x1da9   : > { %v3318_v28 = vpop.f32.mrf.mxu2 }
0x1daa   : > { %v3322_v23 = vmul.f32 0.5, %v3318_v28  ;;  %v4927_v28 = vld [vmem:[%s6410_s13 + $0x8] ss:$0 sm:$0xff] }
0x1dac   : > { %v3323_v29 = vsel %vm735_vm0, %v3322_v23, -inf }
0x1dad   : > { %v3324_v27 = vrot.slane %v3323_v29, 4 }
0x1daf   : > { %v3325_v11 = vmax.f32 %v3323_v29, %v3324_v27 }
0x1db1   : > { %v3326_v59 = vrot.slane %v3325_v11, 2  ;;  %v3320_v17 = vpop.f32.mrf.mxu2 }
0x1db3   : > { %v3327_v18 = vmax.f32 %v3325_v11, %v3326_v59  ;;  %v4928_v11 = vld [vmem:[%s6406_s9 + $0x3] ss:$0 sm:$0xff] }
0x1db5   : > { %v3328_v13 = vrot.slane %v3327_v18, 1 }
0x1db7   : > { %v3329_v4 = vmax.f32 %v3327_v18, %v3328_v13 }
0x1db9   : > { %v3330_v25 = vsub.f32 %v3322_v23, %v3329_v4 }
0x1dbb   : > { %v3331_v10 = vmul.f32 1.442695, %v3330_v25 }
0x1dbd   : > { %4994 = vpow2.f32 %v3331_v10 }
0x1dc3   : > { %v4995_v15 = vpop.eup %4994 }
0x1dc4   : > { %v3333_v43 = vsel %vm735_vm0, %v4995_v15, 0.0 }
0x1dc5   : > { %v3334_v9 = vrot.slane %v3333_v43, 4 }
0x1dc7   : > { %v3335_v46 = vadd.f32 %v3334_v9, %v3333_v43 }
0x1dc9   : > { %v3336_v55 = vrot.slane %v3335_v46, 2 }
0x1dcb   : > { %v3337_v56 = vadd.f32 %v3336_v55, %v3335_v46 }
0x1dcd   : > { %v3338_v44 = vrot.slane %v3337_v56, 1 }
0x1dcf   : > { %v3339_v52 = vadd.f32 %v3338_v44, %v3337_v56  ;;  %v4677_v56 = vld [vmem:[%s6407_s10 + $0x70] sm:$0xff] }
0x1dd1   : > { %4996 = vrcp.f32 %v3339_v52 }
0x1dd7   : > { %v4997_v60 = vpop.eup %4996 }
0x1dd8   : > { %v3341_v62 = vmul.f32 %v4997_v60, %v4995_v15  ;;  %v4678_v15 = vld [vmem:[%s6407_s10 + $0x78] sm:$0xff] }
0x1dd9   : > { %3593 = vmatpush.bf16.msrb.mxu2 %v4678_v15  ;;  %v4680_v15 = vld [vmem:[%s6465_s24 + $0x58] sm:$0xff] }
0x1dda   : > { %v3362_v8 = vpack.c.bf16 %v3341_v62, %v3341_v62  ;;  %v4676_v62 = vld [vmem:[%s6407_s10 + $0x68] sm:$0xff]  ;;  %3669 = vmatpush.bf16.msrb.mxu3 %v4680_v15 }
0x1ddc   : > { %4487 = vmatmul.msk.bf16.vlgmr.msra.gmra.mxu3 %vm735_vm0, %v3362_v8 }
0x1ddd   : > { %3594 = vmatpush.bf16.msrb.mxu2 %v4677_v56 }
0x1de1   : > { %3595 = vmatpush.bf16.msrb.mxu2 %v4676_v62 }
0x1e5f   : > { %v3391_v1 = vpop.f32.mrf.mxu3 }
0x1e60   : > { %v3400_v49 = vpack.c.bf16 %v3391_v1, %v3391_v1 }
0x1e62   : > { %4500 = vmatmul.msk.bf16.vlgmr.msra.gmra.mxu0 %vm757_vm1, %v3400_v49  ;;  %v4675_v49 = vld [vmem:[%s6407_s10 + $0x60] sm:$0xff] }
0x1e63   : > { %3596 = vmatpush.bf16.msrb.mxu2 %v4675_v49  ;;  %v4931_v49 = vld [vmem:[%s6410_s13 + $0x9] ss:$0 sm:$0xff] }
0x1e67   : > { %v3393_v37 = vpop.f32.mrf.mxu3 }
0x1edf   : > { %v3425_v45 = vpop.f32.mrf.mxu0 }
0x1ee0   : > { %v6201_v5 = vadd.f32 %v3425_v45, %v6114_v39  ;;  %v4673_v39 = vld [vmem:[%s6405_s8 + $0x30] sm:$0xff] }
0x1ee1   : > { %3497 = vmatpush.bf16.msrb.mxu1 %v4673_v39 }
0x1ee2   : > { %v3430_v12 = vsel %vm757_vm1, %v6201_v5, 0.0 }
0x1ee3   : > { %3431 = vadd.xlane.f32.xlu0 %v3430_v12 }
0x1ee7   : > { %v3427_v53 = vpop.f32.mrf.mxu0 }
0x1f56   : > { %v3432_v31 = vpop.xlane.xlu0 %3431 }
0x1f57   : > { %v3433_v61 = vmul.f32 %v3432_v31, %v5190_v24 }
0x1f59   : > { %v3434_v30 = vsub.f32 %v6201_v5, %v3433_v61 }
0x1f5b   : > { %v3435_v22 = vmul.f32 %v3434_v30, %v3434_v30 }
0x1f5d   : > { %v3436_v6 = vsel %vm757_vm1, %v3435_v22, 0.0 }
0x1f5e   : > { %3437 = vadd.xlane.f32.xlu2 %v3436_v6 }
0x1fd1   : > { %v3438_v63 = vpop.xlane.xlu2 %3437 }
0x1fd2   : > { %v3439_v35 = vmul.f32 %v3438_v63, %v5190_v24 }
0x1fd4   : > { %v3440_v16 = vadd.f32 1e-05, %v3439_v35 }
0x1fd6   : > { %4998 = vrsqrt.f32 %v3440_v16  ;;  %vm3447_vm11 = vweird.f32 %v3440_v16 }
0x1fdc   : > { %v4999_v58 = vpop.eup %4998 }
0x1fdd   : > { %v3442_v26 = vmul.f32 %v4999_v58, %v3440_v16  ;;  %vm3448_vm3 = vweird.f32 %v4999_v58 }
0x1fde   : > { %vm3449_vm12 = vmor %vm3447_vm11, %vm3448_vm3  ;;  %vm6491_vm3 = vcmask 326656   ;;  %vm6492_vm11 = vcmask 457728  }
0x1fdf   : > { %v3443_v51 = vmul.f32 %v4999_v58, %v3442_v26 }
0x1fe1   : > { %v3444_v34 = vmul.f32 0.5, %v3443_v51 }
0x1fe3   : > { %v3445_v0 = vsub.f32 1.5, %v3444_v34 }
0x1fe5   : > { %v3446_v7 = vmul.f32 %v4999_v58, %v3445_v0 }
0x1fe7   : > { %v3450_v36 = vsel %vm3449_vm12, %v4999_v58, %v3446_v7 }
0x1fe8   : > { %v3451_v19 = vmul.f32 %v3450_v36, %v3434_v30 }
0x1fea   : > { %v3457_v23 = vmul.f32 %v4926_v20, %v3451_v19 }
0x1fec   : > { %v3463_v29 = vadd.f32 %v4927_v28, %v3457_v23 }
0x1fee   : > { %v3469_v27 = vpack.c.bf16 %v3463_v29, %v3463_v29  ;;  %v4929_v29 = vld [vmem:[%s6408_s11 + $0x3] ss:$0 sm:$0xff] }
0x1ff0   : > { %4516 = vmatmul.msk.bf16.vlgmr.msrb.gmra.mxu1 %vm757_vm1, %v3469_v27 }
0x206d   : > { %v3499_v59 = vpop.f32.mrf.mxu1 }
0x206e   : > { %v3500_v17 = vadd.f32 %v4928_v11, %v3499_v59 }
0x2070   : > { %v3504_v18 = vmul.f32 0.70710677, %v3500_v17  ;;  %v3503_v36 = vmul.f32 0.5, %v3500_v17 }
0x2072   : > { %v3505_v13 = vmul.f32 %v3504_v18, %v3504_v18 }
0x2074   : > { %v3506_v4 = vmin.f32 %v3505_v13, 16.0 }
0x2075   : > { %v3501_v25 = vpop.f32.mrf.mxu1 }
0x2076   : > { %v3507_v10 = vmul.f32 2.1237322e-06, %v3506_v4  ;;  %v3518_v41 = vmul.f32 3.8918573e-05, %v3506_v4 }
0x2078   : > { %v3508_v43 = vadd.f32 0.00028619796, %v3507_v10  ;;  %v3519_v9 = vadd.f32 0.001143296, %v3518_v41 }
0x207a   : > { %v3509_v46 = vmul.f32 %v3508_v43, %v3506_v4  ;;  %v3520_v55 = vmul.f32 %v3519_v9, %v3506_v4 }
0x207c   : > { %v3521_v44 = vadd.f32 0.014752088, %v3520_v55  ;;  %v3510_v52 = vadd.f32 0.0036580483, %v3509_v46 }
0x207e   : > { %v3522_v60 = vmul.f32 %v3521_v44, %v3506_v4  ;;  %v3511_v3 = vmul.f32 %v3510_v52, %v3506_v4 }
0x2080   : > { %v3523_v8 = vadd.f32 0.112945676, %v3522_v60  ;;  %v3512_v45 = vadd.f32 0.05243302, %v3511_v3 }
0x2082   : > { %v3524_v1 = vmul.f32 %v3523_v8, %v3506_v4  ;;  %v3513_v31 = vmul.f32 %v3512_v45, %v3506_v4  ;;  %v4930_v8 = vld [vmem:[%s6409_s12 + $0x9] ss:$0 sm:$0xff] }
0x2084   : > { %v3525_v37 = vadd.f32 0.4994258, %v3524_v1  ;;  %v3514_v61 = vadd.f32 0.18741608, %v3513_v31 }
0x2086   : > { %v3526_v12 = vmul.f32 %v3525_v37, %v3506_v4  ;;  %v3515_v22 = vmul.f32 %v3514_v61, %v3506_v4 }
0x2088   : > { %v3527_v53 = vadd.f32 1.0, %v3526_v12  ;;  %v3516_v63 = vadd.f32 1.1283791, %v3515_v22 }
0x208a   : > { %5000 = vrcp.f32 %v3527_v53  ;;  %v3539_v39 = vand.u32 2147483648, %v3527_v53  ;;  %v3537_v16 = vand.u32 2147483647, %v3527_v53  ;;  %vm3533_vm5 = vweird.f32 %v3527_v53 }
0x208b   : > { %v3517_v51 = vmul.f32 %v3516_v63, %v3504_v18 }
0x208c   : > { %v3540_v26 = vor.u32 1.1754944e-38, %v3539_v39  ;;  %vm3538_vm7 = vcmp.eq.f32.partialorder %v3537_v16, 8.507059e+37 }
0x2090   : > { %v5001_v30 = vpop.eup %5000 }
0x2091   : > { %v3529_v6 = vmul.f32 %v5001_v30, %v3527_v53  ;;  %vm3534_vm13 = vweird.f32 %v5001_v30  ;;  %v4932_v53 = vld [vmem:[%s6403_s6 + $0x5] ss:$0 sm:$0xff] }
0x2092   : > { %vm3535_vm6 = vmor %vm3533_vm5, %vm3534_vm13 }
0x2093   : > { %v3530_v47 = vsub.f32 1.0, %v3529_v6  ;;  %vm6494_vm13 = vmmov %vm6491_vm3 }
0x2094   : > { %vm6495_vm5 = vmmov %vm6492_vm11 }
0x2095   : > { %v3531_v35 = vmul.f32 %v5001_v30, %v3530_v47 }
0x2097   : > { %v3532_v58 = vadd.f32 %v5001_v30, %v3531_v35 }
0x2099   : > { %v3536_v34 = vsel %vm3535_vm6, %v5001_v30, %v3532_v58 }
0x209a   : > { %v3541_v0 = vsel %vm3538_vm7, %v3540_v26, %v3536_v34 }
0x209b   : > { %v3542_v7 = vmul.f32 %v3541_v0, %v3517_v51 }
0x209d   : > { %v4517_v20 = vclamps-f32 %v3542_v7, 1.0 }
0x209f   : > { %v3545_v19 = vadd.f32 1.0, %v4517_v20 }
0x20a1   : > { %v3546_v28 = vmul.f32 %v3545_v19, %v3503_v36 }
0x20a3   : > { %v3556_v23 = vpack.c.bf16 %v3546_v28, %v3546_v28 }
0x20a5   : > { %4543 = vmatmul.msk.bf16.vlgmr.msrb.gmra.mxu2 %vm735_vm0, %v3556_v23 }
0x2128   : > { %v3598_v27 = vpop.f32.mrf.mxu2 }
0x2129   : > { %v3599_v11 = vadd.f32 %v4929_v29, %v3598_v27 }
0x212b   : > { %v6242_v59 = vadd.f32 %v3599_v11, %v6201_v5  ;;  %v4679_v5 = vld [vmem:[%s6465_s24 + $0x50] sm:$0xff] }
0x212c   : > { %3670 = vmatpush.bf16.msrb.mxu3 %v4679_v5 }
0x212d   : > { %v3603_v18 = vsel %vm757_vm1, %v6242_v59, 0.0 }
0x212e   : > { %3604 = vadd.xlane.f32.xlu0 %v3603_v18 }
0x2130   : > { %v3600_v13 = vpop.f32.mrf.mxu2 }
0x21a1   : > { %v3605_v17 = vpop.xlane.xlu0 %3604 }
0x21a2   : > { %v3606_v4 = vmul.f32 %v3605_v17, %v5190_v24 }
0x21a4   : > { %v3607_v25 = vsub.f32 %v6242_v59, %v3606_v4 }
0x21a6   : > { %v3608_v10 = vmul.f32 %v3607_v25, %v3607_v25 }
0x21a8   : > { %v3609_v41 = vsel %vm757_vm1, %v3608_v10, 0.0 }
0x21a9   : > { %3610 = vadd.xlane.f32.xlu2 %v3609_v41 }
0x221c   : > { %v3611_v43 = vpop.xlane.xlu2 %3610 }
0x221d   : > { %v3612_v9 = vmul.f32 %v3611_v43, %v5190_v24 }
0x221f   : > { %v3613_v46 = vadd.f32 1e-05, %v3612_v9 }
0x2221   : > { %5002 = vrsqrt.f32 %v3613_v46  ;;  %vm3620_vm15 = vweird.f32 %v3613_v46 }
0x2227   : > { %v5003_v55 = vpop.eup %5002 }
0x2228   : > { %v3615_v56 = vmul.f32 %v5003_v55, %v3613_v46  ;;  %vm3621_vm4 = vweird.f32 %v5003_v55 }
0x2229   : > { %vm3622_vm2 = vmor %vm3620_vm15, %vm3621_vm4 }
0x222a   : > { %v3616_v44 = vmul.f32 %v5003_v55, %v3615_v56 }
0x222c   : > { %v3617_v52 = vmul.f32 0.5, %v3616_v44 }
0x222e   : > { %v3618_v60 = vsub.f32 1.5, %v3617_v52 }
0x2230   : > { %v3619_v62 = vmul.f32 %v5003_v55, %v3618_v60 }
0x2232   : > { %v3623_v3 = vsel %vm3622_vm2, %v5003_v55, %v3619_v62 }
0x2233   : > { %v3624_v1 = vmul.f32 %v3623_v3, %v3607_v25 }
0x2235   : > { %v3630_v37 = vmul.f32 %v4930_v8, %v3624_v1 }
0x2237   : > { %v3636_v45 = vadd.f32 %v4931_v49, %v3630_v37 }
0x2239   : > { %v3644_v12 = vpack.c.bf16 %v3636_v45, %v3636_v45 }
0x223b   : > { %4559 = vmatmul.msk.bf16.vlgmr.msrb.gmra.mxu3 %vm757_vm1, %v3644_v12 }
0x22be   : > { %v3672_v31 = vpop.f32.mrf.mxu3 }
0x22bf   : > { %v3673_v61 = vadd.f32 %v4932_v53, %v3672_v31 }
0x22c1   : > { %3678 = vrot.lane.b32.xlu0 %v3673_v61, %s6475_s1  ;;  %v6278_v19 = vpack.c.bf16 %v3673_v61, %v3673_v61 }
0x22c3   : > { %v3834_v28 = vunpack.c.l.b16 %v6278_v19 }
0x22c5   : > { %v3835_v23 = vpack.c.b16 %v3834_v28, %v3834_v28 }
0x22c6   : > { %v3674_v30 = vpop.f32.mrf.mxu3 }
0x22c7   : > { %v3837_v29 = vsel %vm2366_vm14, %v6278_v19, %v3835_v23  ;;  %vm6490_vm14 = vcmask 195584  }
0x22c8   : > { %v3839_v27 = vunpack.c.l.bf16 %v3837_v29  ;;  %v3840_v11 = vunpack.c.h.bf16 %v3837_v29  ;;  %vm6493_vm12 = vmmov %vm6490_vm14 }
0x22ca   : > { %v3845_v18 = vmul.f32 %v5794_v14, %v3839_v27  ;;  %v3846_v13 = vmul.f32 %v5792_v21, %v3840_v11  ;;  %v3847_v4 = vmul.f32 %v5778_v42, %v3839_v27  ;;  %v3848_v25 = vmul.f32 %v5776_v33, %v3840_v11 }
0x22cb   : > { %v3841_v10 = vmul.f32 %v5827_v38, %v3839_v27  ;;  %v3842_v41 = vmul.f32 %v5825_v2, %v3840_v11  ;;  %v3843_v21 = vmul.f32 %v5814_v57, %v3839_v27  ;;  %v3844_v14 = vmul.f32 %v5812_v32, %v3840_v11 }
0x22cc   : > { %v3851_v17 = vpack.c.bf16 %v3846_v13, %v3845_v18  ;;  %v3852_v15 = vpack.c.bf16 %v3848_v25, %v3847_v4 }
0x22cd   : > { %v3849_v5 = vpack.c.bf16 %v3842_v41, %v3841_v10  ;;  %v3850_v43 = vpack.c.bf16 %v3844_v14, %v3843_v21 }
0x2333   : > { %v3679_v22 = vpop.permute.xlu0 %3678 }
0x2334   : > { %3681 = vxpose.xlu2.b32.start.end [1/1] (short) (narrow) %v3679_v22, 32 }
0x23cd   : > { %v3697_v6 = vpop.trf.xlu2 }
0x23ce   : > { %v3713_v47 = vpack.c.bf16 %v3697_v6, %v3697_v6 }
0x23d0   : > { %v3721_v35 = vunpack.c.l.b16 %v3713_v47 }
0x23d5   : > { %v3698_v39 = vpop.trf.xlu2 }
0x23d6   : > { %v3714_v63 = vpack.c.bf16 %v3698_v39, %v3698_v39 }
0x23d8   : > { %v3722_v16 = vunpack.c.l.b16 %v3714_v63 }
0x23da   : > { %v6267_v58 = vpack.c.b16 %v3722_v16, %v3721_v35 }
0x23dc   : > { %3727 = vrot.lane.b32.xlu0 %v6267_v58, %s6481_s23 }
0x23dd   : > { %v3699_v26 = vpop.trf.xlu2 }
0x23de   : > { %v3715_v51 = vpack.c.bf16 %v3699_v26, %v3699_v26 }
0x23e0   : > { %v3723_v7 = vunpack.c.l.b16 %v3715_v51 }
0x23e4   : > { %3731 = vrot.lane.b32.xlu0 %v6267_v58, %s6476_s22 }
0x23e5   : > { %v3700_v34 = vpop.trf.xlu2 }
0x23e6   : > { %v3716_v0 = vpack.c.bf16 %v3700_v34, %v3700_v34 }
0x23e8   : > { %v3724_v20 = vunpack.c.l.b16 %v3716_v0 }
0x23ea   : > { %v3726_v36 = vpack.c.b16 %v3724_v20, %v3723_v7 }
0x23ec   : > { %3749 = vrot.lane.b32.xlu2 %v3726_v36, %s6469_s4  ;;  %3733 = vrot.lane.b32.xlu1 %v3726_v36, %s6476_s22 }
0x23ed   : > { %3729 = vrot.lane.b32.xlu0 %v3726_v36, %s6481_s23 }
0x23f4   : > { %3741 = vrot.lane.b32.xlu1 %v3726_v36, %s6468_s29 }
0x23f5   : > { %3737 = vrot.lane.b32.xlu0 %v3726_v36, %s6480_s3 }
0x23fc   : > { %3745 = vrot.lane.b32.xlu1 %v3726_v36, %s6482_s27 }
0x23fd   : > { %3743 = vrot.lane.b32.xlu0 %v6267_v58, %s6482_s27 }
0x2404   : > { %3735 = vrot.lane.b32.xlu1 %v6267_v58, %s6480_s3 }
0x2405   : > { %3753 = vrot.lane.b32.xlu0 %v3726_v36, %s6483_s0 }
0x240c   : > { %3739 = vrot.lane.b32.xlu1 %v6267_v58, %s6468_s29  ;;  %s4214_s29 = sshll.u32 %s6497_s25, 3 }
0x240d   : > { %3751 = vrot.lane.b32.xlu0 %v6267_v58, %s6483_s0  ;;  %s654_s22 = scalar_lea.vmem %s6418_s21, %s4214_s29 }
0x2414   : > { %3747 = vrot.lane.b32.xlu1 %v6267_v58, %s6469_s4 }
0x2415   : > { %3862 = vrot.lane.b32.xlu0 %v3851_v17, %s6477_s28 }
0x241c   : > { %3864 = vrot.lane.b32.xlu1 %v3852_v15, %s6477_s28 }
0x241d   : > { %3858 = vrot.lane.b32.xlu0 %v3849_v5, %s6477_s28 }
0x2424   : > { %3860 = vrot.lane.b32.xlu1 %v3850_v43, %s6477_s28 }
0x2446   : > { %v3750_v62 = vpop.permute.xlu2 %3749 }
0x244e   : > { %v3728_v42 = vpop.permute.xlu0 %3727 }
0x244f   : > { %v3757_v30 = vsel %vm2218_vm8, %v6267_v58, %v3728_v42 }
0x2456   : > { %v3732_v9 = vpop.permute.xlu0 %3731 }
0x2457   : > { %v3762_v22 = vsel %vm944_vm9, %v3757_v30, %v3732_v9 }
0x245e   : > { %v3734_v33 = vpop.permute.xlu1 %3733 }
0x245f   : > { %v3730_v46 = vpop.permute.xlu0 %3729 }
0x2460   : > { %v3760_v2 = vsel %vm2218_vm8, %v3726_v36, %v3730_v46 }
0x2461   : > { %v3764_v44 = vsel %vm944_vm9, %v3760_v2, %v3734_v33 }
0x2466   : > { %v3742_v38 = vpop.permute.xlu1 %3741 }
0x2467   : > { %v3738_v55 = vpop.permute.xlu0 %3737 }
0x2468   : > { %v3768_v60 = vsel %vm6490_vm14, %v3764_v44, %v3738_v55  ;;  %vm4150_vm14 = vcmask 15360  }
0x2469   : > { %v3772_v57 = vsel %vm757_vm1, %v3768_v60, %v3742_v38  ;;  %v4681_v38 = vld [vmem:[%s6404_s7 + $0x50] sm:$0xff] }
0x246e   : > { %v3746_v56 = vpop.permute.xlu1 %3745 }
0x246f   : > { %v3744_v52 = vpop.permute.xlu0 %3743  ;;  %v3776_v32 = vsel %vm6491_vm3, %v3772_v57, %v3746_v56 }
0x2470   : > { %v3780_v3 = vsel %vm955_vm10, %v3776_v32, %v3750_v62 }
0x2476   : > { %v3736_v8 = vpop.permute.xlu1 %3735 }
0x2477   : > { %v3754_v1 = vpop.permute.xlu0 %3753  ;;  %v3766_v6 = vsel %vm6493_vm12, %v3762_v22, %v3736_v8 }
0x2478   : > { %v3785_v49 = vsel %vm6492_vm11, %v3780_v3, %v3754_v1  ;;  %vm4152_vm11 = vcmask 48128  }
0x2479   : > { %v3789_v37 = vunpack.c.l.bf16 %v3785_v49  ;;  %v3790_v45 = vunpack.c.h.bf16 %v3785_v49  ;;  %v4684_v49 = vld [vmem:[%s6405_s8 + $0x48] sm:$0xff] }
0x247a   : > { %3987 = vmatpush.bf16.msra.mxu3 %v4684_v49 }
0x247b   : > { %v3793_v12 = vmul.f32 %v5796_v48, %v3789_v37  ;;  %v3794_v53 = vmul.f32 %v5798_v40, %v3790_v45 }
0x247d   : > { %v3796_v31 = vpack.c.bf16 %v3794_v53, %v3793_v12 }
0x247e   : > { %v3740_v61 = vpop.permute.xlu1 %3739 }
0x247f   : > { %3806 = vmatpush.bf16.msrb.mxu0 %v3796_v31  ;;  %v3770_v47 = vsel %vm757_vm1, %v3766_v6, %v3740_v61  ;;  %v3752_v39 = vpop.permute.xlu0 %3751 }
0x2480   : > { %v3774_v35 = vsel %vm6494_vm13, %v3770_v47, %v3744_v52  ;;  %v4933_v47 = vld [vmem:[%s6409_s12 + $0xa] ss:$0 sm:$0xff] }
0x2486   : > { %v3748_v63 = vpop.permute.xlu1 %3747 }
0x2487   : > { %v3778_v48 = vsel %vm955_vm10, %v3774_v35, %v3748_v63  ;;  %v3863_v7 = vpop.permute.xlu0 %3862 }
0x2488   : > { %v3782_v40 = vsel %vm6495_vm5, %v3778_v48, %v3752_v39 }
0x2489   : > { %v3787_v16 = vunpack.c.l.bf16 %v3782_v40  ;;  %v3788_v26 = vunpack.c.h.bf16 %v3782_v40 }
0x248b   : > { %v3791_v51 = vmul.f32 %v5830_v54, %v3787_v16  ;;  %v3792_v58 = vmul.f32 %v5832_v50, %v3788_v26  ;;  %v4935_v16 = vld [vmem:[%s6406_s9 + $0x4] ss:$0 sm:$0xff] }
0x248d   : > { %v3795_v34 = vpack.c.bf16 %v3792_v58, %v3791_v51 }
0x248e   : > { %v3865_v0 = vpop.permute.xlu1 %3864 }
0x248f   : > { %3807 = vmatpush.bf16.msrb.mxu0 %v3795_v34  ;;  %3877 = vmatpush.bf16.msra.mxu1 %v3865_v0  ;;  %v3859_v36 = vpop.permute.xlu0 %3858 }
0x2492   : > { %4560 = vmatmul.msk.bf16.vlgmr.msrb.gmra.mxu0 %vm757_vm1, %v6278_v19  ;;  %v4682_v19 = vld [vmem:[%s6404_s7 + $0x58] sm:$0xff] }
0x2493   : > { %3878 = vmatpush.bf16.msra.mxu1 %v3863_v7  ;;  %3913 = vmatpush.bf16.msra.mxu2 %v4682_v19 }
0x2496   : > { %v3861_v20 = vpop.permute.xlu1 %3860 }
0x2497   : > { %3879 = vmatpush.bf16.msra.mxu1 %v3861_v20  ;;  %3914 = vmatpush.bf16.msra.mxu2 %v4681_v38 }
0x249b   : > { %3880 = vmatpush.bf16.msra.mxu1 %v3859_v36 }
0x250f   : > { %v3809_v28 = vpop.f32.mrf.mxu0 }
0x2510   : > { %v3813_v23 = vmul.f32 0.5, %v3809_v28  ;;  %v4688_v28 = vld [vmem:[%s6407_s10 + $0x98] sm:$0xff] }
0x2511   : > { %4084 = vmatpush.bf16.msra.mxu0 %v4688_v28 }
0x2512   : > { %v3814_v29 = vsel %vm735_vm0, %v3813_v23, -inf }
0x2513   : > { %v3815_v54 = vrot.slane %v3814_v29, 4 }
0x2515   : > { %v3816_v27 = vmax.f32 %v3814_v29, %v3815_v54 }
0x2517   : > { %v3817_v50 = vrot.slane %v3816_v27, 2  ;;  %v3811_v11 = vpop.f32.mrf.mxu0 }
0x2519   : > { %v3818_v18 = vmax.f32 %v3816_v27, %v3817_v50  ;;  %v4687_v50 = vld [vmem:[%s6407_s10 + $0x90] sm:$0xff] }
0x251a   : > { %4085 = vmatpush.bf16.msra.mxu0 %v4687_v50 }
0x251b   : > { %v3819_v13 = vrot.slane %v3818_v18, 1 }
0x251d   : > { %v3820_v17 = vmax.f32 %v3818_v18, %v3819_v13 }
0x251f   : > { %v3821_v4 = vsub.f32 %v3813_v23, %v3820_v17  ;;  %v4686_v17 = vld [vmem:[%s6407_s10 + $0x88] sm:$0xff] }
0x2520   : > { %4086 = vmatpush.bf16.msra.mxu0 %v4686_v17 }
0x2521   : > { %v3822_v25 = vmul.f32 1.442695, %v3821_v4 }
0x2523   : > { %5004 = vpow2.f32 %v3822_v25 }
0x2529   : > { %v5005_v10 = vpop.eup %5004 }
0x252a   : > { %v3824_v41 = vsel %vm735_vm0, %v5005_v10, 0.0 }
0x252b   : > { %v3825_v15 = vrot.slane %v3824_v41, 4 }
0x252d   : > { %v3826_v5 = vadd.f32 %v3825_v15, %v3824_v41 }
0x252f   : > { %v3827_v21 = vrot.slane %v3826_v5, 2 }
0x2531   : > { %v3828_v14 = vadd.f32 %v3827_v21, %v3826_v5  ;;  %v4690_v5 = vld [vmem:[%s6411_s14 + $0x8] sm:$0xff] }
0x2532   : > { %4124 = vmatpush.bf16.msrb.mxu1 %v4690_v5 }
0x2533   : > { %v3829_v43 = vrot.slane %v3828_v14, 1 }
0x2535   : > { %v3830_v42 = vadd.f32 %v3829_v43, %v3828_v14 }
0x2537   : > { %5006 = vrcp.f32 %v3830_v42 }
0x253d   : > { %v5007_v9 = vpop.eup %5006 }
0x253e   : > { %v3832_v33 = vmul.f32 %v5007_v9, %v5005_v10  ;;  %v4685_v10 = vld [vmem:[%s6407_s10 + $0x80] sm:$0xff] }
0x253f   : > { %4087 = vmatpush.bf16.msra.mxu0 %v4685_v10 }
0x2540   : > { %v3853_v46 = vpack.c.bf16 %v3832_v33, %v3832_v33 }
0x2542   : > { %4561 = vmatmul.msk.bf16.vlgmr.msra.gmra.mxu1 %vm735_vm0, %v3853_v46 }
0x25bf   : > { %v3882_v55 = vpop.f32.mrf.mxu1 }
0x25c0   : > { %v3891_v2 = vpack.c.bf16 %v3882_v55, %v3882_v55 }
0x25c2   : > { %4574 = vmatmul.msk.bf16.vlgmr.msra.gmra.mxu2 %vm757_vm1, %v3891_v2 }
0x25c7   : > { %v3884_v56 = vpop.f32.mrf.mxu1 }
0x2645   : > { %v3916_v44 = vpop.f32.mrf.mxu2 }
0x2646   : > { %v6339_v52 = vadd.f32 %v3916_v44, %v6242_v59  ;;  %v4683_v59 = vld [vmem:[%s6405_s8 + $0x40] sm:$0xff] }
0x2647   : > { %3988 = vmatpush.bf16.msra.mxu3 %v4683_v59 }
0x2648   : > { %v3921_v60 = vsel %vm757_vm1, %v6339_v52, 0.0 }
0x2649   : > { %3922 = vadd.xlane.f32.xlu1 %v3921_v60 }
0x264d   : > { %v3918_v57 = vpop.f32.mrf.mxu2 }
0x26bc   : > { %v3923_v32 = vpop.xlane.xlu1 %3922 }
0x26bd   : > { %v3924_v62 = vmul.f32 %v3923_v32, %v5190_v24 }
0x26bf   : > { %v3925_v8 = vsub.f32 %v6339_v52, %v3924_v62 }
0x26c1   : > { %v3926_v3 = vmul.f32 %v3925_v8, %v3925_v8 }
0x26c3   : > { %v3927_v1 = vsel %vm757_vm1, %v3926_v3, 0.0 }
0x26c4   : > { %3928 = vadd.xlane.f32.xlu0 %v3927_v1 }
0x2737   : > { %v3929_v37 = vpop.xlane.xlu0 %3928 }
0x2738   : > { %v3930_v45 = vmul.f32 %v3929_v37, %v5190_v24  ;;  %v4934_v24 = vld [vmem:[%s6410_s13 + $0xa] ss:$0 sm:$0xff] }
0x273a   : > { %v3931_v12 = vadd.f32 1e-05, %v3930_v45 }
0x273c   : > { %5008 = vrsqrt.f32 %v3931_v12  ;;  %vm3938_vm10 = vweird.f32 %v3931_v12 }
0x2742   : > { %v5009_v53 = vpop.eup %5008 }
0x2743   : > { %v3933_v31 = vmul.f32 %v5009_v53, %v3931_v12  ;;  %vm3939_vm9 = vweird.f32 %v5009_v53  ;;  %v4689_v12 = vld [vmem:[%s6411_s14] sm:$0xff] }
0x2744   : > { %vm3940_vm8 = vmor %vm3938_vm10, %vm3939_vm9  ;;  %4125 = vmatpush.bf16.msrb.mxu1 %v4689_v12 }
0x2745   : > { %v3934_v61 = vmul.f32 %v5009_v53, %v3933_v31 }
0x2747   : > { %v3935_v30 = vmul.f32 0.5, %v3934_v61 }
0x2749   : > { %v3936_v22 = vsub.f32 1.5, %v3935_v30 }
0x274b   : > { %v3937_v6 = vmul.f32 %v5009_v53, %v3936_v22 }
0x274d   : > { %v3941_v39 = vsel %vm3940_vm8, %v5009_v53, %v3937_v6  ;;  %v4936_v53 = vld [vmem:[%s6408_s11 + $0x4] ss:$0 sm:$0xff] }
0x274e   : > { %v3942_v63 = vmul.f32 %v3941_v39, %v3925_v8 }
0x2750   : > { %v3948_v35 = vmul.f32 %v4933_v47, %v3942_v63  ;;  %v4937_v47 = vld [vmem:[%s6412_s15] ss:$0 sm:$0xff] }
0x2752   : > { %v3954_v48 = vadd.f32 %v4934_v24, %v3948_v35 }
0x2754   : > { %v3960_v40 = vpack.c.bf16 %v3954_v48, %v3954_v48 }
0x2756   : > { %4590 = vmatmul.msk.bf16.vlgmr.msra.gmra.mxu3 %vm757_vm1, %v3960_v40 }
0x27d9   : > { %v3990_v26 = vpop.f32.mrf.mxu3 }
0x27da   : > { %v3991_v51 = vadd.f32 %v4935_v16, %v3990_v26 }
0x27dc   : > { %v3995_v58 = vmul.f32 0.70710677, %v3991_v51  ;;  %v3994_v49 = vmul.f32 0.5, %v3991_v51 }
0x27de   : > { %v3996_v34 = vmul.f32 %v3995_v58, %v3995_v58 }
0x27e0   : > { %v3997_v0 = vmin.f32 %v3996_v34, 16.0 }
0x27e1   : > { %v3992_v7 = vpop.f32.mrf.mxu3 }
0x27e2   : > { %v3998_v20 = vmul.f32 2.1237322e-06, %v3997_v0  ;;  %v4009_v36 = vmul.f32 3.8918573e-05, %v3997_v0 }
0x27e4   : > { %v3999_v23 = vadd.f32 0.00028619796, %v3998_v20  ;;  %v4010_v29 = vadd.f32 0.001143296, %v4009_v36 }
0x27e6   : > { %v4000_v54 = vmul.f32 %v3999_v23, %v3997_v0  ;;  %v4011_v27 = vmul.f32 %v4010_v29, %v3997_v0 }
0x27e8   : > { %v4012_v11 = vadd.f32 0.014752088, %v4011_v27  ;;  %v4001_v18 = vadd.f32 0.0036580483, %v4000_v54 }
0x27ea   : > { %v4013_v13 = vmul.f32 %v4012_v11, %v3997_v0  ;;  %v4002_v25 = vmul.f32 %v4001_v18, %v3997_v0 }
0x27ec   : > { %v4014_v4 = vadd.f32 0.112945676, %v4013_v13  ;;  %v4003_v15 = vadd.f32 0.05243302, %v4002_v25 }
0x27ee   : > { %v4015_v19 = vmul.f32 %v4014_v4, %v3997_v0  ;;  %v4004_v43 = vmul.f32 %v4003_v15, %v3997_v0 }
0x27f0   : > { %v4016_v41 = vadd.f32 0.4994258, %v4015_v19  ;;  %v4005_v42 = vadd.f32 0.18741608, %v4004_v43 }
0x27f2   : > { %v4017_v21 = vmul.f32 %v4016_v41, %v3997_v0  ;;  %v4006_v33 = vmul.f32 %v4005_v42, %v3997_v0 }
0x27f4   : > { %v4018_v14 = vadd.f32 1.0, %v4017_v21  ;;  %v4007_v2 = vadd.f32 1.1283791, %v4006_v33 }
0x27f6   : > { %5010 = vrcp.f32 %v4018_v14  ;;  %v4030_v55 = vand.u32 2147483648, %v4018_v14  ;;  %v4028_v44 = vand.u32 2147483647, %v4018_v14  ;;  %vm4024_vm7 = vweird.f32 %v4018_v14 }
0x27f7   : > { %v4008_v32 = vmul.f32 %v4007_v2, %v3995_v58 }
0x27f8   : > { %v4031_v57 = vor.u32 1.1754944e-38, %v4030_v55  ;;  %vm4029_vm15 = vcmp.eq.f32.partialorder %v4028_v44, 8.507059e+37 }
0x27fc   : > { %v5011_v9 = vpop.eup %5010 }
0x27fd   : > { %v4020_v46 = vmul.f32 %v5011_v9, %v4018_v14  ;;  %vm4025_vm6 = vweird.f32 %v5011_v9 }
0x27fe   : > { %vm4026_vm4 = vmor %vm4024_vm7, %vm4025_vm6 }
0x27ff   : > { %v4021_v38 = vsub.f32 1.0, %v4020_v46 }
0x2801   : > { %v4022_v56 = vmul.f32 %v5011_v9, %v4021_v38 }
0x2803   : > { %v4023_v60 = vadd.f32 %v5011_v9, %v4022_v56 }
0x2805   : > { %v4027_v62 = vsel %vm4026_vm4, %v5011_v9, %v4023_v60 }
0x2806   : > { %v4032_v8 = vsel %vm4029_vm15, %v4031_v57, %v4027_v62 }
0x2807   : > { %v4033_v3 = vmul.f32 %v4032_v8, %v4008_v32 }
0x2809   : > { %v4591_v1 = vclamps-f32 %v4033_v3, 1.0 }
0x280b   : > { %v4036_v59 = vadd.f32 1.0, %v4591_v1 }
0x280d   : > { %v4037_v37 = vmul.f32 %v4036_v59, %v3994_v49 }
0x280f   : > { %v4047_v45 = vpack.c.bf16 %v4037_v37, %v4037_v37 }
0x2811   : > { %4617 = vmatmul.msk.bf16.vlgmr.msra.gmra.mxu0 %vm735_vm0, %v4047_v45 }
0x288e   : > { %v4089_v31 = vpop.f32.mrf.mxu0 }
0x288f   : > { %v4090_v61 = vadd.f32 %v4936_v53, %v4089_v31 }
0x2891   : > { %v4093_v30 = vadd.f32 %v4090_v61, %v6339_v52 }
0x2893   : > { %v4098_v22 = vpack.c.bf16 %v4093_v30, %v4093_v30 }
0x2895   : > { %4626 = vmatmul.msk.bf16.vlgmr.msrb.gmra.mxu1 %vm757_vm1, %v4098_v22 }
0x2896   : > { %v4091_v6 = vpop.f32.mrf.mxu0 }
0x2912   : > { %v4127_v39 = vpop.f32.mrf.mxu1 }
0x2913   : > { %v4128_v63 = vadd.f32 %v4937_v47, %v4127_v39 }
0x2915   : > { %v4627_v24 = vmul.f32 -1.442695, %v4128_v63 }
0x2917   : > { %5012 = vpow2.f32 %v4627_v24 }
0x291a   : > { %v4129_v35 = vpop.f32.mrf.mxu1 }
0x291d   : > { %v5013_v48 = vpop.eup %5012 }
0x291e   : > { %v4134_v40 = vadd.f32 1.0, %v5013_v48 }
0x2920   : > { %5014 = vrcp.f32 %v4134_v40  ;;  %v4146_v51 = vand.u32 2147483648, %v4134_v40  ;;  %v4144_v34 = vand.u32 2147483647, %v4134_v40  ;;  %vm4140_vm1 = vweird.f32 %v4134_v40 }
0x2922   : > { %v4147_v7 = vor.u32 1.1754944e-38, %v4146_v51  ;;  %vm4145_vm3 = vcmp.eq.f32.partialorder %v4144_v34, 8.507059e+37 }
0x2926   : > { %v5015_v16 = vpop.eup %5014 }
0x2927   : > { %v4136_v26 = vmul.f32 %v5015_v16, %v4134_v40  ;;  %vm4141_vm0 = vweird.f32 %v5015_v16 }
0x2928   : > { %vm4142_vm2 = vmor %vm4140_vm1, %vm4141_vm0 }
0x2929   : > { %v4137_v52 = vsub.f32 1.0, %v4136_v26 }
0x292b   : > { %v4138_v58 = vmul.f32 %v5015_v16, %v4137_v52 }
0x292d   : > { %v4139_v0 = vadd.f32 %v5015_v16, %v4138_v58 }
0x292f   : > { %v4143_v20 = vsel %vm4142_vm2, %v5015_v16, %v4139_v0 }
0x2930   : > { %v4148_v36 = vsel %vm4145_vm3, %v4147_v7, %v4143_v20 }
0x2931   : > { %v4151_v28 = vsel %vm4150_vm14, %v4128_v63, %v4148_v36 }
0x2932   : > { %4153 = vst.msk [vmem:[%s654_s22] sm:$0xff] %vm4152_vm11, %v4151_v28 }
0x2933 PF: > { %s31_s2 = sadd.s32 1, %s5022_s2  }
0x2934   : > { %p28_p4 = scmp.ge.s32.totalorder %s31_s2, 4  }
0x2936   :  { %30 = sbr.rel (!%p28_p4) target bundleno = 10 (0xa), region = 185 }

</bundles_post_ra>
